<compile_context>
chip_gen: v5e
topology: v5e:2x2
jax: 0.10.0
libtpu: 0.0.40
codegen_flags: <defaults>
</compile_context>

<pallas_src>
import jax
import jax.numpy as jnp
from jax.experimental import pallas as pl
from jax.experimental.pallas import tpu as pltpu


# ----------------------------------------------------------------------------
# In-kernel math helpers (elementary ops only -> Mosaic-safe lowering)
# ----------------------------------------------------------------------------
def _erf(x):
    # Abramowitz & Stegun 7.1.26 rational approximation, |abs err| < 1.5e-7,
    # i.e. float32-accurate for GELU purposes (PyTorch nn.GELU uses exact erf).
    a1, a2, a3, a4, a5 = (0.254829592, -0.284496736, 1.421413741,
                          -1.453152027, 1.061405429)
    p = 0.3275911
    sgn = jnp.where(x >= 0.0, 1.0, -1.0)
    ax = jnp.abs(x)
    t = 1.0 / (1.0 + p * ax)
    poly = ((((a5 * t + a4) * t + a3) * t + a2) * t + a1) * t
    return sgn * (1.0 - poly * jnp.exp(-ax * ax))


def _gelu(x):
    return 0.5 * x * (1.0 + _erf(x * 0.7071067811865476))


# ----------------------------------------------------------------------------
# Fused kernel:  Conv_Doublet1(residual=True) -> Conv_Doublet2 -> (+ emb)
# One grid step == one batch sample.  Activations live in the canonical
# "padded-flat" layout: (C, Nf) with Nf = (H+2)*(W+2); channels on sublanes,
# the zero-padded flattened image on the 128-lane axis; pad positions hold 0.
# ----------------------------------------------------------------------------
def make_fused_upblock_kernel(H, W, compute_dtype):
    Wp = W + 2
    Nf = (H + 2) * Wp
    # Conv tap (i, j), i,j in {0,1,2}, needs X[q + (i-1)*Wp + (j-1)] for the
    # output stored at flat position q.  Realized as a static lane rotation
    # (roll result[q] = X[q - shift]  =>  shift = -(i-1)*Wp - (j-1)).
    # Wrap-around never reaches a valid output position, and pad columns are
    # re-masked to zero after every stage.
    shifts = [((1 - i) * Wp + (1 - j)) % Nf
              for i in range(3) for j in range(3)]

    def conv_gn(x, w_ref, g_ref, b_ref, mask):
        # x: (C_in, Nf) f32, canonical padded-flat (zeros at pad positions).
        taps = [x if s == 0 else pltpu.roll(x, s, axis=1) for s in shifts]
        patches = jnp.concatenate(taps, axis=0)              # (9*C_in, Nf)
        # Single K = 9*C_in matmul, bf16 operands, f32 accumulation (MXU).
        acc = jnp.dot(w_ref[...].astype(compute_dtype),
                      patches.astype(compute_dtype),
                      preferred_element_type=jnp.float32)    # (C_out, Nf)
        acc = acc * mask                                     # zero pad columns
        # GroupNorm(num_groups=1): biased stats over all valid (C, H, W)
        # elements of this sample, eps=1e-5, per-channel affine.  f32 stats.
        cnt = float(w_ref.shape[0] * H * W)
        mean = jnp.sum(acc, keepdims=True) * (1.0 / cnt)
        var = jnp.sum(jnp.square(acc - mean) * mask,
                      keepdims=True) * (1.0 / cnt)
        y = (acc - mean) * jax.lax.rsqrt(var + 1e-5)
        y = (y * g_ref[...] + b_ref[...]) * mask             # keep pads at 0
        return y

    def kernel(x_ref, mask_ref,
               w1_ref, g1_ref, b1_ref, w2_ref, g2_ref, b2_ref,
               w3_ref, g3_ref, b3_ref, w4_ref, g4_ref, b4_ref,
               emb_ref, o_ref):
        x = x_ref[...]                                       # (Cin, Nf) f32
        mask = mask_ref[...]                                 # (1, Nf)   f32

        # Conv_Doublet 1 (residual=True): gelu(gn(conv(gelu(gn(conv x)))) + x)
        h = _gelu(conv_gn(x, w1_ref, g1_ref, b1_ref, mask))
        h = _gelu(conv_gn(h, w2_ref, g2_ref, b2_ref, mask) + x)
        # Conv_Doublet 2 (residual=False): gn(conv(gelu(gn(conv h))))
        h = _gelu(conv_gn(h, w3_ref, g3_ref, b3_ref, mask))
        h = conv_gn(h, w4_ref, g4_ref, b4_ref, mask)
        # UpSample epilogue: + spatially-broadcast embedding.
        o_ref[...] = h + emb_ref[...]

    return kernel


def fused_upblock(xc, emb, params, *, compute_dtype=jnp.bfloat16):
    """xc: (B, Cin, H, W) f32 (post-upsample, post-concat, NCHW).
       emb: (B, Cout) f32.  Returns (B, Cout, H, W) f32."""
    B, Cin, H, W = xc.shape
    Cout = params["w4"].shape[0]
    Wp, Hp = W + 2, H + 2
    Nf = Hp * Wp

    # Canonical padded-flat layout.  NCHW is already channel-major, so this is
    # just a zero-pad + reshape that XLA fuses with the upsample/concat glue.
    x_flat = jnp.pad(xc, ((0, 0), (0, 0), (1, 1), (1, 1))).reshape(B, Cin, Nf)
    # Validity mask of the canonical layout (1 inside the image, 0 on pads).
    mask = jnp.pad(jnp.ones((H, W), jnp.float32),
                   ((1, 1), (1, 1))).reshape(1, Nf)

    def cvec(v):                      # (C,) -> (C, 1): lane-broadcastable
        return v.reshape(-1, 1)

    wdt = compute_dtype
    inputs = [
        x_flat, mask,
        params["w1"].astype(wdt), cvec(params["g1"]), cvec(params["b1"]),
        params["w2"].astype(wdt), cvec(params["g2"]), cvec(params["b2"]),
        params["w3"].astype(wdt), cvec(params["g3"]), cvec(params["b3"]),
        params["w4"].astype(wdt), cvec(params["g4"]), cvec(params["b4"]),
        emb.reshape(B, Cout, 1),
    ]
    in_specs = ([pl.BlockSpec((None, Cin, Nf), lambda b: (b, 0, 0)),
                 pl.BlockSpec((1, Nf), lambda b: (0, 0))]
                + [pl.BlockSpec(a.shape, lambda b: (0, 0))
                   for a in inputs[2:14]]
                + [pl.BlockSpec((None, Cout, 1), lambda b: (b, 0, 0))])

    out = pl.pallas_call(
        make_fused_upblock_kernel(H, W, compute_dtype),
        out_shape=jax.ShapeDtypeStruct((B, Cout, Nf), jnp.float32),
        grid=(B,),
        in_specs=in_specs,
        out_specs=pl.BlockSpec((None, Cout, Nf), lambda b: (b, 0, 0)),
        compiler_params=pltpu.CompilerParams(
            dimension_semantics=("parallel",)),
    )(*inputs)

    # Strip the canonical padding -> NCHW output.
    return out.reshape(B, Cout, Hp, Wp)[:, :, 1:H + 1, 1:W + 1]


# ----------------------------------------------------------------------------
# XLA glue: nn.Upsample(scale_factor=2, mode='bilinear', align_corners=True)
# ----------------------------------------------------------------------------
def bilinear_upsample_2x_align_corners(x):   # x: (B, C, H, W)
    B, C, H, W = x.shape
    Ho, Wo = 2 * H, 2 * W

    def grid1d(n_in, n_out):
        if n_in == 1:
            z = jnp.zeros((n_out,), jnp.float32)
            return z, z.astype(jnp.int32), z.astype(jnp.int32)
        src = jnp.arange(n_out, dtype=jnp.float32) * ((n_in - 1) / (n_out - 1))
        i0 = jnp.clip(jnp.floor(src).astype(jnp.int32), 0, n_in - 1)
        i1 = jnp.clip(i0 + 1, 0, n_in - 1)
        return src - i0.astype(jnp.float32), i0, i1

    fy, y0, y1 = grid1d(H, Ho)
    fx, x0, x1 = grid1d(W, Wo)
    rows = (x[:, :, y0, :] * (1.0 - fy)[None, None, :, None]
            + x[:, :, y1, :] * fy[None, None, :, None])
    out = (rows[:, :, :, x0] * (1.0 - fx)[None, None, None, :]
           + rows[:, :, :, x1] * fx[None, None, None, :])
    return out


# ----------------------------------------------------------------------------
# UpSample.forward
# ----------------------------------------------------------------------------
@jax.jit
def upsample_forward(x, residual_x, t, params):
    # 1) bilinear 2x upsample, 2) concat skip connection on the channel axis.
    x_up = bilinear_upsample_2x_align_corners(x)            # (B, Cx, 2H, 2W)
    xc = jnp.concatenate([residual_x, x_up], axis=1)        # (B, Cin, 2H, 2W)
    # Embedding_Model: SiLU -> Linear (tiny GEMM, plain XLA).
    s = t * jax.nn.sigmoid(t)
    emb = s @ params["emb_w"] + params["emb_b"]              # (B, Cout)
    # Fused Conv_Doublet1 + Conv_Doublet2 + (+ emb) Pallas kernel.
    return fused_upblock(xc, emb, params)                    # (B, Cout, 2H, 2W)


# ----------------------------------------------------------------------------
# Deterministic parameter init + example run
# ----------------------------------------------------------------------------
if __name__ == "__main__":
    key = jax.random.PRNGKey(0)
    B, Cx, H0, W0 = 2, 8, 8, 8      # input feature map (pre-upsample)
    Cres = 8                        # skip-connection channels
    Cin = Cx + Cres                 # in_channel_size after concat = 16
    Cmid2 = Cin // 2                # 8
    Cout = 8                        # out_channel_size
    E = 100                         # embedding_dimensions (module default)

    ks = jax.random.split(key, 10)
    x = jax.random.normal(ks[0], (B, Cx, H0, W0), jnp.float32)
    residual_x = jax.random.normal(ks[1], (B, Cres, 2 * H0, 2 * W0), jnp.float32)
    t = jax.random.normal(ks[2], (B, E), jnp.float32)

    def wconv(k, cin, cout):
        # flattened 3x3 conv weight (no bias):
        #   w[co, kk*cin + ci] == W_torch[co, ci, kk // 3, kk % 3]
        return jax.random.normal(k, (cout, 9 * cin), jnp.float32) * 0.05

    params = dict(
        w1=wconv(ks[3], Cin, Cin),
        g1=jnp.ones((Cin,), jnp.float32), b1=jnp.zeros((Cin,), jnp.float32),
        w2=wconv(ks[4], Cin, Cin),
        g2=jnp.ones((Cin,), jnp.float32), b2=jnp.zeros((Cin,), jnp.float32),
        w3=wconv(ks[5], Cin, Cmid2),
        g3=jnp.ones((Cmid2,), jnp.float32), b3=jnp.zeros((Cmid2,), jnp.float32),
        w4=wconv(ks[6], Cmid2, Cout),
        g4=jnp.ones((Cout,), jnp.float32), b4=jnp.zeros((Cout,), jnp.float32),
        emb_w=jax.random.normal(ks[7], (E, Cout), jnp.float32) * 0.05,
        emb_b=jax.random.normal(ks[8], (Cout,), jnp.float32) * 0.05,
    )

    out = upsample_forward(x, residual_x, t, params)
    jax.block_until_ready(out)
    assert out.shape == (B, Cout, 2 * H0, 2 * W0), out.shape
    print("KERNEL_OK")
</pallas_src>

<mosaic_0001>
module attributes {stable_mosaic.version = 11 : i64} {
  func.func @kernel(%arg0: i32, %arg1: memref<1x16x324xf32, #tpu.memory_space<vmem>>, %arg2: memref<1x324xf32, #tpu.memory_space<vmem>>, %arg3: memref<16x144xbf16, #tpu.memory_space<vmem>>, %arg4: memref<16x1xf32, #tpu.memory_space<vmem>>, %arg5: memref<16x1xf32, #tpu.memory_space<vmem>>, %arg6: memref<16x144xbf16, #tpu.memory_space<vmem>>, %arg7: memref<16x1xf32, #tpu.memory_space<vmem>>, %arg8: memref<16x1xf32, #tpu.memory_space<vmem>>, %arg9: memref<8x144xbf16, #tpu.memory_space<vmem>>, %arg10: memref<8x1xf32, #tpu.memory_space<vmem>>, %arg11: memref<8x1xf32, #tpu.memory_space<vmem>>, %arg12: memref<8x72xbf16, #tpu.memory_space<vmem>>, %arg13: memref<8x1xf32, #tpu.memory_space<vmem>>, %arg14: memref<8x1xf32, #tpu.memory_space<vmem>>, %arg15: memref<1x8x1xf32, #tpu.memory_space<vmem>>, %arg16: memref<1x8x324xf32, #tpu.memory_space<vmem>>) attributes {dimension_semantics = [#tpu.dimension_semantics<parallel>], iteration_bounds = array<i64: 2>, scalar_prefetch = 0 : i64, scratch_operands = 0 : i64, tpu.core_type = #tpu.core_type<tc>, window_params = [{transform_indices = @transform_0, window_bounds = array<i64: 1, 16, 324>}, {pipeline_mode = #tpu.pipeline_mode<synchronous>, transform_indices = @transform_1, window_bounds = array<i64: 1, 324>}, {pipeline_mode = #tpu.pipeline_mode<synchronous>, transform_indices = @transform_2, window_bounds = array<i64: 16, 144>}, {pipeline_mode = #tpu.pipeline_mode<synchronous>, transform_indices = @transform_3, window_bounds = array<i64: 16, 1>}, {pipeline_mode = #tpu.pipeline_mode<synchronous>, transform_indices = @transform_4, window_bounds = array<i64: 16, 1>}, {pipeline_mode = #tpu.pipeline_mode<synchronous>, transform_indices = @transform_5, window_bounds = array<i64: 16, 144>}, {pipeline_mode = #tpu.pipeline_mode<synchronous>, transform_indices = @transform_6, window_bounds = array<i64: 16, 1>}, {pipeline_mode = #tpu.pipeline_mode<synchronous>, transform_indices = @transform_7, window_bounds = array<i64: 16, 1>}, {pipeline_mode = #tpu.pipeline_mode<synchronous>, transform_indices = @transform_8, window_bounds = array<i64: 8, 144>}, {pipeline_mode = #tpu.pipeline_mode<synchronous>, transform_indices = @transform_9, window_bounds = array<i64: 8, 1>}, {pipeline_mode = #tpu.pipeline_mode<synchronous>, transform_indices = @transform_10, window_bounds = array<i64: 8, 1>}, {pipeline_mode = #tpu.pipeline_mode<synchronous>, transform_indices = @transform_11, window_bounds = array<i64: 8, 72>}, {pipeline_mode = #tpu.pipeline_mode<synchronous>, transform_indices = @transform_12, window_bounds = array<i64: 8, 1>}, {pipeline_mode = #tpu.pipeline_mode<synchronous>, transform_indices = @transform_13, window_bounds = array<i64: 8, 1>}, {transform_indices = @transform_14, window_bounds = array<i64: 1, 8, 1>}, {transform_indices = @transform_15, window_bounds = array<i64: 1, 8, 324>}]} {
    %c0 = arith.constant 0 : index
    %c0_0 = arith.constant 0 : index
    %c0_1 = arith.constant 0 : index
    %0 = vector.load %arg1[%c0, %c0_0, %c0_1] : memref<1x16x324xf32, #tpu.memory_space<vmem>>, vector<1x16x324xf32>
    %1 = vector.shape_cast %0 : vector<1x16x324xf32> to vector<16x324xf32>
    %c0_2 = arith.constant 0 : index
    %c0_3 = arith.constant 0 : index
    %2 = vector.load %arg2[%c0_2, %c0_3] : memref<1x324xf32, #tpu.memory_space<vmem>>, vector<1x324xf32>
    %c19_i32 = arith.constant 19 : i32
    %3 = tpu.dynamic_rotate %1 by %c19_i32 dim 1 : vector<16x324xf32>, i32 -> vector<16x324xf32>
    %c18_i32 = arith.constant 18 : i32
    %4 = tpu.dynamic_rotate %1 by %c18_i32 dim 1 : vector<16x324xf32>, i32 -> vector<16x324xf32>
    %c17_i32 = arith.constant 17 : i32
    %5 = tpu.dynamic_rotate %1 by %c17_i32 dim 1 : vector<16x324xf32>, i32 -> vector<16x324xf32>
    %c1_i32 = arith.constant 1 : i32
    %6 = tpu.dynamic_rotate %1 by %c1_i32 dim 1 : vector<16x324xf32>, i32 -> vector<16x324xf32>
    %c323_i32 = arith.constant 323 : i32
    %7 = tpu.dynamic_rotate %1 by %c323_i32 dim 1 : vector<16x324xf32>, i32 -> vector<16x324xf32>
    %c307_i32 = arith.constant 307 : i32
    %8 = tpu.dynamic_rotate %1 by %c307_i32 dim 1 : vector<16x324xf32>, i32 -> vector<16x324xf32>
    %c306_i32 = arith.constant 306 : i32
    %9 = tpu.dynamic_rotate %1 by %c306_i32 dim 1 : vector<16x324xf32>, i32 -> vector<16x324xf32>
    %c305_i32 = arith.constant 305 : i32
    %10 = tpu.dynamic_rotate %1 by %c305_i32 dim 1 : vector<16x324xf32>, i32 -> vector<16x324xf32>
    %11 = tpu.concatenate %3, %4, %5, %6, %1, %7, %8, %9, %10 in 0 : vector<16x324xf32>, vector<16x324xf32>, vector<16x324xf32>, vector<16x324xf32>, vector<16x324xf32>, vector<16x324xf32>, vector<16x324xf32>, vector<16x324xf32>, vector<16x324xf32> -> vector<144x324xf32>
    %c0_4 = arith.constant 0 : index
    %c0_5 = arith.constant 0 : index
    %12 = vector.load %arg3[%c0_4, %c0_5] : memref<16x144xbf16, #tpu.memory_space<vmem>>, vector<16x144xbf16>
    %13 = arith.truncf %11 : vector<144x324xf32> to vector<144x324xbf16>
    %cst = arith.constant dense<0.000000e+00> : vector<16x324xf32>
    %14 = tpu.matmul %12, %13, %cst {dimension_numbers = #tpu.dot_dimension_numbers<[1], [0], [0], [1], [0, 0, 1, 1], [], []>} : vector<16x144xbf16>, vector<144x324xbf16>, vector<16x324xf32> -> vector<16x324xf32>
    %15 = vector.broadcast %2 : vector<1x324xf32> to vector<16x324xf32>
    %16 = arith.mulf %14, %15 : vector<16x324xf32>
    %17 = vector.shape_cast %16 : vector<16x324xf32> to vector<1x16x324xf32>
    %cst_6 = arith.constant dense<0.000000e+00> : vector<1xf32>
    %18 = vector.multi_reduction <add>, %17, %cst_6 [1, 2] : vector<1x16x324xf32> to vector<1xf32>
    %19 = vector.shape_cast %18 : vector<1xf32> to vector<1x1x1xf32>
    %20 = vector.extract %19[0, 0, 0] : f32 from vector<1x1x1xf32>
    %21 = vector.broadcast %20 : f32 to vector<1x1xf32>
    %cst_7 = arith.constant 2.44140625E-4 : f32
    %22 = vector.broadcast %cst_7 : f32 to vector<1x1xf32>
    %23 = arith.mulf %21, %22 : vector<1x1xf32>
    %24 = vector.broadcast %23 : vector<1x1xf32> to vector<16x324xf32>
    %25 = arith.subf %16, %24 : vector<16x324xf32>
    %26 = arith.mulf %25, %25 : vector<16x324xf32>
    %27 = vector.broadcast %2 : vector<1x324xf32> to vector<16x324xf32>
    %28 = arith.mulf %26, %27 : vector<16x324xf32>
    %29 = vector.shape_cast %28 : vector<16x324xf32> to vector<1x16x324xf32>
    %cst_8 = arith.constant dense<0.000000e+00> : vector<1xf32>
    %30 = vector.multi_reduction <add>, %29, %cst_8 [1, 2] : vector<1x16x324xf32> to vector<1xf32>
    %31 = vector.shape_cast %30 : vector<1xf32> to vector<1x1x1xf32>
    %32 = vector.extract %31[0, 0, 0] : f32 from vector<1x1x1xf32>
    %33 = vector.broadcast %32 : f32 to vector<1x1xf32>
    %cst_9 = arith.constant 2.44140625E-4 : f32
    %34 = vector.broadcast %cst_9 : f32 to vector<1x1xf32>
    %35 = arith.mulf %33, %34 : vector<1x1xf32>
    %36 = vector.broadcast %23 : vector<1x1xf32> to vector<16x324xf32>
    %37 = arith.subf %16, %36 : vector<16x324xf32>
    %cst_10 = arith.constant 9.99999974E-6 : f32
    %38 = vector.broadcast %cst_10 : f32 to vector<1x1xf32>
    %39 = arith.addf %35, %38 : vector<1x1xf32>
    %40 = math.rsqrt %39 : vector<1x1xf32>
    %41 = vector.broadcast %40 : vector<1x1xf32> to vector<16x324xf32>
    %42 = arith.mulf %37, %41 : vector<16x324xf32>
    %c0_11 = arith.constant 0 : index
    %c0_12 = arith.constant 0 : index
    %43 = vector.load %arg4[%c0_11, %c0_12] : memref<16x1xf32, #tpu.memory_space<vmem>>, vector<16x1xf32>
    %44 = vector.broadcast %43 : vector<16x1xf32> to vector<16x324xf32>
    %45 = arith.mulf %42, %44 : vector<16x324xf32>
    %c0_13 = arith.constant 0 : index
    %c0_14 = arith.constant 0 : index
    %46 = vector.load %arg5[%c0_13, %c0_14] : memref<16x1xf32, #tpu.memory_space<vmem>>, vector<16x1xf32>
    %47 = vector.broadcast %46 : vector<16x1xf32> to vector<16x324xf32>
    %48 = arith.addf %45, %47 : vector<16x324xf32>
    %49 = vector.broadcast %2 : vector<1x324xf32> to vector<16x324xf32>
    %50 = arith.mulf %48, %49 : vector<16x324xf32>
    %cst_15 = arith.constant 5.000000e-01 : f32
    %51 = vector.broadcast %cst_15 : f32 to vector<16x324xf32>
    %52 = arith.mulf %51, %50 : vector<16x324xf32>
    %cst_16 = arith.constant 0.707106769 : f32
    %53 = vector.broadcast %cst_16 : f32 to vector<16x324xf32>
    %54 = arith.mulf %50, %53 : vector<16x324xf32>
    %cst_17 = arith.constant 0.000000e+00 : f32
    %55 = vector.broadcast %cst_17 : f32 to vector<16x324xf32>
    %56 = arith.cmpf oge, %54, %55 : vector<16x324xf32>
    %cst_18 = arith.constant 1.000000e+00 : f32
    %cst_19 = arith.constant -1.000000e+00 : f32
    %57 = vector.broadcast %cst_18 : f32 to vector<16x324xf32>
    %58 = vector.broadcast %cst_19 : f32 to vector<16x324xf32>
    %59 = arith.select %56, %57, %58 : vector<16x324xi1>, vector<16x324xf32>
    %60 = math.absf %54 : vector<16x324xf32>
    %cst_20 = arith.constant 0.327591091 : f32
    %61 = vector.broadcast %cst_20 : f32 to vector<16x324xf32>
    %62 = arith.mulf %61, %60 : vector<16x324xf32>
    %cst_21 = arith.constant 1.000000e+00 : f32
    %63 = vector.broadcast %cst_21 : f32 to vector<16x324xf32>
    %64 = arith.addf %63, %62 : vector<16x324xf32>
    %cst_22 = arith.constant 1.000000e+00 : f32
    %65 = vector.broadcast %cst_22 : f32 to vector<16x324xf32>
    %66 = arith.divf %65, %64 : vector<16x324xf32>
    %cst_23 = arith.constant 1.06140542 : f32
    %67 = vector.broadcast %cst_23 : f32 to vector<16x324xf32>
    %68 = arith.mulf %67, %66 : vector<16x324xf32>
    %cst_24 = arith.constant -1.45315206 : f32
    %69 = vector.broadcast %cst_24 : f32 to vector<16x324xf32>
    %70 = arith.addf %68, %69 : vector<16x324xf32>
    %71 = arith.mulf %70, %66 : vector<16x324xf32>
    %cst_25 = arith.constant 1.42141378 : f32
    %72 = vector.broadcast %cst_25 : f32 to vector<16x324xf32>
    %73 = arith.addf %71, %72 : vector<16x324xf32>
    %74 = arith.mulf %73, %66 : vector<16x324xf32>
    %cst_26 = arith.constant -0.284496725 : f32
    %75 = vector.broadcast %cst_26 : f32 to vector<16x324xf32>
    %76 = arith.addf %74, %75 : vector<16x324xf32>
    %77 = arith.mulf %76, %66 : vector<16x324xf32>
    %cst_27 = arith.constant 0.254829586 : f32
    %78 = vector.broadcast %cst_27 : f32 to vector<16x324xf32>
    %79 = arith.addf %77, %78 : vector<16x324xf32>
    %80 = arith.mulf %79, %66 : vector<16x324xf32>
    %cst_28 = arith.constant 0.000000e+00 : f32
    %81 = vector.broadcast %cst_28 : f32 to vector<16x324xf32>
    %82 = arith.subf %81, %60 : vector<16x324xf32>
    %83 = arith.mulf %82, %60 : vector<16x324xf32>
    %84 = math.exp %83 : vector<16x324xf32>
    %85 = arith.mulf %80, %84 : vector<16x324xf32>
    %cst_29 = arith.constant 1.000000e+00 : f32
    %86 = vector.broadcast %cst_29 : f32 to vector<16x324xf32>
    %87 = arith.subf %86, %85 : vector<16x324xf32>
    %88 = arith.mulf %59, %87 : vector<16x324xf32>
    %cst_30 = arith.constant 1.000000e+00 : f32
    %89 = vector.broadcast %cst_30 : f32 to vector<16x324xf32>
    %90 = arith.addf %89, %88 : vector<16x324xf32>
    %91 = arith.mulf %52, %90 : vector<16x324xf32>
    %c19_i32_31 = arith.constant 19 : i32
    %92 = tpu.dynamic_rotate %91 by %c19_i32_31 dim 1 : vector<16x324xf32>, i32 -> vector<16x324xf32>
    %c18_i32_32 = arith.constant 18 : i32
    %93 = tpu.dynamic_rotate %91 by %c18_i32_32 dim 1 : vector<16x324xf32>, i32 -> vector<16x324xf32>
    %c17_i32_33 = arith.constant 17 : i32
    %94 = tpu.dynamic_rotate %91 by %c17_i32_33 dim 1 : vector<16x324xf32>, i32 -> vector<16x324xf32>
    %c1_i32_34 = arith.constant 1 : i32
    %95 = tpu.dynamic_rotate %91 by %c1_i32_34 dim 1 : vector<16x324xf32>, i32 -> vector<16x324xf32>
    %c323_i32_35 = arith.constant 323 : i32
    %96 = tpu.dynamic_rotate %91 by %c323_i32_35 dim 1 : vector<16x324xf32>, i32 -> vector<16x324xf32>
    %c307_i32_36 = arith.constant 307 : i32
    %97 = tpu.dynamic_rotate %91 by %c307_i32_36 dim 1 : vector<16x324xf32>, i32 -> vector<16x324xf32>
    %c306_i32_37 = arith.constant 306 : i32
    %98 = tpu.dynamic_rotate %91 by %c306_i32_37 dim 1 : vector<16x324xf32>, i32 -> vector<16x324xf32>
    %c305_i32_38 = arith.constant 305 : i32
    %99 = tpu.dynamic_rotate %91 by %c305_i32_38 dim 1 : vector<16x324xf32>, i32 -> vector<16x324xf32>
    %100 = tpu.concatenate %92, %93, %94, %95, %91, %96, %97, %98, %99 in 0 : vector<16x324xf32>, vector<16x324xf32>, vector<16x324xf32>, vector<16x324xf32>, vector<16x324xf32>, vector<16x324xf32>, vector<16x324xf32>, vector<16x324xf32>, vector<16x324xf32> -> vector<144x324xf32>
    %c0_39 = arith.constant 0 : index
    %c0_40 = arith.constant 0 : index
    %101 = vector.load %arg6[%c0_39, %c0_40] : memref<16x144xbf16, #tpu.memory_space<vmem>>, vector<16x144xbf16>
    %102 = arith.truncf %100 : vector<144x324xf32> to vector<144x324xbf16>
    %cst_41 = arith.constant dense<0.000000e+00> : vector<16x324xf32>
    %103 = tpu.matmul %101, %102, %cst_41 {dimension_numbers = #tpu.dot_dimension_numbers<[1], [0], [0], [1], [0, 0, 1, 1], [], []>} : vector<16x144xbf16>, vector<144x324xbf16>, vector<16x324xf32> -> vector<16x324xf32>
    %104 = vector.broadcast %2 : vector<1x324xf32> to vector<16x324xf32>
    %105 = arith.mulf %103, %104 : vector<16x324xf32>
    %106 = vector.shape_cast %105 : vector<16x324xf32> to vector<1x16x324xf32>
    %cst_42 = arith.constant dense<0.000000e+00> : vector<1xf32>
    %107 = vector.multi_reduction <add>, %106, %cst_42 [1, 2] : vector<1x16x324xf32> to vector<1xf32>
    %108 = vector.shape_cast %107 : vector<1xf32> to vector<1x1x1xf32>
    %109 = vector.extract %108[0, 0, 0] : f32 from vector<1x1x1xf32>
    %110 = vector.broadcast %109 : f32 to vector<1x1xf32>
    %cst_43 = arith.constant 2.44140625E-4 : f32
    %111 = vector.broadcast %cst_43 : f32 to vector<1x1xf32>
    %112 = arith.mulf %110, %111 : vector<1x1xf32>
    %113 = vector.broadcast %112 : vector<1x1xf32> to vector<16x324xf32>
    %114 = arith.subf %105, %113 : vector<16x324xf32>
    %115 = arith.mulf %114, %114 : vector<16x324xf32>
    %116 = vector.broadcast %2 : vector<1x324xf32> to vector<16x324xf32>
    %117 = arith.mulf %115, %116 : vector<16x324xf32>
    %118 = vector.shape_cast %117 : vector<16x324xf32> to vector<1x16x324xf32>
    %cst_44 = arith.constant dense<0.000000e+00> : vector<1xf32>
    %119 = vector.multi_reduction <add>, %118, %cst_44 [1, 2] : vector<1x16x324xf32> to vector<1xf32>
    %120 = vector.shape_cast %119 : vector<1xf32> to vector<1x1x1xf32>
    %121 = vector.extract %120[0, 0, 0] : f32 from vector<1x1x1xf32>
    %122 = vector.broadcast %121 : f32 to vector<1x1xf32>
    %cst_45 = arith.constant 2.44140625E-4 : f32
    %123 = vector.broadcast %cst_45 : f32 to vector<1x1xf32>
    %124 = arith.mulf %122, %123 : vector<1x1xf32>
    %125 = vector.broadcast %112 : vector<1x1xf32> to vector<16x324xf32>
    %126 = arith.subf %105, %125 : vector<16x324xf32>
    %cst_46 = arith.constant 9.99999974E-6 : f32
    %127 = vector.broadcast %cst_46 : f32 to vector<1x1xf32>
    %128 = arith.addf %124, %127 : vector<1x1xf32>
    %129 = math.rsqrt %128 : vector<1x1xf32>
    %130 = vector.broadcast %129 : vector<1x1xf32> to vector<16x324xf32>
    %131 = arith.mulf %126, %130 : vector<16x324xf32>
    %c0_47 = arith.constant 0 : index
    %c0_48 = arith.constant 0 : index
    %132 = vector.load %arg7[%c0_47, %c0_48] : memref<16x1xf32, #tpu.memory_space<vmem>>, vector<16x1xf32>
    %133 = vector.broadcast %132 : vector<16x1xf32> to vector<16x324xf32>
    %134 = arith.mulf %131, %133 : vector<16x324xf32>
    %c0_49 = arith.constant 0 : index
    %c0_50 = arith.constant 0 : index
    %135 = vector.load %arg8[%c0_49, %c0_50] : memref<16x1xf32, #tpu.memory_space<vmem>>, vector<16x1xf32>
    %136 = vector.broadcast %135 : vector<16x1xf32> to vector<16x324xf32>
    %137 = arith.addf %134, %136 : vector<16x324xf32>
    %138 = vector.broadcast %2 : vector<1x324xf32> to vector<16x324xf32>
    %139 = arith.mulf %137, %138 : vector<16x324xf32>
    %140 = arith.addf %139, %1 : vector<16x324xf32>
    %cst_51 = arith.constant 5.000000e-01 : f32
    %141 = vector.broadcast %cst_51 : f32 to vector<16x324xf32>
    %142 = arith.mulf %141, %140 : vector<16x324xf32>
    %cst_52 = arith.constant 0.707106769 : f32
    %143 = vector.broadcast %cst_52 : f32 to vector<16x324xf32>
    %144 = arith.mulf %140, %143 : vector<16x324xf32>
    %cst_53 = arith.constant 0.000000e+00 : f32
    %145 = vector.broadcast %cst_53 : f32 to vector<16x324xf32>
    %146 = arith.cmpf oge, %144, %145 : vector<16x324xf32>
    %cst_54 = arith.constant 1.000000e+00 : f32
    %cst_55 = arith.constant -1.000000e+00 : f32
    %147 = vector.broadcast %cst_54 : f32 to vector<16x324xf32>
    %148 = vector.broadcast %cst_55 : f32 to vector<16x324xf32>
    %149 = arith.select %146, %147, %148 : vector<16x324xi1>, vector<16x324xf32>
    %150 = math.absf %144 : vector<16x324xf32>
    %cst_56 = arith.constant 0.327591091 : f32
    %151 = vector.broadcast %cst_56 : f32 to vector<16x324xf32>
    %152 = arith.mulf %151, %150 : vector<16x324xf32>
    %cst_57 = arith.constant 1.000000e+00 : f32
    %153 = vector.broadcast %cst_57 : f32 to vector<16x324xf32>
    %154 = arith.addf %153, %152 : vector<16x324xf32>
    %cst_58 = arith.constant 1.000000e+00 : f32
    %155 = vector.broadcast %cst_58 : f32 to vector<16x324xf32>
    %156 = arith.divf %155, %154 : vector<16x324xf32>
    %cst_59 = arith.constant 1.06140542 : f32
    %157 = vector.broadcast %cst_59 : f32 to vector<16x324xf32>
    %158 = arith.mulf %157, %156 : vector<16x324xf32>
    %cst_60 = arith.constant -1.45315206 : f32
    %159 = vector.broadcast %cst_60 : f32 to vector<16x324xf32>
    %160 = arith.addf %158, %159 : vector<16x324xf32>
    %161 = arith.mulf %160, %156 : vector<16x324xf32>
    %cst_61 = arith.constant 1.42141378 : f32
    %162 = vector.broadcast %cst_61 : f32 to vector<16x324xf32>
    %163 = arith.addf %161, %162 : vector<16x324xf32>
    %164 = arith.mulf %163, %156 : vector<16x324xf32>
    %cst_62 = arith.constant -0.284496725 : f32
    %165 = vector.broadcast %cst_62 : f32 to vector<16x324xf32>
    %166 = arith.addf %164, %165 : vector<16x324xf32>
    %167 = arith.mulf %166, %156 : vector<16x324xf32>
    %cst_63 = arith.constant 0.254829586 : f32
    %168 = vector.broadcast %cst_63 : f32 to vector<16x324xf32>
    %169 = arith.addf %167, %168 : vector<16x324xf32>
    %170 = arith.mulf %169, %156 : vector<16x324xf32>
    %cst_64 = arith.constant 0.000000e+00 : f32
    %171 = vector.broadcast %cst_64 : f32 to vector<16x324xf32>
    %172 = arith.subf %171, %150 : vector<16x324xf32>
    %173 = arith.mulf %172, %150 : vector<16x324xf32>
    %174 = math.exp %173 : vector<16x324xf32>
    %175 = arith.mulf %170, %174 : vector<16x324xf32>
    %cst_65 = arith.constant 1.000000e+00 : f32
    %176 = vector.broadcast %cst_65 : f32 to vector<16x324xf32>
    %177 = arith.subf %176, %175 : vector<16x324xf32>
    %178 = arith.mulf %149, %177 : vector<16x324xf32>
    %cst_66 = arith.constant 1.000000e+00 : f32
    %179 = vector.broadcast %cst_66 : f32 to vector<16x324xf32>
    %180 = arith.addf %179, %178 : vector<16x324xf32>
    %181 = arith.mulf %142, %180 : vector<16x324xf32>
    %c19_i32_67 = arith.constant 19 : i32
    %182 = tpu.dynamic_rotate %181 by %c19_i32_67 dim 1 : vector<16x324xf32>, i32 -> vector<16x324xf32>
    %c18_i32_68 = arith.constant 18 : i32
    %183 = tpu.dynamic_rotate %181 by %c18_i32_68 dim 1 : vector<16x324xf32>, i32 -> vector<16x324xf32>
    %c17_i32_69 = arith.constant 17 : i32
    %184 = tpu.dynamic_rotate %181 by %c17_i32_69 dim 1 : vector<16x324xf32>, i32 -> vector<16x324xf32>
    %c1_i32_70 = arith.constant 1 : i32
    %185 = tpu.dynamic_rotate %181 by %c1_i32_70 dim 1 : vector<16x324xf32>, i32 -> vector<16x324xf32>
    %c323_i32_71 = arith.constant 323 : i32
    %186 = tpu.dynamic_rotate %181 by %c323_i32_71 dim 1 : vector<16x324xf32>, i32 -> vector<16x324xf32>
    %c307_i32_72 = arith.constant 307 : i32
    %187 = tpu.dynamic_rotate %181 by %c307_i32_72 dim 1 : vector<16x324xf32>, i32 -> vector<16x324xf32>
    %c306_i32_73 = arith.constant 306 : i32
    %188 = tpu.dynamic_rotate %181 by %c306_i32_73 dim 1 : vector<16x324xf32>, i32 -> vector<16x324xf32>
    %c305_i32_74 = arith.constant 305 : i32
    %189 = tpu.dynamic_rotate %181 by %c305_i32_74 dim 1 : vector<16x324xf32>, i32 -> vector<16x324xf32>
    %190 = tpu.concatenate %182, %183, %184, %185, %181, %186, %187, %188, %189 in 0 : vector<16x324xf32>, vector<16x324xf32>, vector<16x324xf32>, vector<16x324xf32>, vector<16x324xf32>, vector<16x324xf32>, vector<16x324xf32>, vector<16x324xf32>, vector<16x324xf32> -> vector<144x324xf32>
    %c0_75 = arith.constant 0 : index
    %c0_76 = arith.constant 0 : index
    %191 = vector.load %arg9[%c0_75, %c0_76] : memref<8x144xbf16, #tpu.memory_space<vmem>>, vector<8x144xbf16>
    %192 = arith.truncf %190 : vector<144x324xf32> to vector<144x324xbf16>
    %cst_77 = arith.constant dense<0.000000e+00> : vector<8x324xf32>
    %193 = tpu.matmul %191, %192, %cst_77 {dimension_numbers = #tpu.dot_dimension_numbers<[1], [0], [0], [1], [0, 0, 1, 1], [], []>} : vector<8x144xbf16>, vector<144x324xbf16>, vector<8x324xf32> -> vector<8x324xf32>
    %194 = vector.broadcast %2 : vector<1x324xf32> to vector<8x324xf32>
    %195 = arith.mulf %193, %194 : vector<8x324xf32>
    %196 = vector.shape_cast %195 : vector<8x324xf32> to vector<1x8x324xf32>
    %cst_78 = arith.constant dense<0.000000e+00> : vector<1xf32>
    %197 = vector.multi_reduction <add>, %196, %cst_78 [1, 2] : vector<1x8x324xf32> to vector<1xf32>
    %198 = vector.shape_cast %197 : vector<1xf32> to vector<1x1x1xf32>
    %199 = vector.extract %198[0, 0, 0] : f32 from vector<1x1x1xf32>
    %200 = vector.broadcast %199 : f32 to vector<1x1xf32>
    %cst_79 = arith.constant 4.8828125E-4 : f32
    %201 = vector.broadcast %cst_79 : f32 to vector<1x1xf32>
    %202 = arith.mulf %200, %201 : vector<1x1xf32>
    %203 = vector.broadcast %202 : vector<1x1xf32> to vector<8x324xf32>
    %204 = arith.subf %195, %203 : vector<8x324xf32>
    %205 = arith.mulf %204, %204 : vector<8x324xf32>
    %206 = vector.broadcast %2 : vector<1x324xf32> to vector<8x324xf32>
    %207 = arith.mulf %205, %206 : vector<8x324xf32>
    %208 = vector.shape_cast %207 : vector<8x324xf32> to vector<1x8x324xf32>
    %cst_80 = arith.constant dense<0.000000e+00> : vector<1xf32>
    %209 = vector.multi_reduction <add>, %208, %cst_80 [1, 2] : vector<1x8x324xf32> to vector<1xf32>
    %210 = vector.shape_cast %209 : vector<1xf32> to vector<1x1x1xf32>
    %211 = vector.extract %210[0, 0, 0] : f32 from vector<1x1x1xf32>
    %212 = vector.broadcast %211 : f32 to vector<1x1xf32>
    %cst_81 = arith.constant 4.8828125E-4 : f32
    %213 = vector.broadcast %cst_81 : f32 to vector<1x1xf32>
    %214 = arith.mulf %212, %213 : vector<1x1xf32>
    %215 = vector.broadcast %202 : vector<1x1xf32> to vector<8x324xf32>
    %216 = arith.subf %195, %215 : vector<8x324xf32>
    %cst_82 = arith.constant 9.99999974E-6 : f32
    %217 = vector.broadcast %cst_82 : f32 to vector<1x1xf32>
    %218 = arith.addf %214, %217 : vector<1x1xf32>
    %219 = math.rsqrt %218 : vector<1x1xf32>
    %220 = vector.broadcast %219 : vector<1x1xf32> to vector<8x324xf32>
    %221 = arith.mulf %216, %220 : vector<8x324xf32>
    %c0_83 = arith.constant 0 : index
    %c0_84 = arith.constant 0 : index
    %222 = vector.load %arg10[%c0_83, %c0_84] : memref<8x1xf32, #tpu.memory_space<vmem>>, vector<8x1xf32>
    %223 = vector.broadcast %222 : vector<8x1xf32> to vector<8x324xf32>
    %224 = arith.mulf %221, %223 : vector<8x324xf32>
    %c0_85 = arith.constant 0 : index
    %c0_86 = arith.constant 0 : index
    %225 = vector.load %arg11[%c0_85, %c0_86] : memref<8x1xf32, #tpu.memory_space<vmem>>, vector<8x1xf32>
    %226 = vector.broadcast %225 : vector<8x1xf32> to vector<8x324xf32>
    %227 = arith.addf %224, %226 : vector<8x324xf32>
    %228 = vector.broadcast %2 : vector<1x324xf32> to vector<8x324xf32>
    %229 = arith.mulf %227, %228 : vector<8x324xf32>
    %cst_87 = arith.constant 5.000000e-01 : f32
    %230 = vector.broadcast %cst_87 : f32 to vector<8x324xf32>
    %231 = arith.mulf %230, %229 : vector<8x324xf32>
    %cst_88 = arith.constant 0.707106769 : f32
    %232 = vector.broadcast %cst_88 : f32 to vector<8x324xf32>
    %233 = arith.mulf %229, %232 : vector<8x324xf32>
    %cst_89 = arith.constant 0.000000e+00 : f32
    %234 = vector.broadcast %cst_89 : f32 to vector<8x324xf32>
    %235 = arith.cmpf oge, %233, %234 : vector<8x324xf32>
    %cst_90 = arith.constant 1.000000e+00 : f32
    %cst_91 = arith.constant -1.000000e+00 : f32
    %236 = vector.broadcast %cst_90 : f32 to vector<8x324xf32>
    %237 = vector.broadcast %cst_91 : f32 to vector<8x324xf32>
    %238 = arith.select %235, %236, %237 : vector<8x324xi1>, vector<8x324xf32>
    %239 = math.absf %233 : vector<8x324xf32>
    %cst_92 = arith.constant 0.327591091 : f32
    %240 = vector.broadcast %cst_92 : f32 to vector<8x324xf32>
    %241 = arith.mulf %240, %239 : vector<8x324xf32>
    %cst_93 = arith.constant 1.000000e+00 : f32
    %242 = vector.broadcast %cst_93 : f32 to vector<8x324xf32>
    %243 = arith.addf %242, %241 : vector<8x324xf32>
    %cst_94 = arith.constant 1.000000e+00 : f32
    %244 = vector.broadcast %cst_94 : f32 to vector<8x324xf32>
    %245 = arith.divf %244, %243 : vector<8x324xf32>
    %cst_95 = arith.constant 1.06140542 : f32
    %246 = vector.broadcast %cst_95 : f32 to vector<8x324xf32>
    %247 = arith.mulf %246, %245 : vector<8x324xf32>
    %cst_96 = arith.constant -1.45315206 : f32
    %248 = vector.broadcast %cst_96 : f32 to vector<8x324xf32>
    %249 = arith.addf %247, %248 : vector<8x324xf32>
    %250 = arith.mulf %249, %245 : vector<8x324xf32>
    %cst_97 = arith.constant 1.42141378 : f32
    %251 = vector.broadcast %cst_97 : f32 to vector<8x324xf32>
    %252 = arith.addf %250, %251 : vector<8x324xf32>
    %253 = arith.mulf %252, %245 : vector<8x324xf32>
    %cst_98 = arith.constant -0.284496725 : f32
    %254 = vector.broadcast %cst_98 : f32 to vector<8x324xf32>
    %255 = arith.addf %253, %254 : vector<8x324xf32>
    %256 = arith.mulf %255, %245 : vector<8x324xf32>
    %cst_99 = arith.constant 0.254829586 : f32
    %257 = vector.broadcast %cst_99 : f32 to vector<8x324xf32>
    %258 = arith.addf %256, %257 : vector<8x324xf32>
    %259 = arith.mulf %258, %245 : vector<8x324xf32>
    %cst_100 = arith.constant 0.000000e+00 : f32
    %260 = vector.broadcast %cst_100 : f32 to vector<8x324xf32>
    %261 = arith.subf %260, %239 : vector<8x324xf32>
    %262 = arith.mulf %261, %239 : vector<8x324xf32>
    %263 = math.exp %262 : vector<8x324xf32>
    %264 = arith.mulf %259, %263 : vector<8x324xf32>
    %cst_101 = arith.constant 1.000000e+00 : f32
    %265 = vector.broadcast %cst_101 : f32 to vector<8x324xf32>
    %266 = arith.subf %265, %264 : vector<8x324xf32>
    %267 = arith.mulf %238, %266 : vector<8x324xf32>
    %cst_102 = arith.constant 1.000000e+00 : f32
    %268 = vector.broadcast %cst_102 : f32 to vector<8x324xf32>
    %269 = arith.addf %268, %267 : vector<8x324xf32>
    %270 = arith.mulf %231, %269 : vector<8x324xf32>
    %c19_i32_103 = arith.constant 19 : i32
    %271 = tpu.dynamic_rotate %270 by %c19_i32_103 dim 1 : vector<8x324xf32>, i32 -> vector<8x324xf32>
    %c18_i32_104 = arith.constant 18 : i32
    %272 = tpu.dynamic_rotate %270 by %c18_i32_104 dim 1 : vector<8x324xf32>, i32 -> vector<8x324xf32>
    %c17_i32_105 = arith.constant 17 : i32
    %273 = tpu.dynamic_rotate %270 by %c17_i32_105 dim 1 : vector<8x324xf32>, i32 -> vector<8x324xf32>
    %c1_i32_106 = arith.constant 1 : i32
    %274 = tpu.dynamic_rotate %270 by %c1_i32_106 dim 1 : vector<8x324xf32>, i32 -> vector<8x324xf32>
    %c323_i32_107 = arith.constant 323 : i32
    %275 = tpu.dynamic_rotate %270 by %c323_i32_107 dim 1 : vector<8x324xf32>, i32 -> vector<8x324xf32>
    %c307_i32_108 = arith.constant 307 : i32
    %276 = tpu.dynamic_rotate %270 by %c307_i32_108 dim 1 : vector<8x324xf32>, i32 -> vector<8x324xf32>
    %c306_i32_109 = arith.constant 306 : i32
    %277 = tpu.dynamic_rotate %270 by %c306_i32_109 dim 1 : vector<8x324xf32>, i32 -> vector<8x324xf32>
    %c305_i32_110 = arith.constant 305 : i32
    %278 = tpu.dynamic_rotate %270 by %c305_i32_110 dim 1 : vector<8x324xf32>, i32 -> vector<8x324xf32>
    %279 = tpu.concatenate %271, %272, %273, %274, %270, %275, %276, %277, %278 in 0 : vector<8x324xf32>, vector<8x324xf32>, vector<8x324xf32>, vector<8x324xf32>, vector<8x324xf32>, vector<8x324xf32>, vector<8x324xf32>, vector<8x324xf32>, vector<8x324xf32> -> vector<72x324xf32>
    %c0_111 = arith.constant 0 : index
    %c0_112 = arith.constant 0 : index
    %280 = vector.load %arg12[%c0_111, %c0_112] : memref<8x72xbf16, #tpu.memory_space<vmem>>, vector<8x72xbf16>
    %281 = arith.truncf %279 : vector<72x324xf32> to vector<72x324xbf16>
    %cst_113 = arith.constant dense<0.000000e+00> : vector<8x324xf32>
    %282 = tpu.matmul %280, %281, %cst_113 {dimension_numbers = #tpu.dot_dimension_numbers<[1], [0], [0], [1], [0, 0, 1, 1], [], []>} : vector<8x72xbf16>, vector<72x324xbf16>, vector<8x324xf32> -> vector<8x324xf32>
    %283 = vector.broadcast %2 : vector<1x324xf32> to vector<8x324xf32>
    %284 = arith.mulf %282, %283 : vector<8x324xf32>
    %285 = vector.shape_cast %284 : vector<8x324xf32> to vector<1x8x324xf32>
    %cst_114 = arith.constant dense<0.000000e+00> : vector<1xf32>
    %286 = vector.multi_reduction <add>, %285, %cst_114 [1, 2] : vector<1x8x324xf32> to vector<1xf32>
    %287 = vector.shape_cast %286 : vector<1xf32> to vector<1x1x1xf32>
    %288 = vector.extract %287[0, 0, 0] : f32 from vector<1x1x1xf32>
    %289 = vector.broadcast %288 : f32 to vector<1x1xf32>
    %cst_115 = arith.constant 4.8828125E-4 : f32
    %290 = vector.broadcast %cst_115 : f32 to vector<1x1xf32>
    %291 = arith.mulf %289, %290 : vector<1x1xf32>
    %292 = vector.broadcast %291 : vector<1x1xf32> to vector<8x324xf32>
    %293 = arith.subf %284, %292 : vector<8x324xf32>
    %294 = arith.mulf %293, %293 : vector<8x324xf32>
    %295 = vector.broadcast %2 : vector<1x324xf32> to vector<8x324xf32>
    %296 = arith.mulf %294, %295 : vector<8x324xf32>
    %297 = vector.shape_cast %296 : vector<8x324xf32> to vector<1x8x324xf32>
    %cst_116 = arith.constant dense<0.000000e+00> : vector<1xf32>
    %298 = vector.multi_reduction <add>, %297, %cst_116 [1, 2] : vector<1x8x324xf32> to vector<1xf32>
    %299 = vector.shape_cast %298 : vector<1xf32> to vector<1x1x1xf32>
    %300 = vector.extract %299[0, 0, 0] : f32 from vector<1x1x1xf32>
    %301 = vector.broadcast %300 : f32 to vector<1x1xf32>
    %cst_117 = arith.constant 4.8828125E-4 : f32
    %302 = vector.broadcast %cst_117 : f32 to vector<1x1xf32>
    %303 = arith.mulf %301, %302 : vector<1x1xf32>
    %304 = vector.broadcast %291 : vector<1x1xf32> to vector<8x324xf32>
    %305 = arith.subf %284, %304 : vector<8x324xf32>
    %cst_118 = arith.constant 9.99999974E-6 : f32
    %306 = vector.broadcast %cst_118 : f32 to vector<1x1xf32>
    %307 = arith.addf %303, %306 : vector<1x1xf32>
    %308 = math.rsqrt %307 : vector<1x1xf32>
    %309 = vector.broadcast %308 : vector<1x1xf32> to vector<8x324xf32>
    %310 = arith.mulf %305, %309 : vector<8x324xf32>
    %c0_119 = arith.constant 0 : index
    %c0_120 = arith.constant 0 : index
    %311 = vector.load %arg13[%c0_119, %c0_120] : memref<8x1xf32, #tpu.memory_space<vmem>>, vector<8x1xf32>
    %312 = vector.broadcast %311 : vector<8x1xf32> to vector<8x324xf32>
    %313 = arith.mulf %310, %312 : vector<8x324xf32>
    %c0_121 = arith.constant 0 : index
    %c0_122 = arith.constant 0 : index
    %314 = vector.load %arg14[%c0_121, %c0_122] : memref<8x1xf32, #tpu.memory_space<vmem>>, vector<8x1xf32>
    %315 = vector.broadcast %314 : vector<8x1xf32> to vector<8x324xf32>
    %316 = arith.addf %313, %315 : vector<8x324xf32>
    %317 = vector.broadcast %2 : vector<1x324xf32> to vector<8x324xf32>
    %318 = arith.mulf %316, %317 : vector<8x324xf32>
    %c0_123 = arith.constant 0 : index
    %c0_124 = arith.constant 0 : index
    %c0_125 = arith.constant 0 : index
    %319 = vector.load %arg15[%c0_123, %c0_124, %c0_125] : memref<1x8x1xf32, #tpu.memory_space<vmem>>, vector<1x8x1xf32>
    %320 = vector.shape_cast %319 : vector<1x8x1xf32> to vector<8x1xf32>
    %321 = vector.broadcast %320 : vector<8x1xf32> to vector<8x324xf32>
    %322 = arith.addf %318, %321 : vector<8x324xf32>
    %c0_126 = arith.constant 0 : index
    %c0_127 = arith.constant 0 : index
    %c0_128 = arith.constant 0 : index
    %323 = vector.load %arg16[%c0_126, %c0_127, %c0_128] : memref<1x8x324xf32, #tpu.memory_space<vmem>>, vector<1x8x324xf32>
    %324 = vector.shape_cast %323 : vector<1x8x324xf32> to vector<8x324xf32>
    %325 = vector.shape_cast %322 : vector<8x324xf32> to vector<1x8x324xf32>
    tpu.vector_store %arg16[%c0_126, %c0_127, %c0_128], %325 {strides = array<i32>} : memref<1x8x324xf32, #tpu.memory_space<vmem>>, vector<1x8x324xf32>,
    return
  }
  func.func @transform_0(%arg0: i32) -> (i32, i32, i32) {
    %c0_i32 = arith.constant 0 : i32
    %c0_i32_0 = arith.constant 0 : i32
    %c0_i32_1 = arith.constant 0 : i32
    return %arg0, %c0_i32, %c0_i32_0 : i32, i32, i32
  }
  func.func @transform_1(%arg0: i32) -> (i32, i32) {
    %c0_i32 = arith.constant 0 : i32
    %c0_i32_0 = arith.constant 0 : i32
    %c0_i32_1 = arith.constant 0 : i32
    return %c0_i32, %c0_i32_0 : i32, i32
  }
  func.func @transform_2(%arg0: i32) -> (i32, i32) {
    %c0_i32 = arith.constant 0 : i32
    %c0_i32_0 = arith.constant 0 : i32
    %c0_i32_1 = arith.constant 0 : i32
    return %c0_i32, %c0_i32_0 : i32, i32
  }
  func.func @transform_3(%arg0: i32) -> (i32, i32) {
    %c0_i32 = arith.constant 0 : i32
    %c0_i32_0 = arith.constant 0 : i32
    %c0_i32_1 = arith.constant 0 : i32
    return %c0_i32, %c0_i32_0 : i32, i32
  }
  func.func @transform_4(%arg0: i32) -> (i32, i32) {
    %c0_i32 = arith.constant 0 : i32
    %c0_i32_0 = arith.constant 0 : i32
    %c0_i32_1 = arith.constant 0 : i32
    return %c0_i32, %c0_i32_0 : i32, i32
  }
  func.func @transform_5(%arg0: i32) -> (i32, i32) {
    %c0_i32 = arith.constant 0 : i32
    %c0_i32_0 = arith.constant 0 : i32
    %c0_i32_1 = arith.constant 0 : i32
    return %c0_i32, %c0_i32_0 : i32, i32
  }
  func.func @transform_6(%arg0: i32) -> (i32, i32) {
    %c0_i32 = arith.constant 0 : i32
    %c0_i32_0 = arith.constant 0 : i32
    %c0_i32_1 = arith.constant 0 : i32
    return %c0_i32, %c0_i32_0 : i32, i32
  }
  func.func @transform_7(%arg0: i32) -> (i32, i32) {
    %c0_i32 = arith.constant 0 : i32
    %c0_i32_0 = arith.constant 0 : i32
    %c0_i32_1 = arith.constant 0 : i32
    return %c0_i32, %c0_i32_0 : i32, i32
  }
  func.func @transform_8(%arg0: i32) -> (i32, i32) {
    %c0_i32 = arith.constant 0 : i32
    %c0_i32_0 = arith.constant 0 : i32
    %c0_i32_1 = arith.constant 0 : i32
    return %c0_i32, %c0_i32_0 : i32, i32
  }
  func.func @transform_9(%arg0: i32) -> (i32, i32) {
    %c0_i32 = arith.constant 0 : i32
    %c0_i32_0 = arith.constant 0 : i32
    %c0_i32_1 = arith.constant 0 : i32
    return %c0_i32, %c0_i32_0 : i32, i32
  }
  func.func @transform_10(%arg0: i32) -> (i32, i32) {
    %c0_i32 = arith.constant 0 : i32
    %c0_i32_0 = arith.constant 0 : i32
    %c0_i32_1 = arith.constant 0 : i32
    return %c0_i32, %c0_i32_0 : i32, i32
  }
  func.func @transform_11(%arg0: i32) -> (i32, i32) {
    %c0_i32 = arith.constant 0 : i32
    %c0_i32_0 = arith.constant 0 : i32
    %c0_i32_1 = arith.constant 0 : i32
    return %c0_i32, %c0_i32_0 : i32, i32
  }
  func.func @transform_12(%arg0: i32) -> (i32, i32) {
    %c0_i32 = arith.constant 0 : i32
    %c0_i32_0 = arith.constant 0 : i32
    %c0_i32_1 = arith.constant 0 : i32
    return %c0_i32, %c0_i32_0 : i32, i32
  }
  func.func @transform_13(%arg0: i32) -> (i32, i32) {
    %c0_i32 = arith.constant 0 : i32
    %c0_i32_0 = arith.constant 0 : i32
    %c0_i32_1 = arith.constant 0 : i32
    return %c0_i32, %c0_i32_0 : i32, i32
  }
  func.func @transform_14(%arg0: i32) -> (i32, i32, i32) {
    %c0_i32 = arith.constant 0 : i32
    %c0_i32_0 = arith.constant 0 : i32
    %c0_i32_1 = arith.constant 0 : i32
    return %arg0, %c0_i32, %c0_i32_0 : i32, i32, i32
  }
  func.func @transform_15(%arg0: i32) -> (i32, i32, i32) {
    %c0_i32 = arith.constant 0 : i32
    %c0_i32_0 = arith.constant 0 : i32
    %c0_i32_1 = arith.constant 0 : i32
    return %arg0, %c0_i32, %c0_i32_0 : i32, i32, i32
  }
}

</mosaic_0001>

<bundles_post_ra>
// kernel: upsample_forward.1
= control target key start
LH: loop header
LB: loop body
LE: loop exit
PB: predicated region body
PF: predicated region fallthrough
CT: control target
= control target key end

     0   :  { %s3967_s18 = smov 0   ;;  %s5449_s0 = inlined_call_operand.vmem [shape: f32[2,16,324], index: 0, kind: input, shape index: {}]   ;;  %s5450_s1 = inlined_call_operand.vmem [shape: f32[1,324], index: 1, kind: input, shape index: {}]   ;;  %s5451_s2 = inlined_call_operand.vmem [shape: bf16[16,144], index: 2, kind: input, shape index: {}]   ;;  %s5452_s3 = inlined_call_operand.vmem [shape: f32[16,1], index: 3, kind: input, shape index: {}]   ;;  %s5453_s4 = inlined_call_operand.vmem [shape: f32[16,1], index: 4, kind: input, shape index: {}]   ;;  %s5454_s5 = inlined_call_operand.vmem [shape: bf16[16,144], index: 5, kind: input, shape index: {}]   ;;  %s5455_s6 = inlined_call_operand.vmem [shape: f32[16,1], index: 6, kind: input, shape index: {}]   ;;  %s5456_s7 = inlined_call_operand.vmem [shape: f32[16,1], index: 7, kind: input, shape index: {}]   ;;  %s5457_s8 = inlined_call_operand.vmem [shape: bf16[8,144], index: 8, kind: input, shape index: {}]   ;;  %s5458_s9 = inlined_call_operand.vmem [shape: f32[8,1], index: 9, kind: input, shape index: {}]   ;;  %s5459_s10 = inlined_call_operand.vmem [shape: f32[8,1], index: 10, kind: input, shape index: {}]   ;;  %s5460_s11 = inlined_call_operand.vmem [shape: bf16[8,72], index: 11, kind: input, shape index: {}]   ;;  %s5461_s12 = inlined_call_operand.vmem [shape: f32[8,1], index: 12, kind: input, shape index: {}]   ;;  %s5462_s13 = inlined_call_operand.vmem [shape: f32[8,1], index: 13, kind: input, shape index: {}]   ;;  %s5463_s14 = inlined_call_operand.vmem [shape: f32[2,8,1], index: 14, kind: input, shape index: {}]   ;;  %s5464_s15 = inlined_call_operand.vmem [shape: f32[2,8,324], index: 15, kind: output, shape index: {}]  }
   0x1   :  { %5493 = sst [smem:[#allocation2_spill]] %s5449_s0 }
   0x2 LB: > { %s3240_s19 = sadd.s32 4294967295, %s3873_s18   ;;  %p3244_p0 = scmp.ge.s32.totalorder %s3873_s18, 1  ;;  %s3873_s18 = sphi %s3967_s18, %s25_s18  }
   0x3   : > { %p446_p1 = scmp.lt.s32.totalorder %s3873_s18, 3 }
   0x5   : > { %p447_p2 = pnand %p3244_p0, %p446_p1 }
   0x6   : > { %p498_p3 = scmp.lt.s32.totalorder (!%p447_p2), %s3240_s19, 1  ;;  %s5494_s0 = sld [smem:[#allocation2_spill]] (!%p447_p2) }
   0x7   : > { %450 = sbr.rel (%p447_p2) target bundleno = 4431 (0x114f), region = 80  ;;  %s5491_s24 = smov (!%p447_p2), 68  }
   0x8   : > { %s5483_s25 = smov (!%p447_p2), 31   ;;  %s5485_s26 = smov (!%p447_p2), 49  }
   0x9   : > { %s5489_s27 = smov (!%p447_p2), 32   ;;  %s5473_s28 = smov (!%p447_p2), 30  }
   0xa   : > { %s5487_s29 = smov (!%p447_p2), 48   ;;  %s5465_s30 = smov (!%p447_p2), 127  }
   0xb   : > { %s5471_s16 = smov (!%p447_p2), 110   ;;  %s5467_s17 = smov (!%p447_p2), 126  }
   0xc   : > { %s5636_s19 = smov (!%p498_p3, %s3240_s19), 1  ;;  %vm520_vm0 = vcmask 1048096   ;;  %vm709_vm1 = vcmask 252928   ;;  %vm686_vm2 = vcmask 261120   ;;  %vm5482_vm3 = vcmask 400384   ;;  %s5499_s21 = smov 30  }
   0xd   : > { %s3282_s20 = smul.u32 48, %s5636_s19  ;;  %vm663_vm4 = vcmask 392192   ;;  %vm5481_vm5 = vcmask 244736   ;;  %vm5480_vm6 = vcmask 646144   ;;  %vm5479_vm7 = vcmask 900096   ;;  %s5500_s22 = smov 110  }
   0xe   : > { %vm5478_vm8 = vcmask 1031168   ;;  %vm5477_vm9 = vcmask 1039360   ;;  %vm5476_vm10 = vcmask 130048   ;;  %vm5475_vm11 = vcmask 556032  }
   0xf   : > { %s3981_s23 = scalar_lea.vmem %s5494_s0, %s3282_s20  ;;  %s5469_s20 = smov 79  }
  0x10   : > { %v513_v0 = vld [vmem:[%s3981_s23] sm:$0xff]  ;;  %v516_v1 = vld [vmem:[%s3981_s23 + $0x18] sm:$0xff]  ;;  %v514_v2 = vld [vmem:[%s3981_s23 + $0x8] sm:$0xff] }
  0x11   : > { %v3320_v3 = vpack.i.bf16 %v516_v1, %v513_v0  ;;  %v3330_v4 = vpack.i.bf16 %v514_v2, %v513_v0  ;;  %v517_v5 = vld [vmem:[%s3981_s23 + $0x20] sm:$0xff]  ;;  %v518_v6 = vld [vmem:[%s3981_s23 + $0x28] sm:$0xff]  ;;  %v515_v7 = vld [vmem:[%s3981_s23 + $0x10] sm:$0xff] }
  0x12   : > { %v3355_v8 = vpack.i.bf16 %v518_v6, %v517_v5  ;;  %v3325_v9 = vpack.i.bf16 %v517_v5, %v514_v2  ;;  %v3350_v10 = vpack.i.bf16 %v516_v1, %v515_v7  ;;  %v3365_v11 = vpack.i.bf16 %v517_v5, %v516_v1 }
  0x13   : > { %3321 = vrot.lane.b32.xlu0 %v3320_v3, %s5491_s24  ;;  %3331 = vrot.lane.b32.xlu1 %v3330_v4, %s5483_s25 }
  0x14   : > { %3356 = vrot.lane.b32.xlu2 %v3355_v8, %s5485_s26 }
  0x1b   : > { %3326 = vrot.lane.b32.xlu0 %v3325_v9, %s5491_s24  ;;  %3351 = vrot.lane.b32.xlu1 %v3350_v10, %s5485_s26 }
  0x23   : > { %3336 = vrot.lane.b32.xlu0 %v3330_v4, %s5489_s27  ;;  %3366 = vrot.lane.b32.xlu1 %v3365_v11, %s5473_s28 }
  0x2b   : > { %3341 = vrot.lane.b32.xlu0 %v3330_v4, %s5487_s29 }
  0x33   : > { %3346 = vrot.lane.b32.xlu0 %v3330_v4, %s5485_s26 }
  0x3b   : > { %3361 = vrot.lane.b32.xlu0 %v3330_v4, %s5473_s28 }
  0x6e   : > { %v4028_v21 = vpop.permute.xlu2 %3356 }
  0x6f   : > { %v3359_v56 = vunpack.i.h.bf16 %v4028_v21  ;;  %v3358_v60 = vunpack.i.l.bf16 %v4028_v21 }
  0x85   : > { %v3999_v12 = vpop.permute.xlu0 %3321  ;;  %v4030_v22 = vpop.permute.xlu1 %3331 }
  0x86   : > { %v3324_v13 = vunpack.i.h.bf16 %v3999_v12  ;;  %v3323_v14 = vunpack.i.l.bf16 %v3999_v12  ;;  %v3333_v23 = vunpack.i.l.bf16 %v4030_v22  ;;  %v3334_v29 = vunpack.i.h.bf16 %v4030_v22 }
  0x88   : > { %v4004_v15 = vsel %vm520_vm0, %v3324_v13, %v518_v6  ;;  %v4009_v16 = vsel %vm520_vm0, %v3323_v14, %v515_v7  ;;  %v710_v32 = vsel %vm709_vm1, %v3333_v23, %v3334_v29 }
  0x89   : > { %v3420_v17 = vpack.i.bf16 %v4004_v15, %v4009_v16  ;;  %v3375_v18 = vpack.i.bf16 %v516_v1, %v4009_v16  ;;  %v745_v19 = vpack.c.bf16 %v4004_v15, %v4009_v16  ;;  %v3380_v20 = vpack.i.bf16 %v4004_v15, %v517_v5  ;;  %v3252_v15 = vld [vmem:[%s5451_s2 + $0x8] sm:$0xf0] }
  0x8a   : > { %v644_v5 = vsel %vm5482_vm3, %v3358_v60, %v3359_v56 }
  0x8b   : > { %3421 = vrot.lane.b32.xlu0 %v3420_v17, %s5465_s30  ;;  %3376 = vrot.lane.b32.xlu2 %v3375_v18, %s5483_s25 }
  0x8c   : > { %3371 = vrot.lane.b32.xlu1 %v3420_v17, %s5491_s24 }
  0x8d   : > { %v4036_v27 = vpop.permute.xlu0 %3326  ;;  %v4039_v28 = vpop.permute.xlu1 %3351 }
  0x8e   : > { %v3329_v38 = vunpack.i.h.bf16 %v4036_v27  ;;  %v3328_v40 = vunpack.i.l.bf16 %v4036_v27  ;;  %v3353_v61 = vunpack.i.l.bf16 %v4039_v28 }
  0x90   : > { %v4061_v43 = vsel %vm520_vm0, %v3329_v38, %v3324_v13 }
  0x93   : > { %3381 = vrot.lane.b32.xlu2 %v3380_v20, %s5483_s25 }
  0x94   : > { %3386 = vrot.lane.b32.xlu1 %v3375_v18, %s5489_s27 }
  0x95   : > { %v4051_v34 = vpop.permute.xlu0 %3336  ;;  %v4054_v36 = vpop.permute.xlu1 %3366 }
  0x96   : > { %v3339_v48 = vunpack.i.h.bf16 %v4051_v34  ;;  %v3338_v49 = vunpack.i.l.bf16 %v4051_v34  ;;  %v3369_v10 = vunpack.i.h.bf16 %v4054_v36 }
  0x98   : > { %v687_v55 = vsel %vm686_vm2, %v3338_v49, %v3339_v48 }
  0x9b   : > { %3391 = vrot.lane.b32.xlu2 %v3380_v20, %s5489_s27 }
  0x9c   : > { %3396 = vrot.lane.b32.xlu1 %v3375_v18, %s5487_s29  ;;  %v3368_v18 = vunpack.i.l.bf16 %v4054_v36 }
  0x9d   : > { %v4056_v37 = vpop.permute.xlu0 %3341 }
  0x9e   : > { %v3344_v0 = vunpack.i.h.bf16 %v4056_v37  ;;  %v3343_v1 = vunpack.i.l.bf16 %v4056_v37  ;;  %v735_v27 = vsel %vm5481_vm5, %v3368_v18, %v3369_v10 }
  0xa0   : > { %v664_v9 = vsel %vm663_vm4, %v3343_v1, %v3344_v0 }
  0xa3   : > { %3401 = vrot.lane.b32.xlu2 %v3380_v20, %s5487_s29 }
  0xa5   : > { %v4077_v51 = vpop.permute.xlu0 %3346 }
  0xa6   : > { %v3349_v62 = vunpack.i.h.bf16 %v4077_v51 }
  0xa8   : > { %v642_v4 = vsel %vm5482_vm3, %v3349_v62, %v3353_v61 }
  0xa9   : > { %v759_v13 = vpack.c.bf16 %v644_v5, %v642_v4 }
  0xab   : > { %3406 = vrot.lane.b32.xlu2 %v3420_v17, %s5473_s28  ;;  %s5503_s28 = smov 127  }
  0xad   : > { %v3362_v6 = vpop.permute.xlu0 %3361 }
  0xae   : > { %v3364_v20 = vunpack.i.h.bf16 %v3362_v6 }
  0xb3   : > { %3411 = vrot.lane.b32.xlu2 %v3420_v17, %s5471_s16 }
  0xbb   : > { %3416 = vrot.lane.b32.xlu2 %v3420_v17, %s5467_s17 }
  0xe5   : > { %v4033_v24 = vpop.permute.xlu2 %3376 }
  0xe6   : > { %v3379_v25 = vunpack.i.h.bf16 %v4033_v24 }
  0xe8   : > { %v766_v26 = vpack.c.bf16 %v3379_v25, %v3333_v23  ;;  %v3363_v23 = vunpack.i.l.bf16 %v3362_v6 }
  0xea   : > { %850 = vrot.lane.b32.xlu2 %v766_v26, %s5469_s20  ;;  %v733_v26 = vsel %vm5481_vm5, %v3363_v23, %v3364_v20  ;;  %v769_v37 = vpack.c.bf16 %v3368_v18, %v3363_v23 }
  0xed   : > { %v4042_v30 = vpop.permute.xlu2 %3381 }
  0xee   : > { %v3383_v31 = vunpack.i.l.bf16 %v4042_v30 }
  0xf0   : > { %v712_v33 = vsel %vm709_vm1, %v3379_v25, %v3383_v31 }
  0xf1   : > { %v767_v35 = vpack.c.bf16 %v712_v33, %v710_v32  ;;  %v770_v33 = vpack.c.bf16 %v735_v27, %v733_v26 }
  0xf3   : > { %852 = vrot.lane.b32.xlu1 %v767_v35, %s5469_s20  ;;  %v4116_v35 = vsel %vm520_vm0, %v3328_v40, %v3323_v14  ;;  %v3378_v14 = vunpack.i.l.bf16 %v4033_v24 }
  0xf5   : > { %v4070_v47 = vpop.permute.xlu2 %3391 }
  0xf6   : > { %v3393_v53 = vunpack.i.l.bf16 %v4070_v47 }
  0xfd   : > { %v3402_v2 = vpop.permute.xlu2 %3401  ;;  %v4166_v4 = vpop.permute.xlu0 %3421 }
  0xfe   : > { %v3372_v39 = vpop.permute.xlu1 %3371  ;;  %v3403_v7 = vunpack.i.l.bf16 %v3402_v2 }
  0xff   : > { %v3374_v41 = vunpack.i.h.bf16 %v3372_v39  ;;  %v3373_v42 = vunpack.i.l.bf16 %v3372_v39  ;;  %v3348_v39 = vunpack.i.l.bf16 %v4077_v51 }
 0x101   : > { %v3425_v44 = vpack.i.bf16 %v4061_v43, %v3373_v42  ;;  %v4065_v45 = vsel %vm520_vm0, %v3374_v41, %v3329_v38  ;;  %v4068_v46 = vsel %vm520_vm0, %v3373_v42, %v3328_v40  ;;  %v3354_v38 = vunpack.i.h.bf16 %v4039_v28 }
 0x102   : > { %v747_v50 = vpack.c.bf16 %v4065_v45, %v4068_v46  ;;  %v3445_v58 = vpack.i.bf16 %v4065_v45, %v4061_v43  ;;  %v3435_v11 = vpack.i.bf16 %v3374_v41, %v4065_v45  ;;  %v3430_v36 = vpack.i.bf16 %v4068_v46, %v4116_v35  ;;  %v3278_v45 = vld [vmem:[%s5451_s2 + $0x4] sm:$0xf] }
 0x103   : > { %3426 = vrot.lane.b32.xlu1 %v3425_v44, %s5471_s16  ;;  %v757_v41 = vpack.c.bf16 %v3354_v38, %v3348_v39  ;;  %v3384_v42 = vunpack.i.h.bf16 %v4042_v30  ;;  %v3394_v40 = vunpack.i.h.bf16 %v4070_v47  ;;  %v3404_v30 = vunpack.i.h.bf16 %v3402_v2 }
 0x104   : > { %v641_v34 = vsel %vm5482_vm3, %v3348_v39, %v3349_v62  ;;  %v3255_v16 = vor.u32 %v3278_v45, %v3252_v15 }
 0x105   : > { %v713_v28 = vsel %vm709_vm1, %v3383_v31, %v3384_v42 }
 0x106   : > { %v3387_v52 = vpop.permute.xlu1 %3386 }
 0x107   : > { %v3389_v54 = vunpack.i.h.bf16 %v3387_v52  ;;  %v3388_v12 = vunpack.i.l.bf16 %v3387_v52  ;;  %v711_v52 = vsel %vm709_vm1, %v3334_v29, %v3378_v14 }
 0x108   : > { %v768_v24 = vpack.c.bf16 %v713_v28, %v711_v52 }
 0x109   : > { %v763_v57 = vpack.c.bf16 %v3389_v54, %v3338_v49  ;;  %v689_v59 = vsel %vm686_vm2, %v3389_v54, %v3393_v53  ;;  %v688_v44 = vsel %vm686_vm2, %v3339_v48, %v3388_v12  ;;  %v3407_v49 = vpop.permute.xlu2 %3406  ;;  %v690_v54 = vsel %vm686_vm2, %v3393_v53, %v3394_v40 }
 0x10a   : > { %v764_v63 = vpack.c.bf16 %v689_v59, %v687_v55  ;;  %v765_v55 = vpack.c.bf16 %v690_v54, %v688_v44  ;;  %v3409_v47 = vunpack.i.h.bf16 %v3407_v49  ;;  %v3408_v56 = vunpack.i.l.bf16 %v3407_v49 }
 0x10b   : > { %844 = vrot.lane.b32.xlu2 %v763_v57, %s5469_s20  ;;  %3446 = vrot.lane.b32.xlu1 %v3445_v58, %s5467_s17  ;;  %v643_v48 = vsel %vm5482_vm3, %v3354_v38, %v3358_v60  ;;  %v667_v53 = vsel %vm663_vm4, %v3403_v7, %v3404_v30  ;;  %v746_v30 = vpack.c.bf16 %v4061_v43, %v4116_v35  ;;  %v3423_v43 = vunpack.i.l.bf16 %v4166_v4 }
 0x10c   : > { %846 = vrot.lane.b32.xlu0 %v764_v63, %s5469_s20  ;;  %v734_v31 = vsel %vm5481_vm5, %v3364_v20, %v3408_v56  ;;  %v736_v22 = vsel %vm5481_vm5, %v3369_v10, %v3409_v47  ;;  %v758_v61 = vpack.c.bf16 %v643_v48, %v641_v34 }
 0x10e   : > { %v3397_v3 = vpop.permute.xlu1 %3396 }
 0x10f   : > { %v3399_v8 = vunpack.i.h.bf16 %v3397_v3  ;;  %v3398_v57 = vunpack.i.l.bf16 %v3397_v3 }
 0x111   : > { %v666_v17 = vsel %vm663_vm4, %v3399_v8, %v3403_v7  ;;  %v760_v32 = vpack.c.bf16 %v3399_v8, %v3343_v1  ;;  %v665_v29 = vsel %vm663_vm4, %v3344_v0, %v3398_v57  ;;  %v3412_v51 = vpop.permute.xlu2 %3411 }
 0x112   : > { %v761_v25 = vpack.c.bf16 %v666_v17, %v664_v9  ;;  %v762_v59 = vpack.c.bf16 %v667_v53, %v665_v29  ;;  %v3414_v23 = vunpack.i.h.bf16 %v3412_v51  ;;  %v3413_v27 = vunpack.i.l.bf16 %v3412_v51 }
 0x113   : > { %3436 = vrot.lane.b32.xlu2 %v3435_v11, %s5471_s16  ;;  %836 = vrot.lane.b32.xlu1 %v759_v13, %s5469_s20 }
 0x114   : > { %840 = vrot.lane.b32.xlu0 %v761_v25, %s5469_s20 }
 0x119   : > { %v3417_v62 = vpop.permute.xlu2 %3416 }
 0x11a   : > { %v3419_v44 = vunpack.i.h.bf16 %v3417_v62  ;;  %v3418_v52 = vunpack.i.l.bf16 %v3417_v62 }
 0x11b   : > { %838 = vrot.lane.b32.xlu2 %v760_v32, %s5469_s20  ;;  %858 = vrot.lane.b32.xlu1 %v770_v33, %s5469_s20 }
 0x11c   : > { %3431 = vrot.lane.b32.xlu0 %v3430_v36, %s5471_s16  ;;  %s5563_s16 = smov 49  }
 0x123   : > { %832 = vrot.lane.b32.xlu2 %v757_v41, %s5469_s20  ;;  %3456 = vrot.lane.b32.xlu1 %v3445_v58, %s5465_s30  ;;  %v771_v58 = vpack.c.bf16 %v736_v22, %v734_v31 }
 0x124   : > { %3441 = vrot.lane.b32.xlu0 %v3430_v36, %s5467_s17  ;;  %s5502_s17 = smov 79  }
 0x12b   : > { %854 = vrot.lane.b32.xlu2 %v768_v24, %s5469_s20  ;;  %848 = vrot.lane.b32.xlu1 %v765_v55, %s5469_s20 }
 0x12c   : > { %3451 = vrot.lane.b32.xlu0 %v3430_v36, %s5465_s30  ;;  %s5501_s30 = smov 126  }
 0x133   : > { %860 = vrot.lane.b32.xlu2 %v771_v58, %s5469_s20  ;;  %842 = vrot.lane.b32.xlu1 %v762_v59, %s5469_s20  ;;  %v3424_v59 = vunpack.i.h.bf16 %v4166_v4 }
 0x134   : > { %834 = vrot.lane.b32.xlu0 %v758_v61, %s5469_s20 }
 0x13c   : > { %856 = vrot.lane.b32.xlu0 %v769_v37, %s5469_s20 }
 0x144   : > { %v851_v63 = vpop.permute.xlu2 %850 }
 0x165   : > { %v845_v21 = vpop.permute.xlu2 %844  ;;  %v4160_v60 = vpop.permute.xlu1 %852 }
 0x166   : > { %v877_v0 = vsel %vm5480_vm6, %v851_v63, %v4160_v60 }
 0x167   : > { %912 = vmatpush.bf16.msra.mxu0 %v877_v0 }
 0x16d   : > { %v4164_v1 = vpop.permute.xlu2 %3436 }
 0x16e   : > { %v3438_v32 = vunpack.i.l.bf16 %v4164_v1  ;;  %v3439_v22 = vunpack.i.h.bf16 %v4164_v1 }
 0x170   : > { %v615_v37 = vsel %vm5479_vm7, %v3438_v32, %v3439_v22  ;;  %v519_v22 = vld [vmem:[%s5450_s1] sm:$0x7] }
 0x175   : > { %v839_v2 = vpop.permute.xlu2 %838  ;;  %v3427_v3 = vpop.permute.xlu1 %3426 }
 0x176   : > { %v3429_v17 = vunpack.i.h.bf16 %v3427_v3  ;;  %v3428_v29 = vunpack.i.l.bf16 %v3427_v3 }
 0x178   : > { %v614_v39 = vsel %vm5479_vm7, %v3429_v17, %v3438_v32  ;;  %v613_v42 = vsel %vm5479_vm7, %v3414_v23, %v3429_v17 }
 0x17d   : > { %v4168_v5 = vpop.permute.xlu2 %832  ;;  %v4170_v6 = vpop.permute.xlu1 %3446 }
 0x17e   : > { %v4172_v7 = vpop.permute.xlu0 %846  ;;  %v3448_v40 = vunpack.i.l.bf16 %v4170_v6  ;;  %v3449_v54 = vunpack.i.h.bf16 %v4170_v6 }
 0x17f   : > { %v875_v8 = vsel %vm5480_vm6, %v845_v21, %v4172_v7 }
 0x180   : > { %913 = vmatpush.bf16.msra.mxu0 %v875_v8  ;;  %v583_v57 = vsel %vm5478_vm8, %v3419_v44, %v3448_v40  ;;  %v584_v62 = vsel %vm5478_vm8, %v3448_v40, %v3449_v54  ;;  %v3250_v40 = vld [vmem:[%s5451_s2] sm:$0xf] }
 0x185   : > { %v4176_v9 = vpop.permute.xlu2 %854  ;;  %v4178_v10 = vpop.permute.xlu1 %836 }
 0x186   : > { %v4180_v11 = vpop.permute.xlu0 %840  ;;  %968 = vmatpush.bf16.msra.mxu1 %v4176_v9 }
 0x187   : > { %v873_v13 = vsel %vm5480_vm6, %v839_v2, %v4180_v11 }
 0x188   : > { %914 = vmatpush.bf16.msra.mxu0 %v873_v13 }
 0x18d   : > { %v861_v18 = vpop.permute.xlu2 %860  ;;  %v4185_v20 = vpop.permute.xlu1 %858 }
 0x18e   : > { %v3432_v25 = vpop.permute.xlu0 %3431  ;;  %v880_v26 = vsel %vm5480_vm6, %v4185_v20, %v861_v18 }
 0x18f   : > { %v3434_v33 = vunpack.i.h.bf16 %v3432_v25  ;;  %v3433_v36 = vunpack.i.l.bf16 %v3432_v25  ;;  %961 = vmatpush.bf16.msra.mxu3 %v880_v26 }
 0x191   : > { %v611_v38 = vsel %vm5479_vm7, %v3433_v36, %v3434_v33  ;;  %v610_v41 = vsel %vm5479_vm7, %v3413_v27, %v3433_v36  ;;  %v612_v58 = vsel %vm5479_vm7, %v3434_v33, %v3428_v29 }
 0x192   : > { %v755_v12 = vpack.c.bf16 %v614_v39, %v611_v38  ;;  %v754_v14 = vpack.c.bf16 %v613_v42, %v610_v41  ;;  %v756_v51 = vpack.c.bf16 %v615_v37, %v612_v58  ;;  %3257 = vmatmul.msk.bf16.vlgmr.msra.gmra.mxu3 %vm5476_vm10, %v3255_v16  ;;  %v4271_v58 = vperm.slane %v519_v22, 0 }
 0x193   : > { %989 = vmatpush.bf16.msrb.mxu3 %v861_v18 }
 0x194   : > { %828 = vrot.lane.b32.xlu0 %v755_v12, %s5469_s20  ;;  %826 = vrot.lane.b32.xlu2 %v754_v14, %s5469_s20 }
 0x195   : > { %v3457_v28 = vpop.permute.xlu1 %3456 }
 0x196   : > { %v3442_v49 = vpop.permute.xlu0 %3441  ;;  %v3458_v34 = vunpack.i.l.bf16 %v3457_v28  ;;  %v3459_v3 = vunpack.i.h.bf16 %v3457_v28  ;;  %v3279_v28 = vld [vmem:[%s5451_s2 + $0x4] sm:$0xf0] }
 0x197   : > { %v3444_v24 = vunpack.i.h.bf16 %v3442_v49  ;;  %v3443_v55 = vunpack.i.l.bf16 %v3442_v49  ;;  %v3251_v49 = vor.u32 %v3279_v28, %v3250_v40 }
 0x198   : > { %v560_v21 = vsel %vm5477_vm9, %v3424_v59, %v3458_v34  ;;  %v561_v18 = vsel %vm5477_vm9, %v3458_v34, %v3459_v3  ;;  %v4273_v59 = vperm.slane %v519_v22, 1 }
 0x199   : > { %v753_v47 = vpack.c.bf16 %v3449_v54, %v3444_v24  ;;  %v581_v56 = vsel %vm5478_vm8, %v3418_v52, %v3443_v55  ;;  %v582_v61 = vsel %vm5478_vm8, %v3443_v55, %v3444_v24 }
 0x19a   : > { %v751_v31 = vpack.c.bf16 %v583_v57, %v581_v56  ;;  %v752_v0 = vpack.c.bf16 %v584_v62, %v582_v61 }
 0x19b   : > { %824 = vrot.lane.b32.xlu1 %v753_v47, %s5469_s20 }
 0x19c   : > { %810 = vrot.lane.b32.xlu0 %v746_v30, %s5469_s20  ;;  %820 = vrot.lane.b32.xlu2 %v751_v31, %s5469_s20 }
 0x19d   : > { %v849_v48 = vpop.permute.xlu1 %848 }
 0x19e   : > { %v3452_v53 = vpop.permute.xlu0 %3451  ;;  %969 = vmatpush.bf16.msra.mxu1 %v849_v48  ;;  %v876_v27 = vsel %vm5480_vm6, %v4172_v7, %v849_v48  ;;  %v4269_v48 = vperm.slane %v519_v22, 2 }
 0x19f   : > { %v3453_v35 = vunpack.i.l.bf16 %v3452_v53  ;;  %v3454_v2 = vunpack.i.h.bf16 %v3452_v53 }
 0x1a1   : > { %v558_v63 = vsel %vm5477_vm9, %v3423_v43, %v3453_v35  ;;  %v559_v13 = vsel %vm5477_vm9, %v3453_v35, %v3454_v2  ;;  %v750_v17 = vpack.c.bf16 %v3459_v3, %v3454_v2 }
 0x1a2   : > { %v748_v1 = vpack.c.bf16 %v560_v21, %v558_v63  ;;  %v749_v23 = vpack.c.bf16 %v561_v18, %v559_v13  ;;  %3258 = vmatmul.msk.bf16.vlgmr.msrb.gmra.mxu3 %vm5476_vm10, %v3255_v16 }
 0x1a3   : > { %830 = vrot.lane.b32.xlu1 %v756_v51, %s5469_s20 }
 0x1a4   : > { %822 = vrot.lane.b32.xlu0 %v752_v0, %s5469_s20  ;;  %814 = vrot.lane.b32.xlu2 %v748_v1, %s5469_s20 }
 0x1a5   : > { %v843_v4 = vpop.permute.xlu1 %842 }
 0x1a6   : > { %v835_v6 = vpop.permute.xlu0 %834  ;;  %970 = vmatpush.bf16.msra.mxu1 %v843_v4 }
 0x1a7   : > { %v871_v8 = vsel %vm5480_vm6, %v4168_v5, %v835_v6  ;;  %v878_v5 = vsel %vm5480_vm6, %v4160_v60, %v4176_v9  ;;  %v872_v60 = vsel %vm5480_vm6, %v835_v6, %v4178_v10 }
 0x1a8   : > { %915 = vmatpush.bf16.msra.mxu0 %v871_v8 }
 0x1aa   : > { %971 = vmatpush.bf16.msra.mxu1 %v4178_v10 }
 0x1ab   : > { %818 = vrot.lane.b32.xlu1 %v750_v17, %s5469_s20 }
 0x1ac   : > { %816 = vrot.lane.b32.xlu0 %v749_v23, %s5469_s20 }
 0x1ae   : > { %v857_v25 = vpop.permute.xlu0 %856 }
 0x1af   : > { %v879_v26 = vsel %vm5480_vm6, %v857_v25, %v4185_v20  ;;  %v874_v20 = vsel %vm5480_vm6, %v4180_v11, %v843_v4 }
 0x1b0   : > { %933 = vmatpush.bf16.msra.mxu2 %v879_v26 }
 0x1b3   : > { %812 = vrot.lane.b32.xlu1 %v747_v50, %s5469_s20  ;;  %3256 = vmatmul.msk.bf16.vlgmr.msra.gmra.mxu2 %vm5476_vm10, %v3255_v16 }
 0x1b4   : > { %940 = vmatpush.bf16.msrb.mxu2 %v878_v5  ;;  %808 = vrot.lane.b32.xlu0 %v745_v19, %s5469_s20 }
 0x1b8   : > { %941 = vmatpush.bf16.msrb.mxu2 %v876_v27 }
 0x1bc   : > { %942 = vmatpush.bf16.msrb.mxu2 %v874_v20 }
 0x1c0   : > { %943 = vmatpush.bf16.msrb.mxu2 %v872_v60 }
 0x1ee   : > { %v827_v19 = vpop.permute.xlu2 %826 }
 0x1f6   : > { %v821_v10 = vpop.permute.xlu2 %820 }
 0x1fe   : > { %v815_v41 = vpop.permute.xlu2 %814 }
 0x206   : > { %v829_v46 = vpop.permute.xlu0 %828 }
 0x207   : > { %v869_v50 = vsel %vm5480_vm6, %v827_v19, %v829_v46 }
 0x208   : > { %916 = vmatpush.bf16.msra.mxu0 %v869_v50  ;;  %v3885_v50 = vmov 0  }
 0x209   : > { %3460 = vset.pattern.permute.xlu0 %v3885_v50  ;;  %3601 = vset.pattern.permute.xlu1 %v3885_v50 }
 0x20a   : > { %3792 = vset.pattern.permute.xlu2 %v3885_v50 }
 0x20d   : > { %v825_v7 = vpop.permute.xlu1 %824 }
 0x20e   : > { %v811_v9 = vpop.permute.xlu0 %810 }
 0x215   : > { %v831_v11 = vpop.permute.xlu1 %830  ;;  %v963_v55 = vpop.f32.mrf.mxu3 }
 0x216   : > { %v823_v32 = vpop.permute.xlu0 %822  ;;  %972 = vmatpush.bf16.msra.mxu1 %v831_v11  ;;  %v870_v33 = vsel %vm5480_vm6, %v829_v46, %v831_v11  ;;  %v1081_v46 = vld [vmem:[%s5452_s3] sm:$0xff] }
 0x217   : > { %944 = vmatpush.bf16.msrb.mxu2 %v870_v33  ;;  %v867_v36 = vsel %vm5480_vm6, %v821_v10, %v823_v32  ;;  %v868_v38 = vsel %vm5480_vm6, %v823_v32, %v825_v7  ;;  %1085 = vperm.xlu0 %3460, %v1081_v46   ;;  %v1099_v11 = vld [vmem:[%s5453_s4] sm:$0xff] }
 0x218   : > { %917 = vmatpush.bf16.msra.mxu0 %v867_v36 }
 0x21a   : > { %973 = vmatpush.bf16.msra.mxu1 %v825_v7  ;;  %v1082_v7 = vld [vmem:[%s5452_s3 + $0x8] sm:$0xff] }
 0x21b   : > { %945 = vmatpush.bf16.msrb.mxu2 %v868_v38 }
 0x21d   : > { %v819_v39 = vpop.permute.xlu1 %818  ;;  %v965_v56 = vpop.f32.mrf.mxu3 }
 0x21e   : > { %v817_v42 = vpop.permute.xlu0 %816  ;;  %974 = vmatpush.bf16.msra.mxu1 %v819_v39 }
 0x21f   : > { %v865_v12 = vsel %vm5480_vm6, %v815_v41, %v817_v42  ;;  %v866_v14 = vsel %vm5480_vm6, %v817_v42, %v819_v39  ;;  %1090 = vperm.xlu0 %3460, %v1082_v7  }
 0x220   : > { %918 = vmatpush.bf16.msra.mxu0 %v865_v12  ;;  %946 = vmatpush.bf16.msrb.mxu2 %v866_v14 }
 0x225   : > { %v813_v44 = vpop.permute.xlu1 %812  ;;  %v991_v30 = vpop.f32.mrf.mxu3 }
 0x226   : > { %975 = vmatpush.bf16.msra.mxu1 %v813_v44  ;;  %v809_v52 = vpop.permute.xlu0 %808  ;;  %v864_v54 = vsel %vm5480_vm6, %v811_v9, %v813_v44 }
 0x227   : > { %947 = vmatpush.bf16.msrb.mxu2 %v864_v54  ;;  %v863_v24 = vsel %vm5480_vm6, %v809_v52, %v811_v9  ;;  %1103 = vperm.xlu0 %3460, %v1099_v11  }
 0x228   : > { %919 = vmatpush.bf16.msra.mxu0 %v863_v24 }
 0x229   : > { %976 = vmatmul.bf16.vlgmr.msra.gmra.mxu1 %v3251_v49 }
 0x22a   : > { %948 = vmatmul.bf16.vlgmr.msrb.gmra.mxu2 %v3251_v49 }
 0x22b   : > { %920 = vmatmul.bf16.vlgmr.msra.gmra.mxu0 %v3251_v49 }
 0x22d   : > { %v993_v37 = vpop.f32.mrf.mxu3 }
 0x236   : > { %v935_v47 = vpop.f32.mrf.mxu2 }
 0x23e   : > { %v937_v57 = vpop.f32.mrf.mxu2 }
 0x2a6   : > { %v977_v31 = vpop.f32.mrf.mxu1 }
 0x2a7   : > { %v992_v34 = vadd.f32 %v991_v30, %v977_v31 }
 0x2a8   : > { %v921_v29 = vpop.f32.mrf.mxu0 }
 0x2a9   : > { %v936_v53 = vadd.f32 %v935_v47, %v921_v29  ;;  %v1005_v43 = vmul.f32 %v4269_v48, %v992_v34  ;;  %v1100_v47 = vld [vmem:[%s5453_s4 + $0x8] sm:$0xff] }
 0x2aa   : > { %1108 = vperm.xlu0 %3460, %v1100_v47  }
 0x2ab   : > { %v1003_v51 = vmul.f32 %v4271_v58, %v936_v53  ;;  %v1011_v0 = vsel %vm5475_vm11, %v1005_v43, 0.0 }
 0x2ad   : > { %v949_v35 = vpop.f32.mrf.mxu2 }
 0x2ae   : > { %v964_v61 = vadd.f32 %v963_v55, %v949_v35  ;;  %v979_v63 = vpop.f32.mrf.mxu1 }
 0x2af   : > { %v994_v3 = vadd.f32 %v993_v37, %v979_v63 }
 0x2b0   : > { %v1004_v62 = vmul.f32 %v4273_v59, %v964_v61  ;;  %v923_v21 = vpop.f32.mrf.mxu0 }
 0x2b1   : > { %v938_v1 = vadd.f32 %v937_v57, %v923_v21  ;;  %v1008_v17 = vmul.f32 %v4269_v48, %v994_v3  ;;  %v1086_v21 = vpop.permute.xlu0 %1085 }
 0x2b2   : > { %v1009_v2 = vadd.f32 %v1004_v62, %v1003_v51 }
 0x2b3   : > { %v1006_v4 = vmul.f32 %v4271_v58, %v938_v1  ;;  %v1015_v26 = vsel %vm5475_vm11, %v1008_v17, 0.0 }
 0x2b4   : > { %v1012_v6 = vadd.f32 %v1011_v0, %v1009_v2 }
 0x2b5   : > { %v951_v8 = vpop.f32.mrf.mxu2 }
 0x2b6   : > { %v966_v13 = vadd.f32 %v965_v56, %v951_v8  ;;  %v1013_v18 = vadd.f32 %v1012_v6, %v1006_v4 }
 0x2b8   : > { %v1007_v23 = vmul.f32 %v4273_v59, %v966_v13 }
 0x2b9   : > { %v1091_v3 = vpop.permute.xlu0 %1090 }
 0x2ba   : > { %v1014_v25 = vadd.f32 %v1013_v18, %v1007_v23 }
 0x2bc   : > { %v1016_v5 = vadd.f32 %v1015_v26, %v1014_v25 }
 0x2be   : > { %1017 = vadd.xlane.f32.xlu1 %v1016_v5 }
 0x2c1   : > { %v1104_v13 = vpop.permute.xlu0 %1103 }
 0x31c   : > { %v1109_v50 = vpop.permute.xlu0 %1108 }
 0x331   : > { %v1018_v27 = vpop.xlane.xlu1 %1017 }
 0x332   : > { %v1019_v20 = vrot.slane %v1018_v27, 4 }
 0x334   : > { %v1020_v60 = vadd.f32 %v1019_v20, %v1018_v27 }
 0x336   : > { %v1021_v45 = vrot.slane %v1020_v60, 2 }
 0x338   : > { %v1022_v15 = vadd.f32 %v1021_v45, %v1020_v60 }
 0x33a   : > { %v1023_v16 = vrot.slane %v1022_v15, 1 }
 0x33c   : > { %v1024_v19 = vadd.f32 %v1023_v16, %v1022_v15 }
 0x33e   : > { %3284 = vpush %v1024_v19 }
 0x36f   : > { %s3285_s20 = spop %3284 }
 0x370   : > { %v1026_v9 = vstv %s3285_s20 }
 0x371   : > { %v1027_v10 = vmul.f32 0.00024414063, %v1026_v9 }
 0x373   : > { %v1028_v32 = vsub.f32 %v1003_v51, %v1027_v10  ;;  %v1029_v33 = vsub.f32 %v1004_v62, %v1027_v10  ;;  %v4292_v36 = vsub.f32 %v1005_v43, %v1027_v10  ;;  %v1031_v38 = vsub.f32 %v1006_v4, %v1027_v10 }
 0x374   : > { %v1033_v39 = vsub.f32 %v1008_v17, %v1027_v10  ;;  %v1032_v41 = vsub.f32 %v1007_v23, %v1027_v10 }
 0x375   : > { %v1034_v42 = vmul.f32 %v1028_v32, %v1028_v32  ;;  %v1035_v12 = vmul.f32 %v1029_v33, %v1029_v33  ;;  %v1036_v14 = vmul.f32 %v4292_v36, %v4292_v36  ;;  %v1037_v40 = vmul.f32 %v1031_v38, %v1031_v38 }
 0x376   : > { %v1039_v52 = vmul.f32 %v1033_v39, %v1033_v39  ;;  %v1038_v54 = vmul.f32 %v1032_v41, %v1032_v41 }
 0x377   : > { %v1040_v28 = vmul.f32 %v1034_v42, %v4271_v58  ;;  %v1041_v44 = vmul.f32 %v1035_v12, %v4273_v59  ;;  %v1042_v49 = vmul.f32 %v1036_v14, %v4269_v48  ;;  %v1043_v56 = vmul.f32 %v1037_v40, %v4271_v58 }
 0x378   : > { %v1045_v30 = vmul.f32 %v1039_v52, %v4269_v48  ;;  %v1044_v31 = vmul.f32 %v1038_v54, %v4273_v59 }
 0x379   : > { %v1046_v24 = vadd.f32 %v1041_v44, %v1040_v28  ;;  %v1047_v55 = vsel %vm5475_vm11, %v1042_v49, 0.0 }
 0x37a   : > { %v1051_v34 = vsel %vm5475_vm11, %v1045_v30, 0.0 }
 0x37b   : > { %v1048_v57 = vadd.f32 %v1047_v55, %v1046_v24 }
 0x37d   : > { %v1049_v22 = vadd.f32 %v1048_v57, %v1043_v56 }
 0x37f   : > { %v1050_v29 = vadd.f32 %v1049_v22, %v1044_v31 }
 0x381   : > { %v1052_v53 = vadd.f32 %v1051_v34, %v1050_v29 }
 0x383   : > { %1053 = vadd.xlane.f32.xlu2 %v1052_v53 }
 0x3f6   : > { %v1054_v43 = vpop.xlane.xlu2 %1053 }
 0x3f7   : > { %v1055_v35 = vrot.slane %v1054_v43, 4 }
 0x3f9   : > { %v1056_v61 = vadd.f32 %v1055_v35, %v1054_v43 }
 0x3fb   : > { %v1057_v37 = vrot.slane %v1056_v61, 2 }
 0x3fd   : > { %v1058_v51 = vadd.f32 %v1057_v37, %v1056_v61 }
 0x3ff   : > { %v1059_v62 = vrot.slane %v1058_v51, 1 }
 0x401   : > { %v1060_v63 = vadd.f32 %v1059_v62, %v1058_v51 }
 0x403   : > { %3286 = vpush %v1060_v63 }
 0x434   : > { %s3287_s20 = spop %3286 }
 0x435   : > { %v1062_v0 = vstv %s3287_s20  ;;  %s5564_s20 = smov 31  }
 0x436   : > { %v1063_v1 = vmul.f32 0.00024414063, %v1062_v0 }
 0x438   : > { %v1064_v2 = vadd.f32 1e-05, %v1063_v1 }
 0x43a   : > { %3793 = vrsqrt.f32 %v1064_v2  ;;  %vm1071_vm13 = vweird.f32 %v1064_v2 }
 0x440   : > { %v3794_v4 = vpop.eup %3793 }
 0x441   : > { %v1066_v6 = vmul.f32 %v3794_v4, %v1064_v2  ;;  %vm1072_vm12 = vweird.f32 %v3794_v4 }
 0x442   : > { %vm1073_vm14 = vmor %vm1071_vm13, %vm1072_vm12 }
 0x443   : > { %v1067_v8 = vmul.f32 %v3794_v4, %v1066_v6 }
 0x445   : > { %v1068_v17 = vmul.f32 0.5, %v1067_v8 }
 0x447   : > { %v1069_v18 = vsub.f32 1.5, %v1068_v17 }
 0x449   : > { %v1070_v23 = vmul.f32 %v3794_v4, %v1069_v18 }
 0x44b   : > { %v1074_v25 = vsel %vm1073_vm14, %v3794_v4, %v1070_v23 }
 0x44c   : > { %v1075_v26 = vmul.f32 %v1074_v25, %v1028_v32  ;;  %v1076_v5 = vmul.f32 %v1074_v25, %v1029_v33  ;;  %v1078_v27 = vmul.f32 %v1074_v25, %v1031_v38  ;;  %v1079_v20 = vmul.f32 %v1074_v25, %v1032_v41 }
 0x44d   : > { %v1080_v60 = vmul.f32 %v1074_v25, %v1033_v39  ;;  %v1077_v49 = vmul.f32 %v1074_v25, %v4292_v36 }
 0x44e   : > { %v1093_v45 = vmul.f32 %v1086_v21, %v1075_v26  ;;  %v1094_v15 = vmul.f32 %v1086_v21, %v1076_v5  ;;  %v1096_v16 = vmul.f32 %v1091_v3, %v1078_v27  ;;  %v1097_v19 = vmul.f32 %v1091_v3, %v1079_v20 }
 0x44f   : > { %v1098_v46 = vmul.f32 %v1091_v3, %v1080_v60  ;;  %v1095_v22 = vmul.f32 %v1086_v21, %v1077_v49 }
 0x450   : > { %v1111_v7 = vadd.f32 %v1104_v13, %v1093_v45  ;;  %v1112_v9 = vadd.f32 %v1104_v13, %v1094_v15  ;;  %v1114_v10 = vadd.f32 %v1109_v50, %v1096_v16  ;;  %v1115_v11 = vadd.f32 %v1109_v50, %v1097_v19 }
 0x451   : > { %v1116_v42 = vadd.f32 %v1109_v50, %v1098_v46  ;;  %v1113_v51 = vadd.f32 %v1104_v13, %v1095_v22  ;;  %v3886_v13 = vmov -1.0  }
 0x452   : > { %v1117_v12 = vmul.f32 %v1111_v7, %v4271_v58  ;;  %v1118_v14 = vmul.f32 %v1112_v9, %v4273_v59  ;;  %v4310_v32 = vmul.f32 %v1114_v10, %v4271_v58  ;;  %v4313_v33 = vmul.f32 %v1115_v11, %v4273_v59 }
 0x453   : > { %v4316_v38 = vmul.f32 %v1116_v42, %v4269_v48  ;;  %v4358_v0 = vmul.f32 %v1113_v51, %v4269_v48 }
 0x454   : > { %v4318_v39 = vmul.f32 0.70710677, %v1117_v12  ;;  %v4320_v41 = vmul.f32 0.70710677, %v1118_v14  ;;  %v1132_v40 = vmul.f32 0.70710677, %v4310_v32 }
 0x455   : > { %v4324_v28 = vmul.f32 0.70710677, %v4313_v33  ;;  %v4327_v44 = vmul.f32 0.70710677, %v4316_v38  ;;  %v4362_v3 = vmul.f32 0.5, %v1117_v12  ;;  %v4364_v4 = vmul.f32 0.5, %v1118_v14 }
 0x456   : > { %v1147_v52 = vand.u32 2147483647, %v4318_v39  ;;  %v1148_v54 = vand.u32 2147483647, %v4320_v41  ;;  %v4332_v24 = vand.u32 2147483647, %v1132_v40 }
 0x457   : > { %v4335_v55 = vand.u32 2147483647, %v4324_v28  ;;  %v4338_v30 = vand.u32 2147483647, %v4327_v44  ;;  %vm1138_vm15 = vcmp.ge.f32.partialorder %v1132_v40, 0.0 }
 0x458   : > { %v1153_v47 = vmul.f32 0.3275911, %v1147_v52  ;;  %v1154_v56 = vmul.f32 0.3275911, %v1148_v54  ;;  %v1309_v57 = vsub.f32 0.0, %v1147_v52  ;;  %v1310_v43 = vsub.f32 0.0, %v1148_v54 }
 0x459   : > { %v1156_v31 = vmul.f32 0.3275911, %v4332_v24  ;;  %v1157_v34 = vmul.f32 0.3275911, %v4335_v55  ;;  %v1158_v53 = vmul.f32 0.3275911, %v4338_v30 }
 0x45a   : > { %v4341_v29 = vadd.f32 1.0, %v1153_v47  ;;  %v4343_v36 = vadd.f32 1.0, %v1154_v56  ;;  %v1315_v35 = vmul.f32 %v1309_v57, %v1147_v52  ;;  %v1316_v63 = vmul.f32 %v1310_v43, %v1148_v54 }
 0x45b   : > { %v4348_v61 = vadd.f32 1.0, %v1156_v31  ;;  %v4351_v37 = vadd.f32 1.0, %v1157_v34  ;;  %v4353_v62 = vadd.f32 1.0, %v1158_v53  ;;  %v4368_v17 = vsel %vm1138_vm15, 1.0, %v3886_v13 }
 0x45c   : > { %3795 = vrcp.f32 %v4341_v29  ;;  %v1321_v21 = vmul.f32 1.442695, %v1315_v35  ;;  %v1312_v23 = vsub.f32 0.0, %v4332_v24  ;;  %v4373_v26 = vmul.f32 1.442695, %v1316_v63 }
 0x45d   : > { %3797 = vrcp.f32 %v4343_v36  ;;  %v1221_v2 = vand.u32 2147483648, %v4348_v61  ;;  %v1219_v18 = vand.u32 2147483647, %v4348_v61  ;;  %v1313_v5 = vsub.f32 0.0, %v4335_v55 }
 0x45e   : > { %3799 = vrcp.f32 %v4348_v61  ;;  %vm1215_vm12 = vweird.f32 %v4348_v61  ;;  %v1234_v27 = vand.u32 2147483647, %v4351_v37  ;;  %v1236_v20 = vand.u32 2147483648, %v4351_v37 }
 0x45f   : > { %3801 = vrcp.f32 %v4351_v37  ;;  %v1314_v60 = vsub.f32 0.0, %v4338_v30  ;;  %v1222_v16 = vor.u32 1.1754944e-38, %v1221_v2  ;;  %vm1230_vm13 = vweird.f32 %v4351_v37 }
 0x460   : > { %3803 = vrcp.f32 %v4353_v62  ;;  %vm1170_vm14 = vweird.f32 %v4341_v29  ;;  %v1176_v19 = vand.u32 2147483648, %v4341_v29  ;;  %vm4384_vm15 = vcmp.eq.f32.partialorder %v1219_v18, 8.507059e+37 }
 0x461   : > { %3805 = vpow2.f32 %v1321_v21  ;;  %v1174_v11 = vand.u32 2147483647, %v4341_v29  ;;  %vm1185_vm9 = vweird.f32 %v4343_v36  ;;  %v1189_v57 = vand.u32 2147483647, %v4343_v36 }
 0x462   : > { %v3796_v1 = vpop.eup %3795  ;;  %v1177_v14 = vor.u32 1.1754944e-38, %v1176_v19  ;;  %v1191_v31 = vand.u32 2147483648, %v4343_v36  ;;  %v4412_v18 = vmul.f32 0.70710677, %v4358_v0  ;;  %3807 = vpow2.f32 %v4373_v26 }
 0x463   : > { %v3798_v6 = vpop.eup %3797  ;;  %v1166_v8 = vmul.f32 %v3796_v1, %v4341_v29  ;;  %vm1171_vm11 = vweird.f32 %v3796_v1  ;;  %vm1175_vm6 = vcmp.eq.f32.partialorder %v1174_v11, 8.507059e+37 }
 0x464   : > { %v1181_v25 = vmul.f32 %v3798_v6, %v4343_v36  ;;  %v3800_v15 = vpop.eup %3799  ;;  %vm1172_vm8 = vmor %vm1170_vm14, %vm1171_vm11  ;;  %vm1186_vm7 = vweird.f32 %v3798_v6  ;;  %v1192_v51 = vor.u32 1.1754944e-38, %v1191_v31  ;;  %vm1190_vm11 = vcmp.eq.f32.partialorder %v1189_v57, 8.507059e+37 }
 0x465   : > { %v1167_v45 = vsub.f32 1.0, %v1166_v8  ;;  %v3802_v50 = vpop.eup %3801  ;;  %v1211_v7 = vmul.f32 %v3800_v15, %v4348_v61  ;;  %vm1216_vm10 = vweird.f32 %v3800_v15  ;;  %vm1187_vm3 = vmor %vm1185_vm9, %vm1186_vm7  ;;  %v1237_v36 = vor.u32 1.1754944e-38, %v1236_v20 }
 0x466   : > { %v1182_v46 = vsub.f32 1.0, %v1181_v25  ;;  %v4389_v42 = vpop.eup %3803  ;;  %v1226_v12 = vmul.f32 %v3802_v50, %v4351_v37  ;;  %vm1231_vm5 = vweird.f32 %v3802_v50  ;;  %vm1217_vm14 = vmor %vm1215_vm12, %vm1216_vm10  ;;  %vm1139_vm7 = vcmp.ge.f32.partialorder %v4324_v28, 0.0 }
 0x467   : > { %v1168_v10 = vmul.f32 %v3796_v1, %v1167_v45  ;;  %v1212_v40 = vsub.f32 1.0, %v1211_v7  ;;  %v1241_v49 = vmul.f32 %v4389_v42, %v4353_v62  ;;  %v4395_v47 = vpop.eup %3805  ;;  %vm1135_vm10 = vcmp.ge.f32.partialorder %v4318_v39, 0.0 }
 0x468   : > { %v1183_v54 = vmul.f32 %v3798_v6, %v1182_v46  ;;  %v1227_v56 = vsub.f32 1.0, %v1226_v12  ;;  %v1318_v46 = vmul.f32 %v1312_v23, %v4332_v24  ;;  %v1319_v24 = vmul.f32 %v1313_v5, %v4335_v55 }
 0x469   : > { %v1169_v52 = vadd.f32 %v3796_v1, %v1168_v10  ;;  %v1213_v22 = vmul.f32 %v3800_v15, %v1212_v40  ;;  %v1242_v2 = vsub.f32 1.0, %v1241_v49  ;;  %v1251_v55 = vand.u32 2147483648, %v4353_v62 }
 0x46a   : > { %v1184_v53 = vadd.f32 %v3798_v6, %v1183_v54  ;;  %v1228_v43 = vmul.f32 %v3802_v50, %v1227_v56  ;;  %v1327_v12 = vmul.f32 1.442695, %v1318_v46  ;;  %v1141_v28 = vsel %vm1135_vm10, 1.0, %v3886_v13 }
 0x46b   : > { %v1173_v34 = vsel %vm1172_vm8, %v3796_v1, %v1169_v52  ;;  %v1214_v63 = vadd.f32 %v3800_v15, %v1213_v22  ;;  %vm1245_vm8 = vweird.f32 %v4353_v62  ;;  %v1249_v22 = vand.u32 2147483647, %v4353_v62 }
 0x46c   : > { %v4401_v35 = vsel %vm1175_vm6, %v1177_v14, %v1173_v34  ;;  %v1188_v29 = vsel %vm1187_vm3, %v3798_v6, %v1184_v53  ;;  %v1229_v1 = vadd.f32 %v3802_v50, %v1228_v43  ;;  %vm1232_vm6 = vmor %vm1230_vm13, %vm1231_vm5  ;;  %vm1235_vm3 = vcmp.eq.f32.partialorder %v1234_v27, 8.507059e+37  ;;  %v3808_v34 = vpop.eup %3807 }
 0x46d   : > { %v1255_v21 = vmul.f32 1.0614054, %v4401_v35  ;;  %v4409_v8 = vsel %vm1190_vm11, %v1192_v51, %v1188_v29  ;;  %v1218_v25 = vsel %vm1217_vm14, %v3800_v15, %v1214_v63  ;;  %v1243_v27 = vmul.f32 %v4389_v42, %v1242_v2 }
 0x46e   : > { %v1256_v6 = vmul.f32 1.0614054, %v4409_v8  ;;  %v4419_v19 = vsel %vm4384_vm15, %v1222_v16, %v1218_v25  ;;  %v1233_v61 = vsel %vm1232_vm6, %v3802_v50, %v1229_v1  ;;  %v4432_v50 = vand.u32 2147483647, %v4412_v18 }
 0x46f   : > { %v1261_v45 = vadd.f32 -1.4531521, %v1255_v21  ;;  %v4425_v15 = vsel %vm1235_vm3, %v1237_v36, %v1233_v61  ;;  %v1258_v37 = vmul.f32 1.0614054, %v4419_v19  ;;  %v1244_v26 = vadd.f32 %v4389_v42, %v1243_v27 }
 0x470   : > { %v1262_v20 = vadd.f32 -1.4531521, %v1256_v6  ;;  %v1259_v16 = vmul.f32 1.0614054, %v4425_v15  ;;  %v1155_v14 = vmul.f32 0.3275911, %v4432_v50  ;;  %vm1246_vm5 = vweird.f32 %v4389_v42 }
 0x471   : > { %v1267_v7 = vmul.f32 %v1261_v45, %v4401_v35  ;;  %v1264_v9 = vadd.f32 -1.4531521, %v1258_v37  ;;  %v1320_v43 = vmul.f32 %v1314_v60, %v4338_v30  ;;  %v1329_v51 = vmul.f32 1.442695, %v1319_v24  ;;  %vm4455_vm9 = vmor %vm1245_vm8, %vm1246_vm5 }
 0x472   : > { %v1268_v23 = vmul.f32 %v1262_v20, %v4409_v8  ;;  %v1265_v11 = vadd.f32 -1.4531521, %v1259_v16  ;;  %v4445_v56 = vadd.f32 1.0, %v1155_v14  ;;  %v1248_v62 = vsel %vm4455_vm9, %v4389_v42, %v1244_v26 }
 0x473   : > { %v1273_v10 = vadd.f32 1.4214138, %v1267_v7  ;;  %v1270_v40 = vmul.f32 %v1264_v9, %v4419_v19  ;;  %v1252_v30 = vor.u32 1.1754944e-38, %v1251_v55  ;;  %vm1250_vm12 = vcmp.eq.f32.partialorder %v1249_v22, 8.507059e+37 }
 0x474   : > { %v1274_v49 = vadd.f32 1.4214138, %v1268_v23  ;;  %v1271_v54 = vmul.f32 %v1265_v11, %v4425_v15  ;;  %3809 = vrcp.f32 %v4445_v56  ;;  %v1145_v6 = vsel %vm1139_vm7, 1.0, %v3886_v13 }
 0x475   : > { %v1279_v52 = vmul.f32 %v1273_v10, %v4401_v35  ;;  %v1276_v5 = vadd.f32 1.4214138, %v1270_v40  ;;  %3811 = vpow2.f32 %v1327_v12  ;;  %v4470_v61 = vsel %vm1250_vm12, %v1252_v30, %v1248_v62 }
 0x476   : > { %v1280_v57 = vmul.f32 %v1274_v49, %v4409_v8  ;;  %v1277_v53 = vadd.f32 1.4214138, %v1271_v54  ;;  %3813 = vpow2.f32 %v1329_v51  ;;  %v1260_v20 = vmul.f32 1.0614054, %v4470_v61 }
 0x477   : > { %v1285_v31 = vadd.f32 -0.28449672, %v1279_v52  ;;  %v1282_v29 = vmul.f32 %v1276_v5, %v4419_v19  ;;  %v1331_v27 = vmul.f32 1.442695, %v1320_v43  ;;  %vm1136_vm13 = vcmp.ge.f32.partialorder %v4320_v41, 0.0 }
 0x478   : > { %v1286_v21 = vadd.f32 -0.28449672, %v1280_v57  ;;  %v1283_v2 = vmul.f32 %v1277_v53, %v4425_v15  ;;  %v1204_v12 = vand.u32 2147483647, %v4445_v56  ;;  %v1266_v14 = vadd.f32 -1.4531521, %v1260_v20 }
 0x479   : > { %v1291_v1 = vmul.f32 %v1285_v31, %v4401_v35  ;;  %v1288_v60 = vadd.f32 -0.28449672, %v1282_v29  ;;  %vm1200_vm11 = vweird.f32 %v4445_v56  ;;  %3815 = vpow2.f32 %v1331_v27 }
 0x47a   : > { %v1292_v25 = vmul.f32 %v1286_v21, %v4409_v8  ;;  %v1289_v45 = vadd.f32 -0.28449672, %v1283_v2  ;;  %v3810_v7 = vpop.eup %3809  ;;  %vm1205_vm6 = vcmp.eq.f32.partialorder %v1204_v12, 8.507059e+37  ;;  %vm1140_vm3 = vcmp.ge.f32.partialorder %v4327_v44, 0.0 }
 0x47b   : > { %v1297_v36 = vadd.f32 0.2548296, %v1291_v1  ;;  %v1294_v42 = vmul.f32 %v1288_v60, %v4419_v19  ;;  %v1196_v10 = vmul.f32 %v3810_v7, %v4445_v56  ;;  %vm1201_vm15 = vweird.f32 %v3810_v7 }
 0x47c   : > { %v1298_v46 = vadd.f32 0.2548296, %v1292_v25  ;;  %v1295_v16 = vmul.f32 %v1289_v45, %v4425_v15  ;;  %vm1202_vm14 = vmor %vm1200_vm11, %vm1201_vm15  ;;  %v1311_v25 = vsub.f32 0.0, %v4432_v50  ;;  %vm1137_vm7 = vcmp.ge.f32.partialorder %v4412_v18, 0.0 }
 0x47d   : > { %v1303_v37 = vmul.f32 %v1297_v36, %v4401_v35  ;;  %v1300_v9 = vadd.f32 0.2548296, %v1294_v42  ;;  %v3812_v35 = vpop.eup %3811  ;;  %v1197_v52 = vsub.f32 1.0, %v1196_v10  ;;  %v1126_v36 = vmul.f32 0.5, %v4310_v32 }
 0x47e   : > { %v1304_v24 = vmul.f32 %v1298_v46, %v4409_v8  ;;  %v1301_v11 = vadd.f32 0.2548296, %v1295_v16  ;;  %v3814_v54 = vpop.eup %3813  ;;  %v1206_v8 = vand.u32 2147483648, %v4445_v56  ;;  %v1128_v44 = vmul.f32 0.5, %v4316_v38 }
 0x47f   : > { %v1333_v23 = vmul.f32 %v4395_v47, %v1303_v37  ;;  %v1306_v26 = vmul.f32 %v1300_v9, %v4419_v19  ;;  %v1272_v47 = vmul.f32 %v1266_v14, %v4470_v61  ;;  %v1198_v31 = vmul.f32 %v3810_v7, %v1197_v52 }
 0x480   : > { %v1334_v40 = vmul.f32 %v3808_v34, %v1304_v24  ;;  %v1307_v39 = vmul.f32 %v1301_v11, %v4425_v15  ;;  %v1142_v19 = vsel %vm1136_vm13, 1.0, %v3886_v13  ;;  %v1207_v29 = vor.u32 1.1754944e-38, %v1206_v8 }
 0x481   : > { %v1339_v49 = vsub.f32 1.0, %v1333_v23  ;;  %v1336_v55 = vmul.f32 %v3812_v35, %v1306_v26  ;;  %v1278_v34 = vadd.f32 1.4214138, %v1272_v47  ;;  %v1199_v51 = vadd.f32 %v3810_v7, %v1198_v31  ;;  %v3816_v23 = vpop.eup %3815 }
 0x482   : > { %v1340_v5 = vsub.f32 1.0, %v1334_v40  ;;  %v1337_v22 = vmul.f32 %v3814_v54, %v1307_v39  ;;  %v1127_v37 = vmul.f32 0.5, %v4313_v33  ;;  %v1317_v9 = vmul.f32 %v1311_v25, %v4432_v50 }
 0x483   : > { %v1345_v57 = vmul.f32 %v1339_v49, %v1141_v28  ;;  %v1342_v53 = vsub.f32 1.0, %v1336_v55  ;;  %v1284_v21 = vmul.f32 %v1278_v34, %v4470_v61  ;;  %v1203_v2 = vsel %vm1202_vm14, %v3810_v7, %v1199_v51 }
 0x484   : > { %v1346_v43 = vmul.f32 %v1340_v5, %v1142_v19  ;;  %v1343_v63 = vsub.f32 1.0, %v1337_v22  ;;  %v1208_v56 = vsel %vm1205_vm6, %v1207_v29, %v1203_v2  ;;  %v1325_v10 = vmul.f32 1.442695, %v1317_v9 }
 0x485   : > { %v1351_v15 = vadd.f32 1.0, %v1345_v57  ;;  %v1348_v1 = vmul.f32 %v1342_v53, %v4368_v17  ;;  %v1290_v60 = vadd.f32 -0.28449672, %v1284_v21  ;;  %v1257_v46 = vmul.f32 1.0614054, %v1208_v56 }
 0x486   : > { %v1352_v62 = vadd.f32 1.0, %v1346_v43  ;;  %v1349_v30 = vmul.f32 %v1343_v63, %v1145_v6  ;;  %3817 = vpow2.f32 %v1325_v10  ;;  %v1146_v40 = vsel %vm1140_vm3, 1.0, %v3886_v13 }
 0x487   : > { %v1357_v41 = vmul.f32 %v1351_v15, %v4362_v3  ;;  %v1354_v45 = vadd.f32 1.0, %v1348_v1  ;;  %v1296_v17 = vmul.f32 %v1290_v60, %v4470_v61  ;;  %v1263_v6 = vadd.f32 -1.4531521, %v1257_v46 }
 0x488   : > { %v1358_v42 = vmul.f32 %v1352_v62, %v4364_v4  ;;  %v1355_v20 = vadd.f32 1.0, %v1349_v30  ;;  %v1143_v55 = vsel %vm1137_vm7, 1.0, %v3886_v13  ;;  %v1125_v57 = vmul.f32 0.5, %v4358_v0 }
 0x489   : > { %v4501_v16 = vmul.f32 %v1354_v45, %v1126_v36  ;;  %v1302_v28 = vadd.f32 0.2548296, %v1296_v17  ;;  %v1269_v4 = vmul.f32 %v1263_v6, %v1208_v56  ;;  %vm5504_vm5 = vcmask 400384  }
 0x48a   : > { %v3471_v3 = vpack.i.bf16 %v1358_v42, %v1357_v41  ;;  %v4503_v7 = vmul.f32 %v1355_v20, %v1127_v37  ;;  %vm5505_vm8 = vmmov %vm5504_vm5  ;;  %vm5508_vm12 = vcmask 244736   ;;  %vm5512_vm14 = vcmask 646144  }
 0x48b   : > { %v3461_v32 = vpack.i.bf16 %v4501_v16, %v1357_v41  ;;  %v1308_v27 = vmul.f32 %v1302_v28, %v4470_v61  ;;  %v1275_v24 = vadd.f32 1.4214138, %v1269_v4  ;;  %vm5506_vm9 = vmmov %vm5504_vm5  ;;  %vm5514_vm3 = vcmask 900096  }
 0x48c   : > { %3472 = vrot.lane.b32.xlu0 %v3471_v3, %s5483_s25  ;;  %v3466_v33 = vpack.i.bf16 %v4503_v7, %v1358_v42  ;;  %v3476_v50 = vpack.i.bf16 %v4503_v7, %v4501_v16  ;;  %v3818_v54 = vpop.eup %3817  ;;  %vm5507_vm10 = vmmov %vm5504_vm5 }
 0x48d   : > { %3462 = vrot.lane.b32.xlu2 %v3461_v32, %s5491_s24  ;;  %v1281_v35 = vmul.f32 %v1275_v24, %v1208_v56  ;;  %v1338_v11 = vmul.f32 %v3816_v23, %v1308_v27  ;;  %vm5509_vm13 = vmmov %vm5508_vm12 }
 0x48e   : > { %3467 = vrot.lane.b32.xlu1 %v3466_v33, %s5491_s24  ;;  %vm5510_vm15 = vmmov %vm5508_vm12 }
 0x48f   : > { %v1287_v12 = vadd.f32 -0.28449672, %v1281_v35  ;;  %v1344_v61 = vsub.f32 1.0, %v1338_v11  ;;  %vm5511_vm11 = vmmov %vm5508_vm12 }
 0x490   : > { %vm5513_vm6 = vmmov %vm5512_vm14 }
 0x491   : > { %v1293_v14 = vmul.f32 %v1287_v12, %v1208_v56  ;;  %v1350_v52 = vmul.f32 %v1344_v61, %v1146_v40  ;;  %vm5515_vm7 = vmmov %vm5514_vm3 }
 0x493   : > { %v1299_v26 = vadd.f32 0.2548296, %v1293_v14  ;;  %v1356_v47 = vadd.f32 1.0, %v1350_v52 }
 0x494   : > { %3477 = vrot.lane.b32.xlu0 %v3476_v50, %s5483_s25 }
 0x495   : > { %v1305_v49 = vmul.f32 %v1299_v26, %v1208_v56  ;;  %v1362_v22 = vmul.f32 %v1356_v47, %v1128_v44 }
 0x496   : > { %3482 = vrot.lane.b32.xlu1 %v3471_v3, %s5489_s27 }
 0x497   : > { %v1335_v39 = vmul.f32 %v3818_v54, %v1305_v49 }
 0x499   : > { %v1341_v8 = vsub.f32 1.0, %v1335_v39 }
 0x49b   : > { %v1347_v5 = vmul.f32 %v1341_v8, %v1143_v55 }
 0x49c   : > { %3487 = vrot.lane.b32.xlu0 %v3476_v50, %s5489_s27 }
 0x49d   : > { %v1353_v31 = vadd.f32 1.0, %v1347_v5 }
 0x49e   : > { %3492 = vrot.lane.b32.xlu1 %v3471_v3, %s5487_s29 }
 0x49f   : > { %v1359_v19 = vmul.f32 %v1353_v31, %v1125_v57 }
 0x4a1   : > { %v3511_v34 = vpack.i.bf16 %v1362_v22, %v1359_v19 }
 0x4a3   : > { %3512 = vrot.lane.b32.xlu2 %v3511_v34, %s5485_s26 }
 0x4a4   : > { %3497 = vrot.lane.b32.xlu0 %v3476_v50, %s5487_s29 }
 0x4a6   : > { %3502 = vrot.lane.b32.xlu1 %v3471_v3, %s5485_s26 }
 0x4ac   : > { %3507 = vrot.lane.b32.xlu0 %v3476_v50, %s5485_s26  ;;  %s5562_s26 = smov 48  }
 0x4b4   : > { %3517 = vrot.lane.b32.xlu0 %v3471_v3, %s5499_s21 }
 0x4e7   : > { %v4529_v38 = vpop.permute.xlu2 %3462 }
 0x4e8   : > { %v3465_v18 = vunpack.i.h.bf16 %v4529_v38  ;;  %v3464_v0 = vunpack.i.l.bf16 %v4529_v38 }
 0x4ea   : > { %v4536_v53 = vsel %vm520_vm0, %v3465_v18, %v1362_v22  ;;  %v4539_v43 = vsel %vm520_vm0, %v3464_v0, %v1359_v19 }
 0x4eb   : > { %v3526_v15 = vpack.i.bf16 %v4536_v53, %v4539_v43  ;;  %v3551_v1 = vpack.i.bf16 %v4501_v16, %v4539_v43  ;;  %v3556_v20 = vpack.i.bf16 %v4536_v53, %v4503_v7 }
 0x4ed   : > { %3527 = vrot.lane.b32.xlu2 %v3526_v15, %s5483_s25  ;;  %3522 = vrot.lane.b32.xlu0 %v3526_v15, %s5491_s24  ;;  %s5561_s25 = smov 32  }
 0x4f5   : > { %3532 = vrot.lane.b32.xlu2 %v3526_v15, %s5489_s27 }
 0x4fd   : > { %3537 = vrot.lane.b32.xlu2 %v3526_v15, %s5487_s29  ;;  %v3513_v14 = vpop.permute.xlu2 %3512 }
 0x4fe   : > { %v4547_v51 = vpop.permute.xlu0 %3472  ;;  %v3515_v38 = vunpack.i.h.bf16 %v3513_v14 }
 0x4ff   : > { %v3475_v62 = vunpack.i.h.bf16 %v4547_v51  ;;  %v3474_v41 = vunpack.i.l.bf16 %v4547_v51 }
 0x500   : > { %v3468_v63 = vpop.permute.xlu1 %3467 }
 0x501   : > { %v3469_v29 = vunpack.i.l.bf16 %v3468_v63  ;;  %v1545_v36 = vsel %vm709_vm1, %v3474_v41, %v3475_v62  ;;  %v3470_v49 = vunpack.i.h.bf16 %v3468_v63 }
 0x503   : > { %v4550_v21 = vsel %vm520_vm0, %v3469_v29, %v3464_v0  ;;  %v4621_v44 = vsel %vm520_vm0, %v3470_v49, %v3465_v18  ;;  %v3514_v0 = vunpack.i.l.bf16 %v3513_v14 }
 0x504   : > { %v3541_v2 = vpack.i.bf16 %v4550_v21, %v4539_v43 }
 0x505   : > { %3552 = vrot.lane.b32.xlu2 %v3551_v1, %s5499_s21 }
 0x506   : > { %v4559_v30 = vpop.permute.xlu0 %3477  ;;  %3542 = vrot.lane.b32.xlu1 %v3541_v2, %s5500_s22  ;;  %3547 = vrot.lane.b32.xlu0 %v3541_v2, %s5501_s30 }
 0x507   : > { %v3480_v56 = vunpack.i.h.bf16 %v4559_v30  ;;  %v3479_v60 = vunpack.i.l.bf16 %v4559_v30 }
 0x508   : > { %v4565_v25 = vpop.permute.xlu1 %3482 }
 0x509   : > { %v1547_v45 = vsel %vm709_vm1, %v3479_v60, %v3480_v56  ;;  %v3485_v46 = vunpack.i.h.bf16 %v4565_v25  ;;  %v3484_v37 = vunpack.i.l.bf16 %v4565_v25  ;;  %v1600_v33 = vpack.c.bf16 %v3479_v60, %v3474_v41 }
 0x50a   : > { %v1601_v42 = vpack.c.bf16 %v1547_v45, %v1545_v36 }
 0x50b   : > { %v1523_v6 = vsel %vm686_vm2, %v3484_v37, %v3485_v46 }
 0x50d   : > { %1686 = vrot.lane.b32.xlu2 %v1601_v42, %s5502_s17 }
 0x50e   : > { %v4578_v17 = vpop.permute.xlu0 %3487  ;;  %3557 = vrot.lane.b32.xlu1 %v3556_v20, %s5499_s21  ;;  %3562 = vrot.lane.b32.xlu0 %v3541_v2, %s5503_s28 }
 0x50f   : > { %v3490_v16 = vunpack.i.h.bf16 %v4578_v17  ;;  %v3489_v3 = vunpack.i.l.bf16 %v4578_v17 }
 0x510   : > { %v4590_v28 = vpop.permute.xlu1 %3492 }
 0x511   : > { %v1525_v7 = vsel %vm686_vm2, %v3489_v3, %v3490_v16  ;;  %v3495_v32 = vunpack.i.h.bf16 %v4590_v28  ;;  %v3494_v4 = vunpack.i.l.bf16 %v4590_v28  ;;  %v1597_v12 = vpack.c.bf16 %v3489_v3, %v3484_v37 }
 0x512   : > { %v1598_v9 = vpack.c.bf16 %v1525_v7, %v1523_v6 }
 0x513   : > { %v1501_v10 = vsel %vm663_vm4, %v3494_v4, %v3495_v32 }
 0x515   : > { %1680 = vrot.lane.b32.xlu2 %v1598_v9, %s5502_s17 }
 0x516   : > { %v4595_v27 = vpop.permute.xlu0 %3497  ;;  %1684 = vrot.lane.b32.xlu0 %v1600_v33, %s5502_s17 }
 0x517   : > { %v3500_v24 = vunpack.i.h.bf16 %v4595_v27  ;;  %v3499_v23 = vunpack.i.l.bf16 %v4595_v27 }
 0x518   : > { %v3503_v19 = vpop.permute.xlu1 %3502 }
 0x519   : > { %v1503_v35 = vsel %vm663_vm4, %v3499_v23, %v3500_v24  ;;  %v1594_v11 = vpack.c.bf16 %v3499_v23, %v3494_v4  ;;  %v3505_v18 = vunpack.i.h.bf16 %v3503_v19 }
 0x51a   : > { %v1595_v50 = vpack.c.bf16 %v1503_v35, %v1501_v10 }
 0x51b   : > { %v1480_v1 = vsel %vm5505_vm8, %v3505_v18, %v3514_v0  ;;  %vm5517_vm8 = vmmov %vm5514_vm3 }
 0x51d   : > { %1674 = vrot.lane.b32.xlu2 %v1595_v50, %s5502_s17 }
 0x51e   : > { %1678 = vrot.lane.b32.xlu0 %v1597_v12, %s5502_s17  ;;  %v3508_v61 = vpop.permute.xlu0 %3507 }
 0x51f   : > { %v3510_v34 = vunpack.i.h.bf16 %v3508_v61  ;;  %v3509_v15 = vunpack.i.l.bf16 %v3508_v61 }
 0x521   : > { %v1482_v63 = vsel %vm5504_vm5, %v3510_v34, %v3515_v38  ;;  %v1481_v20 = vsel %vm5506_vm9, %v3509_v15, %v3510_v34  ;;  %vm5516_vm5 = vmmov %vm5514_vm3 }
 0x522   : > { %v1593_v41 = vpack.c.bf16 %v1482_v63, %v1480_v1  ;;  %vm5518_vm9 = vmmov %vm5513_vm6 }
 0x526   : > { %v3518_v40 = vpop.permute.xlu0 %3517 }
 0x527   : > { %v3519_v45 = vunpack.i.l.bf16 %v3518_v40  ;;  %v3520_v9 = vunpack.i.h.bf16 %v3518_v40 }
 0x529   : > { %v1567_v50 = vsel %vm5508_vm12, %v3519_v45, %v3520_v9 }
 0x547   : > { %v4608_v26 = vpop.permute.xlu2 %3527 }
 0x548   : > { %v3529_v12 = vunpack.i.l.bf16 %v4608_v26 }
 0x54f   : > { %v4610_v52 = vpop.permute.xlu2 %3532 }
 0x550   : > { %v3535_v34 = vunpack.i.h.bf16 %v4610_v52  ;;  %v3534_v38 = vunpack.i.l.bf16 %v4610_v52 }
 0x552   : > { %v1524_v51 = vsel %vm686_vm2, %v3485_v46, %v3534_v38 }
 0x557   : > { %v4632_v22 = vpop.permute.xlu2 %3537 }
 0x558   : > { %v3540_v52 = vunpack.i.h.bf16 %v4632_v22 }
 0x55a   : > { %v1504_v46 = vsel %vm663_vm4, %v3500_v24, %v3540_v52 }
 0x55f   : > { %v3523_v54 = vpop.permute.xlu0 %3522  ;;  %v3553_v2 = vpop.permute.xlu2 %3552 }
 0x560   : > { %v3525_v39 = vunpack.i.h.bf16 %v3523_v54  ;;  %v3524_v8 = vunpack.i.l.bf16 %v3523_v54  ;;  %3567 = vrot.lane.b32.xlu1 %v3523_v54, %s5500_s22  ;;  %v3555_v36 = vunpack.i.h.bf16 %v3553_v2  ;;  %v3554_v4 = vunpack.i.l.bf16 %v3553_v2 }
 0x562   : > { %v4613_v47 = vsel %vm520_vm0, %v3525_v39, %v3470_v49  ;;  %v4616_v55 = vsel %vm520_vm0, %v3524_v8, %v3469_v29  ;;  %v3504_v29 = vunpack.i.l.bf16 %v3503_v19  ;;  %v1603_v3 = vpack.c.bf16 %v3555_v36, %v3519_v45 }
 0x563   : > { %v3571_v5 = vpack.i.bf16 %v4536_v53, %v4616_v55  ;;  %v3576_v57 = vpack.i.bf16 %v4613_v47, %v4621_v44  ;;  %v1581_v31 = vpack.c.bf16 %v4613_v47, %v4616_v55  ;;  %v1568_v61 = vsel %vm5510_vm15, %v3520_v9, %v3554_v4 }
 0x564   : > { %v1591_v60 = vpack.c.bf16 %v3509_v15, %v3504_v29  ;;  %v1479_v6 = vsel %vm5507_vm10, %v3504_v29, %v3505_v18  ;;  %v3539_v15 = vunpack.i.l.bf16 %v4632_v22  ;;  %vm5519_vm10 = vcmask 1031168  }
 0x565   : > { %3572 = vrot.lane.b32.xlu0 %v3571_v5, %s5500_s22  ;;  %3577 = vrot.lane.b32.xlu2 %v3576_v57, %s5500_s22  ;;  %v1592_v7 = vpack.c.bf16 %v1481_v20, %v1479_v6  ;;  %vm5520_vm12 = vmmov %vm5519_vm10 }
 0x566   : > { %v1502_v25 = vsel %vm663_vm4, %v3495_v32, %v3539_v15  ;;  %vm5522_vm15 = vmmov %vm5519_vm10 }
 0x567   : > { %v4659_v39 = vpop.permute.xlu2 %1686  ;;  %v1596_v17 = vpack.c.bf16 %v1504_v46, %v1502_v25 }
 0x568   : > { %3587 = vrot.lane.b32.xlu1 %v3576_v57, %s5501_s30 }
 0x56d   : > { %1672 = vrot.lane.b32.xlu0 %v1594_v11, %s5502_s17  ;;  %3582 = vrot.lane.b32.xlu2 %v3571_v5, %s5501_s30  ;;  %v3530_v11 = vunpack.i.h.bf16 %v4608_v26  ;;  %v1546_v26 = vsel %vm709_vm1, %v3475_v62, %v3529_v12  ;;  %v1526_v62 = vsel %vm686_vm2, %v3490_v16, %v3535_v34 }
 0x56e   : > { %v1599_v0 = vpack.c.bf16 %v1526_v62, %v1524_v51 }
 0x56f   : > { %v1548_v8 = vsel %vm709_vm1, %v3480_v56, %v3530_v11  ;;  %v4680_v30 = vpop.permute.xlu2 %1680 }
 0x570   : > { %1670 = vrot.lane.b32.xlu1 %v1593_v41, %s5502_s17  ;;  %v1602_v19 = vpack.c.bf16 %v1548_v8, %v1546_v26 }
 0x575   : > { %1666 = vrot.lane.b32.xlu0 %v1591_v60, %s5502_s17  ;;  %3592 = vrot.lane.b32.xlu2 %v3571_v5, %s5503_s28 }
 0x577   : > { %v4694_v16 = vpop.permute.xlu2 %1674 }
 0x578   : > { %v4642_v42 = vpop.permute.xlu1 %3542  ;;  %v4644_v37 = vpop.permute.xlu0 %3547  ;;  %1690 = vrot.lane.b32.xlu1 %v1603_v3, %s5502_s17 }
 0x579   : > { %v3545_v1 = vunpack.i.h.bf16 %v4642_v42  ;;  %v3544_v22 = vunpack.i.l.bf16 %v4642_v42  ;;  %v3549_v42 = vunpack.i.l.bf16 %v4644_v37 }
 0x57b   : > { %v1449_v45 = vsel %vm5516_vm5, %v3544_v22, %v3545_v1  ;;  %vm5527_vm5 = vmmov %vm5513_vm6 }
 0x57d   : > { %1668 = vrot.lane.b32.xlu2 %v1592_v7, %s5502_s17  ;;  %v3550_v7 = vunpack.i.h.bf16 %v4644_v37 }
 0x580   : > { %v3558_v33 = vpop.permute.xlu1 %3557  ;;  %v4650_v23 = vpop.permute.xlu0 %3562  ;;  %3597 = vrot.lane.b32.xlu1 %v3576_v57, %s5503_s28 }
 0x581   : > { %v3560_v10 = vunpack.i.h.bf16 %v3558_v33  ;;  %v3559_v35 = vunpack.i.l.bf16 %v3558_v33  ;;  %v3565_v52 = vunpack.i.h.bf16 %v4650_v23  ;;  %v3564_v15 = vunpack.i.l.bf16 %v4650_v23 }
 0x583   : > { %v1569_v14 = vsel %vm5509_vm13, %v3555_v36, %v3559_v35  ;;  %v1570_v49 = vsel %vm5511_vm11, %v3559_v35, %v3560_v10  ;;  %vm5521_vm13 = vmmov %vm5519_vm10 }
 0x584   : > { %v1604_v40 = vpack.c.bf16 %v1569_v14, %v1567_v50  ;;  %v1605_v54 = vpack.c.bf16 %v1570_v49, %v1568_v61  ;;  %v1421_v14 = vsel %vm5519_vm10, %v3549_v42, %v3550_v7  ;;  %vm5523_vm11 = vmmov %vm5514_vm3 }
 0x586   : > { %1692 = vrot.lane.b32.xlu0 %v1604_v40, %s5502_s17  ;;  %1694 = vrot.lane.b32.xlu2 %v1605_v54, %s5502_s17 }
 0x588   : > { %v1685_v5 = vpop.permute.xlu0 %1684  ;;  %1688 = vrot.lane.b32.xlu1 %v1602_v19, %s5502_s17 }
 0x589   : > { %v1710_v57 = vsel %vm5512_vm14, %v1685_v5, %v4659_v39  ;;  %vm5524_vm14 = vmmov %vm5514_vm3 }
 0x58a   : > { %1744 = vmatpush.bf16.msra.mxu3 %v1710_v57 }
 0x590   : > { %v1679_v56 = vpop.permute.xlu0 %1678  ;;  %1682 = vrot.lane.b32.xlu1 %v1599_v0, %s5502_s17 }
 0x591   : > { %v1708_v18 = vsel %vm5513_vm6, %v1679_v56, %v4680_v30 }
 0x592   : > { %1745 = vmatpush.bf16.msra.mxu3 %v1708_v18 }
 0x598   : > { %1676 = vrot.lane.b32.xlu1 %v1596_v17, %s5502_s17 }
 0x5bf   : > { %v3578_v63 = vpop.permute.xlu2 %3577 }
 0x5c0   : > { %v3580_v41 = vunpack.i.h.bf16 %v3578_v63  ;;  %v3579_v2 = vunpack.i.l.bf16 %v3578_v63 }
 0x5c2   : > { %v1453_v24 = vsel %vm5515_vm7, %v3579_v2, %v3580_v41  ;;  %vm5526_vm7 = vmmov %vm5513_vm6 }
 0x5c7   : > { %v3583_v29 = vpop.permute.xlu2 %3582 }
 0x5c8   : > { %v3584_v9 = vunpack.i.l.bf16 %v3583_v29  ;;  %v3585_v10 = vunpack.i.h.bf16 %v3583_v29 }
 0x5ca   : > { %v1422_v37 = vsel %vm5520_vm12, %v3550_v7, %v3584_v9  ;;  %vm5531_vm12 = vmmov %vm5527_vm5 }
 0x5cf   : > { %v3593_v4 = vpop.permute.xlu2 %3592 }
 0x5d0   : > { %v3594_v0 = vunpack.i.l.bf16 %v3593_v4  ;;  %v3595_v63 = vunpack.i.h.bf16 %v3593_v4 }
 0x5d2   : > { %v3568_v28 = vpop.permute.xlu1 %3567 }
 0x5d3   : > { %v3570_v54 = vunpack.i.h.bf16 %v3568_v28  ;;  %v3569_v26 = vunpack.i.l.bf16 %v3568_v28 }
 0x5d5   : > { %v1454_v34 = vsel %vm5524_vm14, %v3580_v41, %v3570_v54  ;;  %vm5535_vm14 = vcmask 130048  }
 0x5d7   : > { %v3573_v60 = vpop.permute.xlu0 %3572  ;;  %v1669_v38 = vpop.permute.xlu2 %1668 }
 0x5d8   : > { %v3575_v32 = vunpack.i.h.bf16 %v3573_v60  ;;  %v3574_v36 = vunpack.i.l.bf16 %v3573_v60 }
 0x5da   : > { %v1450_v27 = vsel %vm5514_vm3, %v3545_v1, %v3574_v36  ;;  %v1452_v20 = vsel %vm5517_vm8, %v3575_v32, %v3579_v2  ;;  %v3588_v33 = vpop.permute.xlu1 %3587  ;;  %v1451_v19 = vsel %vm5523_vm11, %v3574_v36, %v3569_v26  ;;  %vm5525_vm3 = vcmask 1039360   ;;  %vm5534_vm11 = vmmov %vm5527_vm5 }
 0x5db   : > { %v1589_v3 = vpack.c.bf16 %v1453_v24, %v1450_v27  ;;  %v1588_v6 = vpack.c.bf16 %v1452_v20, %v1449_v45  ;;  %v3590_v35 = vunpack.i.h.bf16 %v3588_v33  ;;  %v3589_v11 = vunpack.i.l.bf16 %v3588_v33  ;;  %vm5528_vm8 = vmmov %vm5525_vm3 }
 0x5dc   : > { %v1590_v56 = vpack.c.bf16 %v1454_v34, %v1451_v19  ;;  %v1400_v22 = vsel %vm5525_vm3, %v3565_v52, %v3594_v0  ;;  %vm5530_vm10 = vmmov %vm5525_vm3  ;;  %v1580_v20 = vpack.c.bf16 %v4621_v44, %v4550_v21 }
 0x5dd   : > { %1662 = vrot.lane.b32.xlu2 %v1589_v3, %s5502_s17  ;;  %1660 = vrot.lane.b32.xlu0 %v1588_v6, %s5502_s17  ;;  %v1587_v61 = vpack.c.bf16 %v3590_v35, %v3584_v9  ;;  %v1424_v49 = vsel %vm5521_vm13, %v3589_v11, %v3590_v35  ;;  %v1423_v40 = vsel %vm5522_vm15, %v3585_v10, %v3589_v11  ;;  %vm5532_vm13 = vmmov %vm5527_vm5 }
 0x5de   : > { %v1586_v8 = vpack.c.bf16 %v1424_v49, %v1422_v37  ;;  %v1585_v5 = vpack.c.bf16 %v1423_v40, %v1421_v14  ;;  %v1579_v3 = vpack.c.bf16 %v4536_v53, %v4539_v43  ;;  %vm5533_vm15 = vmmov %vm5527_vm5  ;;  %v3280_v53 = vld [vmem:[%s5454_s5 + $0x4] sm:$0xf]  ;;  %v3263_v43 = vld [vmem:[%s5454_s5 + $0x8] sm:$0xf0] }
 0x5df   : > { %v1673_v50 = vpop.permute.xlu0 %1672  ;;  %1658 = vrot.lane.b32.xlu1 %v1587_v61, %s5502_s17  ;;  %v3266_v55 = vor.u32 %v3280_v53, %v3263_v43  ;;  %v3261_v37 = vld [vmem:[%s5454_s5] sm:$0xf]  ;;  %v3281_v49 = vld [vmem:[%s5454_s5 + $0x4] sm:$0xf0] }
 0x5e0   : > { %v1706_v12 = vsel %vm5518_vm9, %v1673_v50, %v4694_v16  ;;  %v1695_v29 = vpop.permute.xlu2 %1694  ;;  %vm5529_vm9 = vmmov %vm5525_vm3 }
 0x5e1   : > { %1746 = vmatpush.bf16.msra.mxu3 %v1706_v12  ;;  %v1399_v23 = vsel %vm5529_vm9, %v3564_v15, %v3565_v52  ;;  %vm5537_vm3 = vmmov %vm5527_vm5 }
 0x5e2   : > { %v1671_v57 = vpop.permute.xlu1 %1670  ;;  %vm5541_vm9 = vmmov %vm5537_vm3 }
 0x5e3   : > { %v1705_v47 = vsel %vm5534_vm11, %v1669_v38, %v1671_v57  ;;  %vm5546_vm11 = vcmask 556032  }
 0x5e5   : > { %1656 = vrot.lane.b32.xlu2 %v1586_v8, %s5502_s17  ;;  %1654 = vrot.lane.b32.xlu0 %v1585_v5, %s5502_s17  ;;  %v3262_v8 = vor.u32 %v3281_v49, %v3261_v37 }
 0x5e7   : > { %v1667_v51 = vpop.permute.xlu0 %1666  ;;  %1664 = vrot.lane.b32.xlu1 %v1590_v56, %s5502_s17 }
 0x5e8   : > { %v1704_v62 = vsel %vm5513_vm6, %v1667_v51, %v1669_v38  ;;  %vm5536_vm6 = vmmov %vm5535_vm14 }
 0x5e9   : > { %1747 = vmatpush.bf16.msra.mxu3 %v1704_v62 }
 0x5ea   : > { %v1691_v18 = vpop.permute.xlu1 %1690 }
 0x5f2   : > { %v3598_v25 = vpop.permute.xlu1 %3597 }
 0x5f3   : > { %v3600_v46 = vunpack.i.h.bf16 %v3598_v25  ;;  %v3599_v17 = vunpack.i.l.bf16 %v3598_v25 }
 0x5f5   : > { %v1584_v41 = vpack.c.bf16 %v3600_v46, %v3594_v0  ;;  %v1402_v60 = vsel %vm5528_vm8, %v3599_v17, %v3600_v46  ;;  %v1401_v36 = vsel %vm5530_vm10, %v3595_v63, %v3599_v17  ;;  %vm5540_vm8 = vmmov %vm5537_vm3 }
 0x5f6   : > { %v1583_v32 = vpack.c.bf16 %v1402_v60, %v1400_v22  ;;  %v1582_v27 = vpack.c.bf16 %v1401_v36, %v1399_v23  ;;  %vm5542_vm10 = vmmov %vm5537_vm3 }
 0x5f7   : > { %1652 = vrot.lane.b32.xlu1 %v1584_v41, %s5502_s17 }
 0x5f8   : > { %v1693_v1 = vpop.permute.xlu0 %1692  ;;  %1650 = vrot.lane.b32.xlu2 %v1583_v32, %s5502_s17  ;;  %1648 = vrot.lane.b32.xlu0 %v1582_v27, %s5502_s17 }
 0x5f9   : > { %v1712_v2 = vsel %vm5526_vm7, %v1691_v18, %v1693_v1  ;;  %v1713_v28 = vsel %vm5527_vm5, %v1693_v1, %v1695_v29  ;;  %vm5538_vm7 = vmmov %vm5536_vm6 }
 0x5fa   : > { %1765 = vmatpush.bf16.msrb.mxu0 %v1712_v2  ;;  %1793 = vmatpush.bf16.msrb.mxu1 %v1713_v28  ;;  %v1689_v24 = vpop.permute.xlu1 %1688  ;;  %vm5539_vm5 = vmmov %vm5537_vm3 }
 0x5fb   : > { %v1711_v45 = vsel %vm5531_vm12, %v4659_v39, %v1689_v24  ;;  %vm5543_vm12 = vmmov %vm5537_vm3 }
 0x5fc   : > { %1772 = vmatpush.bf16.msra.mxu2 %v1711_v45 }
 0x5fd   : > { %3267 = vmatmul.msk.bf16.vlgmr.msrb.gmra.mxu0 %vm5535_vm14, %v3266_v55  ;;  %3268 = vmatmul.msk.bf16.vlgmr.msrb.gmra.mxu1 %vm5536_vm6, %v3266_v55  ;;  %vm5547_vm14 = vmmov %vm5546_vm11 }
 0x5fe   : > { %1821 = vmatpush.bf16.msra.mxu1 %v1695_v29  ;;  %1800 = vmatpush.bf16.msra.mxu0 %v1689_v24  ;;  %vm5548_vm6 = vmmov %vm5546_vm11 }
 0x5ff   : > { %1646 = vrot.lane.b32.xlu1 %v1581_v31, %s5502_s17 }
 0x600   : > { %1644 = vrot.lane.b32.xlu2 %v1580_v20, %s5502_s17  ;;  %1642 = vrot.lane.b32.xlu0 %v1579_v3, %s5502_s17 }
 0x602   : > { %v1683_v6 = vpop.permute.xlu1 %1682 }
 0x603   : > { %1801 = vmatpush.bf16.msra.mxu0 %v1683_v6  ;;  %v1709_v39 = vsel %vm5532_vm13, %v4680_v30, %v1683_v6  ;;  %vm5544_vm13 = vmmov %vm5537_vm3 }
 0x604   : > { %1773 = vmatpush.bf16.msra.mxu2 %v1709_v39 }
 0x60a   : > { %v1677_v7 = vpop.permute.xlu1 %1676 }
 0x60b   : > { %1802 = vmatpush.bf16.msra.mxu0 %v1677_v7  ;;  %v1707_v21 = vsel %vm5533_vm15, %v4694_v16, %v1677_v7  ;;  %vm5545_vm15 = vmmov %vm5537_vm3 }
 0x60c   : > { %1774 = vmatpush.bf16.msra.mxu2 %v1707_v21 }
 0x60d   : > { %3269 = vmatmul.msk.bf16.vlgmr.msra.gmra.mxu1 %vm5538_vm7, %v3266_v55 }
 0x60f   : > { %1803 = vmatpush.bf16.msra.mxu0 %v1671_v57 }
 0x610   : > { %1775 = vmatpush.bf16.msra.mxu2 %v1705_v47 }
 0x637   : > { %v1663_v44 = vpop.permute.xlu2 %1662 }
 0x63f   : > { %v1657_v42 = vpop.permute.xlu2 %1656 }
 0x64f   : > { %v1661_v31 = vpop.permute.xlu0 %1660 }
 0x650   : > { %v1702_v30 = vsel %vm5537_vm3, %v1661_v31, %v1663_v44  ;;  %v1905_v31 = vld [vmem:[%s5455_s6] sm:$0xff]  ;;  %vm5549_vm3 = vmmov %vm5548_vm6 }
 0x651   : > { %1748 = vmatpush.bf16.msra.mxu3 %v1702_v30  ;;  %v1659_v16 = vpop.permute.xlu1 %1658  ;;  %1909 = vperm.xlu1 %3601, %v1905_v31   ;;  %v1906_v30 = vld [vmem:[%s5455_s6 + $0x8] sm:$0xff] }
 0x652   : > { %v1701_v35 = vsel %vm5541_vm9, %v1657_v42, %v1659_v16  ;;  %v1651_v11 = vpop.permute.xlu2 %1650 }
 0x657   : > { %v1655_v9 = vpop.permute.xlu0 %1654 }
 0x658   : > { %v1700_v4 = vsel %vm5539_vm5, %v1655_v9, %v1657_v42  ;;  %v1923_v9 = vld [vmem:[%s5456_s7] sm:$0xff] }
 0x659   : > { %1749 = vmatpush.bf16.msra.mxu3 %v1700_v4  ;;  %v1665_v33 = vpop.permute.xlu1 %1664  ;;  %1914 = vperm.xlu1 %3601, %v1906_v30  }
 0x65a   : > { %1804 = vmatpush.bf16.msra.mxu0 %v1665_v33  ;;  %v1703_v10 = vsel %vm5540_vm8, %v1663_v44, %v1665_v33  ;;  %v1645_v40 = vpop.permute.xlu2 %1644 }
 0x65b   : > { %1776 = vmatpush.bf16.msra.mxu2 %v1703_v10 }
 0x65e   : > { %1805 = vmatpush.bf16.msra.mxu0 %v1659_v16 }
 0x65f   : > { %1777 = vmatpush.bf16.msra.mxu2 %v1701_v35 }
 0x661   : > { %1927 = vperm.xlu1 %3601, %v1923_v9  }
 0x669   : > { %v1653_v50 = vpop.permute.xlu1 %1652 }
 0x66a   : > { %1806 = vmatpush.bf16.msra.mxu0 %v1653_v50  ;;  %v1699_v12 = vsel %vm5542_vm10, %v1651_v11, %v1653_v50  ;;  %v1649_v14 = vpop.permute.xlu0 %1648 }
 0x66b   : > { %1778 = vmatpush.bf16.msra.mxu2 %v1699_v12  ;;  %v1698_v61 = vsel %vm5543_vm12, %v1649_v14, %v1651_v11 }
 0x66c   : > { %1750 = vmatpush.bf16.msra.mxu3 %v1698_v61 }
 0x671   : > { %v1647_v54 = vpop.permute.xlu1 %1646 }
 0x672   : > { %1807 = vmatpush.bf16.msra.mxu0 %v1647_v54  ;;  %v1697_v26 = vsel %vm5544_vm13, %v1645_v40, %v1647_v54  ;;  %v1643_v5 = vpop.permute.xlu0 %1642 }
 0x673   : > { %1779 = vmatpush.bf16.msra.mxu2 %v1697_v26  ;;  %v1696_v57 = vsel %vm5545_vm15, %v1643_v5, %v1645_v40 }
 0x674   : > { %1751 = vmatpush.bf16.msra.mxu3 %v1696_v57 }
 0x675   : > { %1808 = vmatmul.bf16.vlgmr.msra.gmra.mxu0 %v3262_v8 }
 0x676   : > { %1780 = vmatmul.bf16.vlgmr.msra.gmra.mxu2 %v3262_v8 }
 0x677   : > { %1752 = vmatmul.bf16.vlgmr.msra.gmra.mxu3 %v3262_v8 }
 0x67a   : > { %v1767_v19 = vpop.f32.mrf.mxu0  ;;  %v1795_v34 = vpop.f32.mrf.mxu1 }
 0x682   : > { %v1769_v38 = vpop.f32.mrf.mxu0  ;;  %v1797_v51 = vpop.f32.mrf.mxu1 }
 0x68a   : > { %v1823_v56 = vpop.f32.mrf.mxu1 }
 0x692   : > { %v1825_v1 = vpop.f32.mrf.mxu1 }
 0x6f2   : > { %v1809_v62 = vpop.f32.mrf.mxu0 }
 0x6f3   : > { %v1824_v52 = vadd.f32 %v1823_v56, %v1809_v62 }
 0x6f5   : > { %v1830_v63 = vmul.f32 %v1824_v52, %v4269_v48 }
 0x6f7   : > { %v1835_v2 = vsel %vm5546_vm11, %v1830_v63, 0.0 }
 0x6f9   : > { %v1781_v18 = vpop.f32.mrf.mxu2 }
 0x6fa   : > { %v1796_v0 = vadd.f32 %v1795_v34, %v1781_v18  ;;  %v1753_v15 = vpop.f32.mrf.mxu3  ;;  %v1811_v29 = vpop.f32.mrf.mxu0 }
 0x6fb   : > { %v1768_v25 = vadd.f32 %v1767_v19, %v1753_v15  ;;  %v1826_v28 = vadd.f32 %v1825_v1, %v1811_v29  ;;  %v1924_v19 = vld [vmem:[%s5456_s7 + $0x8] sm:$0xff] }
 0x6fc   : > { %v1829_v46 = vmul.f32 %v1796_v0, %v4273_v59  ;;  %1932 = vperm.xlu1 %3601, %v1924_v19  }
 0x6fd   : > { %v1828_v17 = vmul.f32 %v1768_v25, %v4271_v58  ;;  %v1833_v24 = vmul.f32 %v1826_v28, %v4269_v48 }
 0x6ff   : > { %v1834_v41 = vadd.f32 %v1829_v46, %v1828_v17  ;;  %v1839_v6 = vsel %vm5547_vm14, %v1833_v24, 0.0 }
 0x701   : > { %v1783_v22 = vpop.f32.mrf.mxu2  ;;  %v1836_v27 = vadd.f32 %v1835_v2, %v1834_v41 }
 0x702   : > { %v1755_v60 = vpop.f32.mrf.mxu3  ;;  %v1798_v32 = vadd.f32 %v1797_v51, %v1783_v22  ;;  %v1910_v22 = vpop.permute.xlu1 %1909 }
 0x703   : > { %v1770_v23 = vadd.f32 %v1769_v38, %v1755_v60 }
 0x704   : > { %v1832_v45 = vmul.f32 %v1798_v32, %v4273_v59 }
 0x705   : > { %v1831_v36 = vmul.f32 %v1770_v23, %v4271_v58 }
 0x707   : > { %v1837_v20 = vadd.f32 %v1836_v27, %v1831_v36 }
 0x709   : > { %v1838_v3 = vadd.f32 %v1837_v20, %v1832_v45 }
 0x70a   : > { %v1915_v60 = vpop.permute.xlu1 %1914 }
 0x70b   : > { %v1840_v39 = vadd.f32 %v1839_v6, %v1838_v3 }
 0x70d   : > { %1841 = vadd.xlane.f32.xlu0 %v1840_v39 }
 0x712   : > { %v1928_v27 = vpop.permute.xlu1 %1927 }
 0x780   : > { %v1842_v7 = vpop.xlane.xlu0 %1841 }
 0x781   : > { %v1843_v21 = vrot.slane %v1842_v7, 4 }
 0x783   : > { %v1844_v47 = vadd.f32 %v1843_v21, %v1842_v7 }
 0x785   : > { %v1845_v53 = vrot.slane %v1844_v47, 2 }
 0x787   : > { %v1846_v43 = vadd.f32 %v1845_v53, %v1844_v47 }
 0x789   : > { %v1847_v55 = vrot.slane %v1846_v43, 1 }
 0x78b   : > { %v1848_v44 = vadd.f32 %v1847_v55, %v1846_v43  ;;  %v1933_v55 = vpop.permute.xlu1 %1932 }
 0x78d   : > { %3288 = vpush %v1848_v44 }
 0x7be   : > { %s3289_s29 = spop %3288 }
 0x7bf   : > { %v1850_v16 = vstv %s3289_s29 }
 0x7c0   : > { %v1851_v42 = vmul.f32 0.00024414063, %v1850_v16 }
 0x7c2   : > { %v4787_v4 = vsub.f32 %v1828_v17, %v1851_v42  ;;  %v1853_v33 = vsub.f32 %v1829_v46, %v1851_v42  ;;  %v4789_v10 = vsub.f32 %v1830_v63, %v1851_v42  ;;  %v1855_v35 = vsub.f32 %v1831_v36, %v1851_v42 }
 0x7c3   : > { %v1857_v11 = vsub.f32 %v1833_v24, %v1851_v42  ;;  %v1856_v50 = vsub.f32 %v1832_v45, %v1851_v42 }
 0x7c4   : > { %v1858_v12 = vmul.f32 %v4787_v4, %v4787_v4  ;;  %v1859_v14 = vmul.f32 %v1853_v33, %v1853_v33  ;;  %v1860_v61 = vmul.f32 %v4789_v10, %v4789_v10  ;;  %v1861_v37 = vmul.f32 %v1855_v35, %v1855_v35 }
 0x7c5   : > { %v1863_v26 = vmul.f32 %v1857_v11, %v1857_v11  ;;  %v1862_v8 = vmul.f32 %v1856_v50, %v1856_v50 }
 0x7c6   : > { %v1864_v49 = vmul.f32 %v1858_v12, %v4271_v58  ;;  %v1865_v40 = vmul.f32 %v1859_v14, %v4273_v59  ;;  %v1866_v54 = vmul.f32 %v1860_v61, %v4269_v48  ;;  %v1867_v34 = vmul.f32 %v1861_v37, %v4271_v58  ;;  %v3861_v61 = vld [vmem:[%s3981_s23 + $0x18] sm:$0xff] }
 0x7c7   : > { %v1869_v51 = vmul.f32 %v1863_v26, %v4269_v48  ;;  %v1868_v62 = vmul.f32 %v1862_v8, %v4273_v59  ;;  %v3864_v26 = vld [vmem:[%s3981_s23 + $0x28] sm:$0xff] }
 0x7c8   : > { %v1870_v5 = vadd.f32 %v1865_v40, %v1864_v49  ;;  %v1871_v57 = vsel %vm5548_vm6, %v1866_v54, 0.0  ;;  %v3863_v40 = vld [vmem:[%s3981_s23 + $0x8] sm:$0xff] }
 0x7c9   : > { %v1875_v0 = vsel %vm5549_vm3, %v1869_v51, 0.0 }
 0x7ca   : > { %v1872_v38 = vadd.f32 %v1871_v57, %v1870_v5 }
 0x7cc   : > { %v1873_v56 = vadd.f32 %v1872_v38, %v1867_v34 }
 0x7ce   : > { %v1874_v18 = vadd.f32 %v1873_v56, %v1868_v62 }
 0x7d0   : > { %v1876_v52 = vadd.f32 %v1875_v0, %v1874_v18 }
 0x7d2   : > { %1877 = vadd.xlane.f32.xlu2 %v1876_v52 }
 0x845   : > { %v1878_v15 = vpop.xlane.xlu2 %1877 }
 0x846   : > { %v1879_v25 = vrot.slane %v1878_v15, 4 }
 0x848   : > { %v1880_v46 = vadd.f32 %v1879_v25, %v1878_v15 }
 0x84a   : > { %v1881_v17 = vrot.slane %v1880_v46, 2 }
 0x84c   : > { %v1882_v63 = vadd.f32 %v1881_v17, %v1880_v46 }
 0x84e   : > { %v1883_v29 = vrot.slane %v1882_v63, 1 }
 0x850   : > { %v1884_v1 = vadd.f32 %v1883_v29, %v1882_v63 }
 0x852   : > { %3290 = vpush %v1884_v1 }
 0x883   : > { %s3291_s29 = spop %3290 }
 0x884   : > { %v1886_v41 = vstv %s3291_s29 }
 0x885   : > { %v1887_v2 = vmul.f32 0.00024414063, %v1886_v41 }
 0x887   : > { %v1888_v28 = vadd.f32 1e-05, %v1887_v2 }
 0x889   : > { %3819 = vrsqrt.f32 %v1888_v28  ;;  %vm1895_vm5 = vweird.f32 %v1888_v28 }
 0x88f   : > { %v3820_v32 = vpop.eup %3819 }
 0x890   : > { %v1890_v23 = vmul.f32 %v3820_v32, %v1888_v28  ;;  %vm1896_vm7 = vweird.f32 %v3820_v32  ;;  %v3865_v28 = vld [vmem:[%s3981_s23] sm:$0xff] }
 0x891   : > { %vm1897_vm8 = vmor %vm1895_vm5, %vm1896_vm7 }
 0x892   : > { %v1891_v36 = vmul.f32 %v3820_v32, %v1890_v23 }
 0x894   : > { %v1892_v24 = vmul.f32 0.5, %v1891_v36  ;;  %v3866_v36 = vld [vmem:[%s3981_s23 + $0x10] sm:$0xff] }
 0x896   : > { %v1893_v45 = vsub.f32 1.5, %v1892_v24 }
 0x898   : > { %v1894_v20 = vmul.f32 %v3820_v32, %v1893_v45 }
 0x89a   : > { %v1898_v3 = vsel %vm1897_vm8, %v3820_v32, %v1894_v20 }
 0x89b   : > { %v1900_v6 = vmul.f32 %v1898_v3, %v1853_v33  ;;  %v1902_v39 = vmul.f32 %v1898_v3, %v1855_v35  ;;  %v1903_v7 = vmul.f32 %v1898_v3, %v1856_v50  ;;  %v1904_v21 = vmul.f32 %v1898_v3, %v1857_v11 }
 0x89c   : > { %v1899_v31 = vmul.f32 %v1898_v3, %v4787_v4  ;;  %v1901_v12 = vmul.f32 %v1898_v3, %v4789_v10  ;;  %v3862_v4 = vld [vmem:[%s3981_s23 + $0x20] sm:$0xff]  ;;  %s5560_s23 = smov 68  }
 0x89d   : > { %v1918_v47 = vmul.f32 %v1910_v22, %v1900_v6  ;;  %v1920_v53 = vmul.f32 %v1915_v60, %v1902_v39  ;;  %v1921_v43 = vmul.f32 %v1915_v60, %v1903_v7  ;;  %v1922_v44 = vmul.f32 %v1915_v60, %v1904_v21 }
 0x89e   : > { %v1917_v14 = vmul.f32 %v1910_v22, %v1899_v31  ;;  %v1919_v34 = vmul.f32 %v1910_v22, %v1901_v12 }
 0x89f   : > { %v1936_v30 = vadd.f32 %v1928_v27, %v1918_v47  ;;  %v1938_v16 = vadd.f32 %v1933_v55, %v1920_v53  ;;  %v1939_v42 = vadd.f32 %v1933_v55, %v1921_v43  ;;  %v1940_v9 = vadd.f32 %v1933_v55, %v1922_v44 }
 0x8a0   : > { %v1935_v38 = vadd.f32 %v1928_v27, %v1917_v14  ;;  %v1937_v25 = vadd.f32 %v1928_v27, %v1919_v34 }
 0x8a1   : > { %v1942_v33 = vmul.f32 %v1936_v30, %v4273_v59  ;;  %v1944_v35 = vmul.f32 %v1938_v16, %v4271_v58  ;;  %v1945_v11 = vmul.f32 %v1939_v42, %v4273_v59  ;;  %v1946_v50 = vmul.f32 %v1940_v9, %v4269_v48 }
 0x8a2   : > { %v1941_v46 = vmul.f32 %v1935_v38, %v4271_v58  ;;  %v1943_v41 = vmul.f32 %v1937_v25, %v4269_v48 }
 0x8a3   : > { %v4813_v37 = vadd.f32 %v3861_v61, %v1944_v35  ;;  %v4816_v49 = vadd.f32 %v3862_v4, %v1945_v11  ;;  %v4819_v54 = vadd.f32 %v3863_v40, %v1942_v33  ;;  %v4822_v8 = vadd.f32 %v3864_v26, %v1946_v50 }
 0x8a4   : > { %v4849_v60 = vadd.f32 %v3865_v28, %v1941_v46  ;;  %v4854_v27 = vadd.f32 %v3866_v36, %v1943_v41 }
 0x8a5   : > { %v4825_v5 = vmul.f32 0.70710677, %v4813_v37  ;;  %v4828_v57 = vmul.f32 0.70710677, %v4816_v49  ;;  %v4831_v10 = vmul.f32 0.70710677, %v4822_v8 }
 0x8a6   : > { %v4834_v19 = vmul.f32 0.70710677, %v4819_v54  ;;  %v4857_v6 = vmul.f32 0.70710677, %v4849_v60  ;;  %v4865_v16 = vmul.f32 0.70710677, %v4854_v27 }
 0x8a7   : > { %v1980_v51 = vand.u32 2147483647, %v4825_v5  ;;  %v1981_v62 = vand.u32 2147483647, %v4828_v57  ;;  %v4839_v56 = vand.u32 2147483647, %v4831_v10 }
 0x8a8   : > { %v1978_v15 = vand.u32 2147483647, %v4834_v19  ;;  %v4872_v35 = vand.u32 2147483647, %v4857_v6  ;;  %v4880_v38 = vand.u32 2147483647, %v4865_v16 }
 0x8a9   : > { %v1986_v18 = vmul.f32 0.3275911, %v1980_v51  ;;  %v1987_v0 = vmul.f32 0.3275911, %v1981_v62  ;;  %v1988_v52 = vmul.f32 0.3275911, %v4839_v56 }
 0x8aa   : > { %v1984_v1 = vmul.f32 0.3275911, %v1978_v15  ;;  %v2142_v22 = vsub.f32 0.0, %v1980_v51  ;;  %v2143_v2 = vsub.f32 0.0, %v1981_v62  ;;  %v2140_v55 = vsub.f32 0.0, %v1978_v15 }
 0x8ab   : > { %v1992_v17 = vadd.f32 1.0, %v1986_v18  ;;  %v1993_v63 = vadd.f32 1.0, %v1987_v0  ;;  %v4844_v29 = vadd.f32 1.0, %v1988_v52  ;;  %v1983_v4 = vmul.f32 0.3275911, %v4872_v35 }
 0x8ac   : > { %v4851_v32 = vadd.f32 1.0, %v1984_v1  ;;  %v2148_v23 = vmul.f32 %v2142_v22, %v1980_v51  ;;  %v2149_v3 = vmul.f32 %v2143_v2, %v1981_v62  ;;  %v2146_v18 = vmul.f32 %v2140_v55, %v1978_v15 }
 0x8ad   : > { %3821 = vrcp.f32 %v1992_v17  ;;  %v2049_v45 = vand.u32 2147483647, %v1992_v17  ;;  %v2051_v20 = vand.u32 2147483648, %v1992_v17  ;;  %v2064_v21 = vand.u32 2147483647, %v1993_v63 }
 0x8ae   : > { %3823 = vrcp.f32 %v1993_v63  ;;  %v2066_v47 = vand.u32 2147483648, %v1993_v63  ;;  %vm2045_vm9 = vweird.f32 %v1992_v17  ;;  %vm2060_vm10 = vweird.f32 %v1993_v63 }
 0x8af   : > { %3825 = vrcp.f32 %v4844_v29  ;;  %v2157_v30 = vmul.f32 1.442695, %v2148_v23  ;;  %vm4867_vm12 = vcmp.eq.f32.partialorder %v2049_v45, 8.507059e+37  ;;  %v2052_v9 = vor.u32 1.1754944e-38, %v2051_v20 }
 0x8b0   : > { %3827 = vrcp.f32 %v4851_v32  ;;  %vm4874_vm15 = vcmp.eq.f32.partialorder %v2064_v21, 8.507059e+37  ;;  %v2067_v12 = vor.u32 1.1754944e-38, %v2066_v47  ;;  %v2159_v61 = vmul.f32 1.442695, %v2149_v3 }
 0x8b1   : > { %3829 = vpow2.f32 %v2157_v30  ;;  %v4884_v0 = vadd.f32 1.0, %v1983_v4  ;;  %v2019_v25 = vand.u32 2147483647, %v4851_v32  ;;  %v2021_v46 = vand.u32 2147483648, %v4851_v32 }
 0x8b2   : > { %v1985_v1 = vmul.f32 0.3275911, %v4880_v38  ;;  %vm2015_vm3 = vweird.f32 %v4851_v32  ;;  %v2153_v20 = vmul.f32 1.442695, %v2146_v18 }
 0x8b3   : > { %v3822_v24 = vpop.eup %3821  ;;  %3831 = vrcp.f32 %v4884_v0  ;;  %vm4905_vm5 = vcmp.eq.f32.partialorder %v2019_v25, 8.507059e+37  ;;  %v2022_v21 = vor.u32 1.1754944e-38, %v2021_v46  ;;  %v2004_v47 = vand.u32 2147483647, %v4884_v0 }
 0x8b4   : > { %v3824_v39 = vpop.eup %3823  ;;  %v2041_v7 = vmul.f32 %v3822_v24, %v1992_v17  ;;  %vm2046_vm13 = vweird.f32 %v3822_v24  ;;  %3833 = vpow2.f32 %v2159_v61  ;;  %v4909_v3 = vadd.f32 1.0, %v1985_v1 }
 0x8b5   : > { %v4860_v53 = vpop.eup %3825  ;;  %v2056_v43 = vmul.f32 %v3824_v39, %v1993_v63  ;;  %vm2061_vm11 = vweird.f32 %v3824_v39  ;;  %vm2047_vm14 = vmor %vm2045_vm9, %vm2046_vm13  ;;  %v2006_v42 = vand.u32 2147483648, %v4884_v0  ;;  %vm4927_vm13 = vcmp.eq.f32.partialorder %v2004_v47, 8.507059e+37 }
 0x8b6   : > { %v2042_v44 = vsub.f32 1.0, %v2041_v7  ;;  %v2071_v31 = vmul.f32 %v4860_v53, %v4844_v29  ;;  %v3828_v40 = vpop.eup %3827  ;;  %vm2062_vm6 = vmor %vm2060_vm10, %vm2061_vm11  ;;  %3835 = vrcp.f32 %v4909_v3  ;;  %vm2076_vm9 = vweird.f32 %v4860_v53 }
 0x8b7   : > { %v2057_v33 = vsub.f32 1.0, %v2056_v43  ;;  %v2011_v62 = vmul.f32 %v3828_v40, %v4851_v32  ;;  %vm2016_vm7 = vweird.f32 %v3828_v40  ;;  %v4903_v36 = vpop.eup %3829  ;;  %v2139_v32 = vsub.f32 0.0, %v4872_v35 }
 0x8b8   : > { %v2043_v11 = vmul.f32 %v3822_v24, %v2042_v44  ;;  %v2072_v34 = vsub.f32 1.0, %v2071_v31  ;;  %vm2017_vm8 = vmor %vm2015_vm3, %vm2016_vm7  ;;  %vm2075_vm10 = vweird.f32 %v4844_v29  ;;  %3837 = vpow2.f32 %v2153_v20 }
 0x8b9   : > { %v2058_v14 = vmul.f32 %v3824_v39, %v2057_v33  ;;  %v2012_v41 = vsub.f32 1.0, %v2011_v62  ;;  %v3832_v44 = vpop.eup %3831 }
 0x8ba   : > { %v2044_v26 = vadd.f32 %v3822_v24, %v2043_v11  ;;  %v2073_v2 = vmul.f32 %v4860_v53, %v2072_v34  ;;  %v1996_v50 = vmul.f32 %v3832_v44, %v4884_v0  ;;  %v2079_v34 = vand.u32 2147483647, %v4844_v29 }
 0x8bb   : > { %v2059_v51 = vadd.f32 %v3824_v39, %v2058_v14  ;;  %v2013_v23 = vmul.f32 %v3828_v40, %v2012_v41  ;;  %vm2001_vm11 = vweird.f32 %v3832_v44 }
 0x8bc   : > { %v2048_v52 = vsel %vm2047_vm14, %v3822_v24, %v2044_v26  ;;  %v2074_v55 = vadd.f32 %v4860_v53, %v2073_v2  ;;  %vm1969_vm14 = vcmp.ge.f32.partialorder %v4828_v57, 0.0 }
 0x8bd   : > { %v4892_v22 = vsel %vm4867_vm12, %v2052_v9, %v2048_v52  ;;  %v2063_v17 = vsel %vm2062_vm6, %v3824_v39, %v2059_v51  ;;  %v2014_v7 = vadd.f32 %v3828_v40, %v2013_v23  ;;  %v3834_v9 = vpop.eup %3833  ;;  %vm2000_vm12 = vweird.f32 %v4884_v0 }
 0x8be   : > { %v4897_v15 = vsel %vm4874_vm15, %v2067_v12, %v2063_v17  ;;  %v2088_v63 = vmul.f32 1.0614054, %v4892_v22  ;;  %vm4932_vm15 = vmor %vm2075_vm10, %vm2076_vm9  ;;  %v2081_v51 = vand.u32 2147483648, %v4844_v29  ;;  %v2007_v52 = vor.u32 1.1754944e-38, %v2006_v42  ;;  %v3836_v46 = vpop.eup %3835 }
 0x8bf   : > { %v2089_v28 = vmul.f32 1.0614054, %v4897_v15  ;;  %v2018_v30 = vsel %vm2017_vm8, %v3828_v40, %v2014_v7  ;;  %v1997_v40 = vsub.f32 1.0, %v1996_v50  ;;  %v2078_v25 = vsel %vm4932_vm15, %v4860_v53, %v2074_v55  ;;  %vm2002_vm3 = vmor %vm2000_vm12, %vm2001_vm11 }
 0x8c0   : > { %v2094_v24 = vadd.f32 -1.4531521, %v2088_v63  ;;  %v4921_v11 = vsel %vm4905_vm5, %v2022_v21, %v2018_v30  ;;  %v2082_v41 = vor.u32 1.1754944e-38, %v2081_v51  ;;  %v2026_v29 = vmul.f32 %v3836_v46, %v4909_v3 }
 0x8c1   : > { %v2095_v39 = vadd.f32 -1.4531521, %v2089_v28  ;;  %v2086_v14 = vmul.f32 1.0614054, %v4921_v11  ;;  %v1998_v17 = vmul.f32 %v3832_v44, %v1997_v40  ;;  %vm2080_vm6 = vcmp.eq.f32.partialorder %v2079_v34, 8.507059e+37 }
 0x8c2   : > { %v2100_v43 = vmul.f32 %v2094_v24, %v4892_v22  ;;  %v2034_v24 = vand.u32 2147483647, %v4909_v3  ;;  %v4947_v45 = vsel %vm2080_vm6, %v2082_v41, %v2078_v25  ;;  %v2027_v7 = vsub.f32 1.0, %v2026_v29 }
 0x8c3   : > { %v2101_v31 = vmul.f32 %v2095_v39, %v4897_v15  ;;  %v2092_v18 = vadd.f32 -1.4531521, %v2086_v14  ;;  %v1999_v23 = vadd.f32 %v3832_v44, %v1998_v17  ;;  %v2090_v21 = vmul.f32 1.0614054, %v4947_v45  ;;  %v3838_v17 = vpop.eup %3837 }
 0x8c4   : > { %v2106_v33 = vadd.f32 1.4214138, %v2100_v43  ;;  %vm2031_vm7 = vweird.f32 %v3836_v46  ;;  %v2036_v55 = vand.u32 2147483648, %v4909_v3  ;;  %v2145_v50 = vmul.f32 %v2139_v32, %v4872_v35 }
 0x8c5   : > { %v2107_v12 = vadd.f32 1.4214138, %v2101_v31  ;;  %v2098_v2 = vmul.f32 %v2092_v18, %v4921_v11  ;;  %v2003_v43 = vsel %vm2002_vm3, %v3832_v44, %v1999_v23  ;;  %vm2030_vm5 = vweird.f32 %v4909_v3 }
 0x8c6   : > { %v2112_v4 = vmul.f32 %v2106_v33, %v4892_v22  ;;  %v4957_v42 = vsel %vm4927_vm13, %v2007_v52, %v2003_v43  ;;  %v2028_v33 = vmul.f32 %v3836_v46, %v2027_v7  ;;  %vm2032_vm8 = vmor %vm2030_vm5, %vm2031_vm7  ;;  %vm2035_vm9 = vcmp.eq.f32.partialorder %v2034_v24, 8.507059e+37 }
 0x8c7   : > { %v2113_v62 = vmul.f32 %v2107_v12, %v4897_v15  ;;  %v2104_v39 = vadd.f32 1.4214138, %v2098_v2  ;;  %v2085_v0 = vmul.f32 1.0614054, %v4957_v42  ;;  %v2096_v12 = vadd.f32 -1.4531521, %v2090_v21 }
 0x8c8   : > { %v2118_v1 = vadd.f32 -0.28449672, %v2112_v4  ;;  %v2029_v4 = vadd.f32 %v3836_v46, %v2028_v33  ;;  %v2037_v61 = vor.u32 1.1754944e-38, %v2036_v55  ;;  %v2144_v32 = vsub.f32 0.0, %v4839_v56 }
 0x8c9   : > { %v2119_v63 = vadd.f32 -0.28449672, %v2113_v62  ;;  %v2110_v30 = vmul.f32 %v2104_v39, %v4921_v11  ;;  %v2091_v40 = vadd.f32 -1.4531521, %v2085_v0  ;;  %v2102_v26 = vmul.f32 %v2096_v12, %v4947_v45 }
 0x8ca   : > { %v2124_v28 = vmul.f32 %v2118_v1, %v4892_v22  ;;  %v2033_v35 = vsel %vm2032_vm8, %v3836_v46, %v2029_v4  ;;  %v2141_v1 = vsub.f32 0.0, %v4880_v38  ;;  %v2151_v41 = vmul.f32 1.442695, %v2145_v50 }
 0x8cb   : > { %v2125_v53 = vmul.f32 %v2119_v63, %v4897_v15  ;;  %v2116_v44 = vadd.f32 -0.28449672, %v2110_v30  ;;  %v2038_v62 = vsel %vm2035_vm9, %v2037_v61, %v2033_v35  ;;  %v2108_v18 = vadd.f32 1.4214138, %v2102_v26 }
 0x8cc   : > { %v2130_v47 = vadd.f32 0.2548296, %v2124_v28  ;;  %v2087_v25 = vmul.f32 1.0614054, %v2038_v62  ;;  %v2150_v23 = vmul.f32 %v2144_v32, %v4839_v56  ;;  %vm1966_vm10 = vcmp.ge.f32.partialorder %v4834_v19, 0.0 }
 0x8cd   : > { %v2131_v31 = vadd.f32 0.2548296, %v2125_v53  ;;  %v2122_v51 = vmul.f32 %v2116_v44, %v4921_v11  ;;  %v2114_v46 = vmul.f32 %v2108_v18, %v4947_v45  ;;  %v2147_v7 = vmul.f32 %v2141_v1, %v4880_v38 }
 0x8ce   : > { %v2136_v20 = vmul.f32 %v2130_v47, %v4892_v22  ;;  %v1975_v22 = vsel %vm1969_vm14, 1.0, %v3886_v13  ;;  %v2093_v28 = vadd.f32 -1.4531521, %v2087_v25  ;;  %vm1968_vm12 = vcmp.ge.f32.partialorder %v4825_v5, 0.0 }
 0x8cf   : > { %v2137_v14 = vmul.f32 %v2131_v31, %v4897_v15  ;;  %v2097_v15 = vmul.f32 %v2091_v40, %v4957_v42  ;;  %v2128_v52 = vadd.f32 0.2548296, %v2122_v51  ;;  %v2120_v53 = vadd.f32 -0.28449672, %v2114_v46 }
 0x8d0   : > { %v2166_v63 = vmul.f32 %v4903_v36, %v2136_v20  ;;  %v2099_v57 = vmul.f32 %v2093_v28, %v2038_v62  ;;  %3839 = vpow2.f32 %v2151_v41  ;;  %v2161_v55 = vmul.f32 1.442695, %v2150_v23 }
 0x8d1   : > { %v2167_v34 = vmul.f32 %v3834_v9, %v2137_v14  ;;  %v2103_v9 = vadd.f32 1.4214138, %v2097_v15  ;;  %v2134_v29 = vmul.f32 %v2128_v52, %v4921_v11  ;;  %v1972_v56 = vsel %vm1966_vm10, 1.0, %v3886_v13 }
 0x8d2   : > { %v2172_v36 = vsub.f32 1.0, %v2166_v63  ;;  %v2105_v11 = vadd.f32 1.4214138, %v2099_v57  ;;  %v2126_v30 = vmul.f32 %v2120_v53, %v4947_v45  ;;  %v1957_v19 = vmul.f32 0.5, %v4816_v49 }
 0x8d3   : > { %v2173_v3 = vsub.f32 1.0, %v2167_v34  ;;  %v2109_v24 = vmul.f32 %v2103_v9, %v4957_v42  ;;  %v2164_v39 = vmul.f32 %v3838_v17, %v2134_v29  ;;  %v2155_v38 = vmul.f32 1.442695, %v2147_v7 }
 0x8d4   : > { %v2111_v0 = vmul.f32 %v2105_v11, %v2038_v62  ;;  %v1974_v5 = vsel %vm1968_vm12, 1.0, %v3886_v13  ;;  %v1954_v50 = vmul.f32 0.5, %v4819_v54  ;;  %3841 = vpow2.f32 %v2161_v55 }
 0x8d5   : > { %v2179_v2 = vmul.f32 %v2173_v3, %v1975_v22  ;;  %v2115_v21 = vadd.f32 -0.28449672, %v2109_v24  ;;  %v2170_v43 = vsub.f32 1.0, %v2164_v39  ;;  %v2178_v14 = vmul.f32 %v2172_v36, %v1974_v5 }
 0x8d6   : > { %v2117_v40 = vadd.f32 -0.28449672, %v2111_v0  ;;  %v3840_v61 = vpop.eup %3839  ;;  %v2132_v20 = vadd.f32 0.2548296, %v2126_v30  ;;  %3843 = vpow2.f32 %v2155_v38  ;;  %vm1965_vm13 = vcmp.ge.f32.partialorder %v4857_v6, 0.0 }
 0x8d7   : > { %v2185_v47 = vadd.f32 1.0, %v2179_v2  ;;  %v2121_v31 = vmul.f32 %v2115_v21, %v4957_v42  ;;  %v2176_v33 = vmul.f32 %v2170_v43, %v1972_v56  ;;  %v2184_v35 = vadd.f32 1.0, %v2178_v14 }
 0x8d8   : > { %v2123_v51 = vmul.f32 %v2117_v40, %v2038_v62  ;;  %v2138_v18 = vmul.f32 %v2132_v20, %v4947_v45  ;;  %v1956_v3 = vmul.f32 0.5, %v4813_v37  ;;  %v1971_v52 = vsel %vm1965_vm13, 1.0, %v3886_v13 }
 0x8d9   : > { %v2127_v12 = vadd.f32 0.2548296, %v2121_v31  ;;  %v2191_v44 = vmul.f32 %v2185_v47, %v1957_v19  ;;  %v2182_v4 = vadd.f32 1.0, %v2176_v33  ;;  %v1953_v6 = vmul.f32 0.5, %v4849_v60 }
 0x8da   : > { %v2129_v15 = vadd.f32 0.2548296, %v2123_v51  ;;  %v3842_v25 = vpop.eup %3841  ;;  %v2190_v22 = vmul.f32 %v2184_v35, %v1956_v3  ;;  %vm1967_vm15 = vcmp.ge.f32.partialorder %v4865_v16, 0.0  ;;  %vm1970_vm11 = vcmp.ge.f32.partialorder %v4831_v10, 0.0 }
 0x8db   : > { %v2133_v26 = vmul.f32 %v2127_v12, %v4957_v42  ;;  %v2188_v34 = vmul.f32 %v2182_v4, %v1954_v50  ;;  %v2168_v46 = vmul.f32 %v3842_v25, %v2138_v18  ;;  %v1973_v60 = vsel %vm1967_vm15, 1.0, %v3886_v13 }
 0x8dc   : > { %v2135_v42 = vmul.f32 %v2129_v15, %v2038_v62  ;;  %v3844_v17 = vpop.eup %3843  ;;  %v3627_v2 = vpack.i.bf16 %v2191_v44, %v2190_v22  ;;  %v1976_v62 = vsel %vm1970_vm11, 1.0, %v3886_v13  ;;  %v1955_v10 = vmul.f32 0.5, %v4854_v27 }
 0x8dd   : > { %v2163_v49 = vmul.f32 %v3840_v61, %v2133_v26  ;;  %v3607_v32 = vpack.i.bf16 %v2191_v44, %v2188_v34  ;;  %v2174_v28 = vsub.f32 1.0, %v2168_v46  ;;  %v1958_v39 = vmul.f32 0.5, %v4822_v8 }
 0x8de   : > { %v2165_v41 = vmul.f32 %v3844_v17, %v2135_v42  ;;  %vm5565_vm14 = vcmask 400384   ;;  %vm5567_vm3 = vcmask 244736   ;;  %vm5571_vm9 = vcmask 646144  }
 0x8df   : > { %v2169_v54 = vsub.f32 1.0, %v2163_v49  ;;  %3608 = vrot.lane.b32.xlu0 %v3607_v32, %s5560_s23  ;;  %v2180_v24 = vmul.f32 %v2174_v28, %v1976_v62  ;;  %vm5566_vm6 = vmmov %vm5565_vm14  ;;  %vm5573_vm12 = vcmask 900096  }
 0x8e0   : > { %v2171_v29 = vsub.f32 1.0, %v2165_v41  ;;  %vm5568_vm7 = vmmov %vm5567_vm3 }
 0x8e1   : > { %v2175_v1 = vmul.f32 %v2169_v54, %v1971_v52  ;;  %v2186_v16 = vadd.f32 1.0, %v2180_v24  ;;  %vm5569_vm5 = vmmov %vm5566_vm6 }
 0x8e2   : > { %v2177_v23 = vmul.f32 %v2171_v29, %v1973_v60  ;;  %vm5570_vm8 = vmmov %vm5569_vm5 }
 0x8e3   : > { %v2181_v9 = vadd.f32 1.0, %v2175_v1  ;;  %v2192_v7 = vmul.f32 %v2186_v16, %v1958_v39  ;;  %vm5572_vm10 = vmmov %vm5571_vm9 }
 0x8e4   : > { %v2183_v53 = vadd.f32 1.0, %v2177_v23  ;;  %vm5574_vm13 = vmmov %vm5573_vm12 }
 0x8e5   : > { %v2187_v63 = vmul.f32 %v2181_v9, %v1953_v6  ;;  %vm5575_vm15 = vmmov %vm5573_vm12 }
 0x8e6   : > { %v2189_v57 = vmul.f32 %v2183_v53, %v1955_v10  ;;  %vm5576_vm11 = vmmov %vm5573_vm12 }
 0x8e7   : > { %v3632_v37 = vpack.i.bf16 %v2188_v34, %v2187_v63  ;;  %v3602_v45 = vpack.i.bf16 %v2190_v22, %v2187_v63  ;;  %3628 = vrot.lane.b32.xlu0 %v3627_v2, %s5561_s25 }
 0x8e8   : > { %v3662_v21 = vpack.i.bf16 %v2192_v7, %v2189_v57 }
 0x8e9   : > { %3633 = vrot.lane.b32.xlu2 %v3632_v37, %s5562_s26  ;;  %3603 = vrot.lane.b32.xlu1 %v3602_v45, %s5560_s23 }
 0x8ef   : > { %3643 = vrot.lane.b32.xlu0 %v3632_v37, %s5563_s16 }
 0x8f1   : > { %3648 = vrot.lane.b32.xlu2 %v3627_v2, %s5563_s16  ;;  %3613 = vrot.lane.b32.xlu1 %v3632_v37, %s5564_s20 }
 0x8f7   : > { %3658 = vrot.lane.b32.xlu0 %v3627_v2, %s5499_s21 }
 0x8f9   : > { %3663 = vrot.lane.b32.xlu2 %v3662_v21, %s5563_s16  ;;  %3618 = vrot.lane.b32.xlu1 %v3627_v2, %s5564_s20 }
 0x901   : > { %3623 = vrot.lane.b32.xlu1 %v3632_v37, %s5561_s25 }
 0x909   : > { %3638 = vrot.lane.b32.xlu1 %v3627_v2, %s5562_s26 }
 0x911   : > { %3653 = vrot.lane.b32.xlu1 %v3632_v37, %s5499_s21 }
 0x943   : > { %v5012_v36 = vpop.permute.xlu2 %3633 }
 0x94b   : > { %v5016_v8 = vpop.permute.xlu2 %3648 }
 0x94c   : > { %v3651_v26 = vunpack.i.h.bf16 %v5016_v8 }
 0x951   : > { %v5014_v27 = vpop.permute.xlu0 %3608 }
 0x952   : > { %v3611_v47 = vunpack.i.h.bf16 %v5014_v27  ;;  %v3610_v43 = vunpack.i.l.bf16 %v5014_v27 }
 0x953   : > { %v3664_v0 = vpop.permute.xlu2 %3663 }
 0x954   : > { %v3666_v4 = vunpack.i.h.bf16 %v3664_v0  ;;  %v3665_v20 = vunpack.i.l.bf16 %v3664_v0 }
 0x956   : > { %v5063_v49 = vsel %vm5565_vm14, %v3651_v26, %v3666_v4  ;;  %vm5577_vm14 = vmmov %vm5576_vm11 }
 0x959   : > { %v5020_v11 = vpop.permute.xlu0 %3628 }
 0x95a   : > { %v3631_v56 = vunpack.i.h.bf16 %v5020_v11  ;;  %v3630_v31 = vunpack.i.l.bf16 %v5020_v11 }
 0x95b   : > { %v3604_v55 = vpop.permute.xlu1 %3603 }
 0x95c   : > { %v3606_v30 = vunpack.i.h.bf16 %v3604_v55  ;;  %v3605_v19 = vunpack.i.l.bf16 %v3604_v55  ;;  %v5027_v33 = vsel %vm686_vm2, %v3630_v31, %v3631_v56 }
 0x95e   : > { %v5030_v38 = vsel %vm520_vm0, %v3606_v30, %v2192_v7  ;;  %v5035_v5 = vsel %vm520_vm0, %v3611_v47, %v3606_v30  ;;  %v5038_v50 = vsel %vm520_vm0, %v3605_v19, %v2189_v57  ;;  %v5043_v12 = vsel %vm520_vm0, %v3610_v43, %v3605_v19 }
 0x95f   : > { %v3682_v14 = vpack.i.bf16 %v5043_v12, %v5038_v50  ;;  %v3667_v44 = vpack.i.bf16 %v5030_v38, %v5038_v50  ;;  %v2409_v40 = vpack.c.bf16 %v5035_v5, %v5043_v12  ;;  %v3635_v30 = vunpack.i.l.bf16 %v5012_v36 }
 0x961   : > { %3683 = vrot.lane.b32.xlu0 %v3682_v14, %s5501_s30  ;;  %3673 = vrot.lane.b32.xlu1 %v3682_v14, %s5500_s22  ;;  %v5054_v61 = vpop.permute.xlu0 %3643 }
 0x962   : > { %3668 = vrot.lane.b32.xlu2 %v3667_v44, %s5560_s23  ;;  %v3646_v51 = vunpack.i.h.bf16 %v5054_v61  ;;  %v3645_v4 = vunpack.i.l.bf16 %v5054_v61 }
 0x963   : > { %v5057_v34 = vpop.permute.xlu1 %3613 }
 0x964   : > { %v5068_v35 = vsel %vm5566_vm6, %v3646_v51, %v3665_v20  ;;  %v3615_v54 = vunpack.i.l.bf16 %v5057_v34  ;;  %v3616_v42 = vunpack.i.h.bf16 %v5057_v34  ;;  %v3650_v20 = vunpack.i.l.bf16 %v5016_v8  ;;  %vm5578_vm6 = vmmov %vm5576_vm11 }
 0x965   : > { %v2422_v32 = vpack.c.bf16 %v5063_v49, %v5068_v35 }
 0x966   : > { %v2375_v41 = vsel %vm709_vm1, %v3615_v54, %v3616_v42 }
 0x969   : > { %3688 = vrot.lane.b32.xlu0 %v3667_v44, %s5561_s25  ;;  %3678 = vrot.lane.b32.xlu1 %v3667_v44, %s5564_s20  ;;  %v5102_v37 = vpop.permute.xlu0 %3658 }
 0x96a   : > { %3693 = vrot.lane.b32.xlu2 %v3682_v14, %s5503_s28  ;;  %v3661_v45 = vunpack.i.h.bf16 %v5102_v37  ;;  %v3660_v29 = vunpack.i.l.bf16 %v5102_v37 }
 0x96b   : > { %v5075_v15 = vpop.permute.xlu1 %3618 }
 0x96c   : > { %v3620_v18 = vunpack.i.l.bf16 %v5075_v15  ;;  %v3621_v52 = vunpack.i.h.bf16 %v5075_v15  ;;  %v5113_v23 = vsel %vm5567_vm3, %v3660_v29, %v3661_v45  ;;  %vm5579_vm3 = vcmask 1031168  }
 0x96e   : > { %v2429_v3 = vpack.c.bf16 %v3620_v18, %v3615_v54  ;;  %v2377_v22 = vsel %vm709_vm1, %v3620_v18, %v3621_v52  ;;  %v2420_v54 = vpack.c.bf16 %v3650_v20, %v3645_v4  ;;  %v2408_v18 = vpack.c.bf16 %v5030_v38, %v5038_v50 }
 0x96f   : > { %v2430_v63 = vpack.c.bf16 %v2377_v22, %v2375_v41 }
 0x971   : > { %2510 = vrot.lane.b32.xlu0 %v2429_v3, %s5502_s17  ;;  %3703 = vrot.lane.b32.xlu1 %v3667_v44, %s5499_s21 }
 0x972   : > { %3698 = vrot.lane.b32.xlu2 %v3667_v44, %s5562_s26 }
 0x973   : > { %v5084_v25 = vpop.permute.xlu1 %3623 }
 0x974   : > { %v3626_v1 = vunpack.i.h.bf16 %v5084_v25  ;;  %v3625_v17 = vunpack.i.l.bf16 %v5084_v25 }
 0x976   : > { %v2426_v6 = vpack.c.bf16 %v3630_v31, %v3625_v17  ;;  %v2353_v9 = vsel %vm686_vm2, %v3625_v17, %v3626_v1 }
 0x977   : > { %v2427_v46 = vpack.c.bf16 %v5027_v33, %v2353_v9 }
 0x979   : > { %2504 = vrot.lane.b32.xlu0 %v2426_v6, %s5502_s17  ;;  %v2309_v6 = vsel %vm5569_vm5, %v3645_v4, %v3646_v51  ;;  %vm5581_vm5 = vmmov %vm5579_vm3 }
 0x97a   : > { %2512 = vrot.lane.b32.xlu2 %v2430_v63, %s5502_s17 }
 0x97b   : > { %v5100_v2 = vpop.permute.xlu1 %3638 }
 0x97c   : > { %v3641_v27 = vunpack.i.h.bf16 %v5100_v2 }
 0x983   : > { %v5106_v28 = vpop.permute.xlu1 %3653 }
 0x984   : > { %v3656_v60 = vunpack.i.h.bf16 %v5106_v28  ;;  %v3655_v62 = vunpack.i.l.bf16 %v5106_v28  ;;  %v2711_v28 = vld [vmem:[%s5459_s10] sm:$0xff] }
 0x986   : > { %v5118_v24 = vsel %vm5568_vm7, %v3655_v62, %v3656_v60  ;;  %vm5580_vm7 = vmmov %vm5579_vm3 }
 0x987   : > { %v2433_v53 = vpack.c.bf16 %v5113_v23, %v5118_v24 }
 0x9bc   : > { %v3669_v16 = vpop.permute.xlu2 %3668 }
 0x9bd   : > { %v3671_v10 = vunpack.i.h.bf16 %v3669_v16  ;;  %v3670_v39 = vunpack.i.l.bf16 %v3669_v16  ;;  %3708 = vrot.lane.b32.xlu1 %v3669_v16, %s5500_s22 }
 0x9bf   : > { %v5125_v57 = vsel %vm520_vm0, %v3671_v10, %v3611_v47  ;;  %v5130_v7 = vsel %vm520_vm0, %v3670_v39, %v3610_v43  ;;  %v3640_v47 = vunpack.i.l.bf16 %v5100_v2  ;;  %v3636_v43 = vunpack.i.h.bf16 %v5012_v36 }
 0x9c0   : > { %v3717_v21 = vpack.i.bf16 %v5125_v57, %v5035_v5  ;;  %v3712_v55 = vpack.i.bf16 %v5030_v38, %v5130_v7  ;;  %v2410_v31 = vpack.c.bf16 %v5125_v57, %v5130_v7 }
 0x9c1   : > { %v2333_v19 = vsel %vm663_vm4, %v3640_v47, %v3641_v27  ;;  %v2331_v33 = vsel %vm663_vm4, %v3635_v30, %v3636_v43  ;;  %v2423_v36 = vpack.c.bf16 %v3640_v47, %v3635_v30 }
 0x9c2   : > { %3718 = vrot.lane.b32.xlu2 %v3717_v21, %s5500_s22  ;;  %3713 = vrot.lane.b32.xlu0 %v3712_v55, %s5500_s22  ;;  %v2424_v14 = vpack.c.bf16 %v2333_v19, %v2331_v33 }
 0x9c4   : > { %v5150_v0 = vpop.permute.xlu2 %3693 }
 0x9c5   : > { %3728 = vrot.lane.b32.xlu1 %v3717_v21, %s5501_s30 }
 0x9ca   : > { %3723 = vrot.lane.b32.xlu2 %v3712_v55, %s5501_s30  ;;  %3738 = vrot.lane.b32.xlu0 %v3717_v21, %s5503_s28 }
 0x9cc   : > { %v3699_v3 = vpop.permute.xlu2 %3698 }
 0x9cd   : > { %3733 = vrot.lane.b32.xlu1 %v3712_v55, %s5503_s28  ;;  %v3700_v16 = vunpack.i.l.bf16 %v3699_v3 }
 0x9d2   : > { %2506 = vrot.lane.b32.xlu2 %v2427_v46, %s5502_s17  ;;  %2500 = vrot.lane.b32.xlu0 %v2424_v14, %s5502_s17  ;;  %v2311_v46 = vsel %vm5570_vm8, %v3650_v20, %v3651_v26  ;;  %v2432_v26 = vpack.c.bf16 %v3660_v29, %v3655_v62  ;;  %v2332_v62 = vsel %vm663_vm4, %v3636_v43, %v3700_v16  ;;  %vm5582_vm8 = vmmov %vm5579_vm3 }
 0x9d3   : > { %v5155_v44 = vpop.permute.xlu0 %3683  ;;  %v3674_v17 = vpop.permute.xlu1 %3673  ;;  %v2421_v63 = vpack.c.bf16 %v2311_v46, %v2309_v6 }
 0x9d4   : > { %v5181_v8 = vpop.permute.xlu2 %2512  ;;  %v3676_v55 = vunpack.i.h.bf16 %v3674_v17  ;;  %v3675_v47 = vunpack.i.l.bf16 %v3674_v17  ;;  %v3686_v46 = vunpack.i.h.bf16 %v5155_v44 }
 0x9d5   : > { %2498 = vrot.lane.b32.xlu1 %v2423_v36, %s5502_s17 }
 0x9d6   : > { %v2279_v36 = vsel %vm5573_vm12, %v3675_v47, %v3676_v55 }
 0x9da   : > { %2492 = vrot.lane.b32.xlu2 %v2420_v54, %s5502_s17  ;;  %2468 = vrot.lane.b32.xlu0 %v2408_v18, %s5502_s17 }
 0x9db   : > { %v3689_v22 = vpop.permute.xlu0 %3688 }
 0x9dc   : > { %v3691_v9 = vunpack.i.h.bf16 %v3689_v22  ;;  %v3690_v41 = vunpack.i.l.bf16 %v3689_v22 }
 0x9dd   : > { %2494 = vrot.lane.b32.xlu1 %v2421_v63, %s5502_s17 }
 0x9de   : > { %v2356_v38 = vsel %vm686_vm2, %v3631_v56, %v3691_v9  ;;  %v2354_v50 = vsel %vm686_vm2, %v3626_v1, %v3690_v41  ;;  %v3679_v56 = vpop.permute.xlu1 %3678 }
 0x9df   : > { %v2428_v2 = vpack.c.bf16 %v2356_v38, %v2354_v50  ;;  %v3681_v51 = vunpack.i.h.bf16 %v3679_v56  ;;  %v3680_v25 = vunpack.i.l.bf16 %v3679_v56  ;;  %v3685_v38 = vunpack.i.l.bf16 %v5155_v44 }
 0x9e1   : > { %v2378_v1 = vsel %vm709_vm1, %v3621_v52, %v3681_v51  ;;  %v2376_v5 = vsel %vm709_vm1, %v3616_v42, %v3680_v25  ;;  %v2251_v56 = vsel %vm5579_vm3, %v3685_v38, %v3686_v46 }
 0x9e2   : > { %2470 = vrot.lane.b32.xlu2 %v2409_v40, %s5502_s17  ;;  %v2431_v12 = vpack.c.bf16 %v2378_v1, %v2376_v5  ;;  %v3701_v40 = vunpack.i.h.bf16 %v3699_v3 }
 0x9e3   : > { %v2511_v61 = vpop.permute.xlu0 %2510 }
 0x9e4   : > { %v2536_v11 = vsel %vm5571_vm9, %v2511_v61, %v5181_v8  ;;  %v2334_v29 = vsel %vm663_vm4, %v3641_v27, %v3701_v40  ;;  %v3695_v40 = vunpack.i.l.bf16 %v5150_v0  ;;  %vm5583_vm9 = vcmask 1039360  }
 0x9e5   : > { %2570 = vmatpush.bf16.msrb.mxu3 %v2536_v11  ;;  %2516 = vrot.lane.b32.xlu1 %v2432_v26, %s5502_s17  ;;  %v2425_v10 = vpack.c.bf16 %v2334_v29, %v2332_v62  ;;  %vm5585_vm12 = vmmov %vm5583_vm9 }
 0x9e6   : > { %v5199_v34 = vpop.permute.xlu1 %3703 }
 0x9eb   : > { %v2505_v42 = vpop.permute.xlu0 %2504 }
 0x9ed   : > { %2514 = vrot.lane.b32.xlu1 %v2431_v12, %s5502_s17  ;;  %v3696_v12 = vunpack.i.h.bf16 %v5150_v0 }
 0x9f5   : > { %2508 = vrot.lane.b32.xlu1 %v2428_v2, %s5502_s17 }
 0x9fd   : > { %2502 = vrot.lane.b32.xlu1 %v2425_v10, %s5502_s17 }
 0xa1c   : > { %v3719_v15 = vpop.permute.xlu2 %3718 }
 0xa1d   : > { %v3721_v27 = vunpack.i.h.bf16 %v3719_v15  ;;  %v3720_v30 = vunpack.i.l.bf16 %v3719_v15 }
 0xa1f   : > { %v2283_v18 = vsel %vm5575_vm15, %v3720_v30, %v3721_v27  ;;  %vm5587_vm15 = vcmask 646144  }
 0xa24   : > { %v5197_v52 = vpop.permute.xlu2 %3723 }
 0xa25   : > { %v3725_v50 = vunpack.i.l.bf16 %v5197_v52  ;;  %v3726_v2 = vunpack.i.h.bf16 %v5197_v52  ;;  %v2229_v52 = vsel %vm5583_vm9, %v3695_v40, %v3696_v12 }
 0xa27   : > { %v2252_v26 = vsel %vm5580_vm7, %v3686_v46, %v3725_v50 }
 0xa2c   : > { %v5201_v39 = vpop.permute.xlu2 %2506 }
 0xa2d   : > { %v2534_v21 = vsel %vm5572_vm10, %v2505_v42, %v5201_v39  ;;  %vm5584_vm10 = vmmov %vm5583_vm9 }
 0xa2e   : > { %2571 = vmatpush.bf16.msrb.mxu3 %v2534_v21 }
 0xa2f   : > { %v3709_v43 = vpop.permute.xlu1 %3708 }
 0xa30   : > { %v3711_v19 = vunpack.i.h.bf16 %v3709_v43  ;;  %v3710_v33 = vunpack.i.l.bf16 %v3709_v43 }
 0xa32   : > { %v2284_v54 = vsel %vm5574_vm13, %v3721_v27, %v3711_v19  ;;  %vm5586_vm13 = vmmov %vm5583_vm9 }
 0xa34   : > { %v3714_v14 = vpop.permute.xlu0 %3713 }
 0xa35   : > { %v3716_v4 = vunpack.i.h.bf16 %v3714_v14  ;;  %v3715_v20 = vunpack.i.l.bf16 %v3714_v14  ;;  %v3706_v14 = vunpack.i.h.bf16 %v5199_v34 }
 0xa37   : > { %v2282_v3 = vsel %vm5576_vm11, %v3716_v4, %v3720_v30  ;;  %v2280_v22 = vsel %vm5577_vm14, %v3676_v55, %v3715_v20  ;;  %v2281_v17 = vsel %vm5578_vm6, %v3715_v20, %v3710_v33  ;;  %v3729_v63 = vpop.permute.xlu1 %3728  ;;  %vm5588_vm11 = vmmov %vm5587_vm15  ;;  %v3705_v4 = vunpack.i.l.bf16 %v5199_v34  ;;  %v2702_v34 = vld [vmem:[%s5458_s9] sm:$0xff] }
 0xa38   : > { %v2417_v6 = vpack.c.bf16 %v2282_v3, %v2279_v36  ;;  %v2418_v9 = vpack.c.bf16 %v2283_v18, %v2280_v22  ;;  %v2419_v41 = vpack.c.bf16 %v2284_v54, %v2281_v17  ;;  %v3731_v61 = vunpack.i.h.bf16 %v3729_v63  ;;  %vm5591_vm3 = vmmov %vm5588_vm11 }
 0xa39   : > { %v3730_v11 = vunpack.i.l.bf16 %v3729_v63  ;;  %vm5589_vm14 = vcmask 244736   ;;  %vm5592_vm7 = vmmov %vm5591_vm3 }
 0xa3a   : > { %2488 = vrot.lane.b32.xlu2 %v2418_v9, %s5502_s17  ;;  %2490 = vrot.lane.b32.xlu1 %v2419_v41, %s5502_s17  ;;  %v2416_v33 = vpack.c.bf16 %v3731_v61, %v3725_v50  ;;  %v2400_v35 = vsel %vm5589_vm14, %v3661_v45, %v3706_v14  ;;  %vm5590_vm6 = vmmov %vm5589_vm14  ;;  %v2407_v50 = vld [vmem:[%s5457_s8] sm:$0xff]  ;;  %vm5601_vm14 = vcmask 130048  }
 0xa3b   : > { %2486 = vrot.lane.b32.xlu0 %v2417_v6, %s5502_s17  ;;  %v2253_v51 = vsel %vm5581_vm5, %v3726_v2, %v3730_v11  ;;  %v2254_v44 = vsel %vm5582_vm8, %v3730_v11, %v3731_v61  ;;  %vm5593_vm5 = vmmov %vm5591_vm3  ;;  %v2436_v61 = vunpack.c.l.b16 %v2407_v50 }
 0xa3c   : > { %v2414_v25 = vpack.c.bf16 %v2253_v51, %v2251_v56  ;;  %v2415_v1 = vpack.c.bf16 %v2254_v44, %v2252_v26  ;;  %v3739_v5 = vpop.permute.xlu0 %3738  ;;  %vm5594_vm8 = vmmov %vm5591_vm3  ;;  %v2437_v56 = vunpack.c.h.b16 %v2407_v50 }
 0xa3d   : > { %v3741_v16 = vunpack.i.h.bf16 %v3739_v5  ;;  %v3740_v29 = vunpack.i.l.bf16 %v3739_v5  ;;  %vm5595_vm9 = vmmov %vm5591_vm3  ;;  %v2438_v26 = vpack.c.b16 %v2436_v61, %v2436_v61 }
 0xa3f   : > { %v3734_v62 = vpop.permute.xlu1 %3733  ;;  %v2232_v42 = vsel %vm5584_vm10, %v3740_v29, %v3741_v16  ;;  %vm5596_vm10 = vmmov %vm5591_vm3 }
 0xa40   : > { %v3736_v10 = vunpack.i.h.bf16 %v3734_v62  ;;  %v3735_v15 = vunpack.i.l.bf16 %v3734_v62 }
 0xa42   : > { %2482 = vrot.lane.b32.xlu2 %v2415_v1, %s5502_s17  ;;  %2472 = vrot.lane.b32.xlu1 %v2410_v31, %s5502_s17  ;;  %v2231_v0 = vsel %vm5585_vm12, %v3736_v10, %v3740_v29  ;;  %v2230_v21 = vsel %vm5586_vm13, %v3696_v12, %v3735_v15  ;;  %v2493_v31 = vpop.permute.xlu2 %2492  ;;  %v2413_v19 = vpack.c.bf16 %v3741_v16, %v3735_v15  ;;  %vm5597_vm12 = vmmov %vm5591_vm3 }
 0xa43   : > { %2480 = vrot.lane.b32.xlu0 %v2414_v25, %s5502_s17  ;;  %v2411_v55 = vpack.c.bf16 %v2231_v0, %v2229_v52  ;;  %v2412_v47 = vpack.c.bf16 %v2232_v42, %v2230_v21  ;;  %vm5598_vm13 = vmmov %vm5591_vm3  ;;  %v2439_v25 = vpack.c.b16 %v2437_v56, %v2437_v56 }
 0xa44   : > { %v2501_v27 = vpop.permute.xlu0 %2500 }
 0xa47   : > { %v2499_v57 = vpop.permute.xlu1 %2498 }
 0xa48   : > { %v2532_v7 = vsel %vm5587_vm15, %v2499_v57, %v2501_v27  ;;  %vm5599_vm15 = vmmov %vm5591_vm3 }
 0xa49   : > { %2572 = vmatpush.bf16.msrb.mxu3 %v2532_v7 }
 0xa4a   : > { %2476 = vrot.lane.b32.xlu2 %v2412_v47, %s5502_s17 }
 0xa4b   : > { %2474 = vrot.lane.b32.xlu0 %v2411_v55, %s5502_s17 }
 0xa4c   : > { %v2469_v3 = vpop.permute.xlu0 %2468 }
 0xa4f   : > { %v2495_v30 = vpop.permute.xlu1 %2494 }
 0xa50   : > { %v2530_v43 = vsel %vm5588_vm11, %v2493_v31, %v2495_v30  ;;  %vm5600_vm11 = vmmov %vm5591_vm3 }
 0xa51   : > { %2573 = vmatpush.bf16.msrb.mxu3 %v2530_v43 }
 0xa52   : > { %2496 = vrot.lane.b32.xlu2 %v2422_v32, %s5502_s17  ;;  %v2398_v32 = vsel %vm5590_vm6, %v3656_v60, %v3705_v4  ;;  %vm5602_vm6 = vmmov %vm5591_vm3 }
 0xa53   : > { %2518 = vrot.lane.b32.xlu0 %v2433_v53, %s5502_s17  ;;  %v2434_v23 = vpack.c.bf16 %v2400_v35, %v2398_v32 }
 0xa57   : > { %v2517_v49 = vpop.permute.xlu1 %2516 }
 0xa5a   : > { %2478 = vrot.lane.b32.xlu2 %v2413_v19, %s5502_s17 }
 0xa5b   : > { %2484 = vrot.lane.b32.xlu0 %v2416_v33, %s5502_s17 }
 0xa5f   : > { %v2515_v24 = vpop.permute.xlu1 %2514 }
 0xa60   : > { %v2537_v53 = vsel %vm5591_vm3, %v5181_v8, %v2515_v24  ;;  %v2471_v8 = vpop.permute.xlu2 %2470 }
 0xa61   : > { %2596 = vmatpush.bf16.msrb.mxu1 %v2537_v53  ;;  %v2522_v11 = vsel %vm5599_vm15, %v2469_v3, %v2471_v8 }
 0xa63   : > { %2520 = vrot.lane.b32.xlu0 %v2434_v23, %s5502_s17 }
 0xa67   : > { %v2509_v37 = vpop.permute.xlu1 %2508 }
 0xa68   : > { %v2535_v45 = vsel %vm5592_vm7, %v5201_v39, %v2509_v37  ;;  %vm5603_vm7 = vmmov %vm5591_vm3 }
 0xa69   : > { %2597 = vmatpush.bf16.msrb.mxu1 %v2535_v45 }
 0xa6b   : > { %2705 = vperm.xlu0 %3460, %v2702_v34  }
 0xa6f   : > { %v2503_v60 = vpop.permute.xlu1 %2502 }
 0xa70   : > { %v2533_v20 = vsel %vm5593_vm5, %v2501_v27, %v2503_v60  ;;  %vm5604_vm5 = vmmov %vm5591_vm3 }
 0xa71   : > { %2598 = vmatpush.bf16.msrb.mxu1 %v2533_v20 }
 0xa73   : > { %2714 = vperm.xlu0 %3460, %v2711_v28  }
 0xa94   : > { %v2489_v36 = vpop.permute.xlu2 %2488 }
 0xa9c   : > { %v2483_v54 = vpop.permute.xlu2 %2482 }
 0xaa4   : > { %v2477_v18 = vpop.permute.xlu2 %2476 }
 0xaac   : > { %v2497_v22 = vpop.permute.xlu2 %2496  ;;  %v2491_v39 = vpop.permute.xlu1 %2490 }
 0xaad   : > { %v2487_v17 = vpop.permute.xlu0 %2486  ;;  %v2531_v6 = vsel %vm5594_vm8, %v2495_v30, %v2497_v22  ;;  %v2529_v41 = vsel %vm5596_vm10, %v2489_v36, %v2491_v39  ;;  %vm5605_vm8 = vmmov %vm5601_vm14  ;;  %vm5607_vm10 = vcmask 556032  }
 0xaae   : > { %v2528_v9 = vsel %vm5595_vm9, %v2487_v17, %v2489_v36  ;;  %2599 = vmatpush.bf16.msrb.mxu1 %v2531_v6  ;;  %vm5606_vm9 = vmmov %vm5605_vm8 }
 0xaaf   : > { %2574 = vmatpush.bf16.msrb.mxu3 %v2528_v9 }
 0xab2   : > { %2600 = vmatpush.bf16.msrb.mxu1 %v2529_v41 }
 0xab4   : > { %v2479_v12 = vpop.permute.xlu2 %2478  ;;  %v2473_v16 = vpop.permute.xlu1 %2472 }
 0xab5   : > { %v2481_v46 = vpop.permute.xlu0 %2480  ;;  %v2525_v40 = vsel %vm5591_vm3, %v2477_v18, %v2479_v12  ;;  %v2523_v10 = vsel %vm5604_vm5, %v2471_v8, %v2473_v16 }
 0xab6   : > { %v2526_v38 = vsel %vm5597_vm12, %v2481_v46, %v2483_v54  ;;  %vm5608_vm12 = vmmov %vm5607_vm10 }
 0xab7   : > { %2575 = vmatpush.bf16.msrb.mxu3 %v2526_v38 }
 0xabd   : > { %v2475_v63 = vpop.permute.xlu0 %2474 }
 0xabe   : > { %v2524_v2 = vsel %vm5598_vm13, %v2475_v63, %v2477_v18 }
 0xabf   : > { %2576 = vmatpush.bf16.msrb.mxu3 %v2524_v2 }
 0xac3   : > { %2577 = vmatpush.bf16.msrb.mxu3 %v2522_v11 }
 0xac5   : > { %v2519_v51 = vpop.permute.xlu0 %2518 }
 0xac6   : > { %v2538_v44 = vsel %vm5600_vm11, %v2517_v49, %v2519_v51  ;;  %2578 = vmatmul.bf16.vlgmr.msrb.gmra.mxu3 %v2438_v26 }
 0xac7   : > { %2590 = vmatpush.bf16.msrb.mxu2 %v2538_v44 }
 0xaca   : > { %3270 = vmatmul.msk.bf16.vlgmr.msrb.gmra.mxu2 %vm5601_vm14, %v2439_v25 }
 0xacb   : > { %2622 = vmatpush.bf16.msra.mxu2 %v2515_v24 }
 0xacd   : > { %v2485_v1 = vpop.permute.xlu0 %2484 }
 0xace   : > { %v2527_v5 = vsel %vm5602_vm6, %v2483_v54, %v2485_v1 }
 0xacf   : > { %2623 = vmatpush.bf16.msra.mxu2 %v2509_v37  ;;  %2601 = vmatpush.bf16.msrb.mxu1 %v2527_v5 }
 0xad3   : > { %2624 = vmatpush.bf16.msra.mxu2 %v2503_v60  ;;  %2602 = vmatpush.bf16.msrb.mxu1 %v2525_v40 }
 0xad5   : > { %v2521_v29 = vpop.permute.xlu0 %2520 }
 0xad6   : > { %v2539_v62 = vsel %vm5603_vm7, %v2519_v51, %v2521_v29  ;;  %2642 = vmatpush.bf16.msra.mxu3 %v2521_v29 }
 0xad7   : > { %2625 = vmatpush.bf16.msra.mxu2 %v2497_v22  ;;  %2603 = vmatpush.bf16.msrb.mxu1 %v2523_v10 }
 0xad8   : > { %2616 = vmatpush.bf16.msrb.mxu0 %v2539_v62 }
 0xad9   : > { %3272 = vmatmul.msk.bf16.vlgmr.msra.gmra.mxu3 %vm5605_vm8, %v2439_v25 }
 0xada   : > { %2604 = vmatmul.bf16.vlgmr.msrb.gmra.mxu1 %v2438_v26 }
 0xadb   : > { %2626 = vmatpush.bf16.msra.mxu2 %v2491_v39  ;;  %3271 = vmatmul.msk.bf16.vlgmr.msrb.gmra.mxu0 %vm5606_vm9, %v2439_v25 }
 0xadd   : > { %v2706_v40 = vpop.permute.xlu0 %2705 }
 0xadf   : > { %2627 = vmatpush.bf16.msra.mxu2 %v2485_v1 }
 0xae3   : > { %2628 = vmatpush.bf16.msra.mxu2 %v2479_v12 }
 0xae7   : > { %2629 = vmatpush.bf16.msra.mxu2 %v2473_v16 }
 0xaea   : > { %2630 = vmatmul.bf16.vlgmr.msra.gmra.mxu2 %v2438_v26 }
 0xb49   : > { %v2579_v15 = vpop.f32.mrf.mxu3 }
 0xb4d   : > { %v2592_v52 = vpop.f32.mrf.mxu2 }
 0xb4e   : > { %v2593_v31 = vadd.f32 %v2592_v52, %v2579_v15 }
 0xb50   : > { %v2648_v43 = vmul.f32 %v2593_v31, %v4271_v58 }
 0xb51   : > { %v2581_v42 = vpop.f32.mrf.mxu3 }
 0xb55   : > { %v2594_v0 = vpop.f32.mrf.mxu2 }
 0xb57   : > { %v2605_v21 = vpop.f32.mrf.mxu1 }
 0xb58   : > { %v2618_v55 = vpop.f32.mrf.mxu0 }
 0xb59   : > { %v2619_v30 = vadd.f32 %v2618_v55, %v2605_v21 }
 0xb5b   : > { %v2649_v19 = vmul.f32 %v2619_v30, %v4273_v59 }
 0xb5c   : > { %v2644_v47 = vpop.f32.mrf.mxu3 }
 0xb5d   : > { %v2651_v49 = vadd.f32 %v2649_v19, %v2648_v43 }
 0xb5f   : > { %v2607_v27 = vpop.f32.mrf.mxu1 }
 0xb60   : > { %v2620_v57 = vpop.f32.mrf.mxu0 }
 0xb64   : > { %v2646_v7 = vpop.f32.mrf.mxu3 }
 0xb6d   : > { %v2631_v33 = vpop.f32.mrf.mxu2 }
 0xb6e   : > { %v2645_v14 = vadd.f32 %v2644_v47, %v2631_v33  ;;  %v2715_v47 = vpop.permute.xlu0 %2714 }
 0xb70   : > { %v2650_v4 = vmul.f32 %v2645_v14, %v4269_v48 }
 0xb72   : > { %v2652_v35 = vsel %vm5607_vm10, %v2650_v4, 0.0 }
 0xb73   : > { %v2653_v32 = vadd.f32 %v2652_v35, %v2651_v49 }
 0xb75   : > { %v2633_v23 = vpop.f32.mrf.mxu2  ;;  %2654 = vadd.xlane.f32.xlu2 %v2653_v32 }
 0xbe8   : > { %v2655_v24 = vpop.xlane.xlu2 %2654 }
 0xbe9   : > { %v2656_v53 = vrot.slane %v2655_v24, 4 }
 0xbeb   : > { %v2657_v34 = vadd.f32 %v2656_v53, %v2655_v24 }
 0xbed   : > { %v2658_v37 = vrot.slane %v2657_v34, 2 }
 0xbef   : > { %v2659_v45 = vadd.f32 %v2658_v37, %v2657_v34 }
 0xbf1   : > { %v2660_v28 = vrot.slane %v2659_v45, 1 }
 0xbf3   : > { %v2661_v60 = vadd.f32 %v2660_v28, %v2659_v45 }
 0xbf5   : > { %3292 = vpush %v2661_v60 }
 0xc26   : > { %s3293_s27 = spop %3292 }
 0xc27   : > { %v2663_v20 = vstv %s3293_s27  ;;  %s3283_s27 = smul.u32 24, %s5636_s19 }
 0xc28   : > { %v2664_v8 = vmul.f32 0.00048828125, %v2663_v20 }
 0xc2a   : > { %v2665_v36 = vsub.f32 %v2648_v43, %v2664_v8  ;;  %v2666_v54 = vsub.f32 %v2649_v19, %v2664_v8  ;;  %v2667_v18 = vsub.f32 %v2650_v4, %v2664_v8 }
 0xc2c   : > { %v2668_v3 = vmul.f32 %v2665_v36, %v2665_v36  ;;  %v2669_v22 = vmul.f32 %v2666_v54, %v2666_v54  ;;  %v2670_v17 = vmul.f32 %v2667_v18, %v2667_v18 }
 0xc2e   : > { %v2671_v6 = vmul.f32 %v2668_v3, %v4271_v58  ;;  %v2672_v39 = vmul.f32 %v2669_v22, %v4273_v59  ;;  %v2673_v9 = vmul.f32 %v2670_v17, %v4269_v48 }
 0xc30   : > { %v2674_v41 = vadd.f32 %v2672_v39, %v2671_v6  ;;  %v2675_v46 = vsel %vm5608_vm12, %v2673_v9, 0.0 }
 0xc32   : > { %v2676_v38 = vadd.f32 %v2675_v46, %v2674_v41 }
 0xc34   : > { %2677 = vadd.xlane.f32.xlu1 %v2676_v38 }
 0xca7   : > { %v2678_v50 = vpop.xlane.xlu1 %2677 }
 0xca8   : > { %v2679_v63 = vrot.slane %v2678_v50, 4 }
 0xcaa   : > { %v2680_v2 = vadd.f32 %v2679_v63, %v2678_v50 }
 0xcac   : > { %v2681_v61 = vrot.slane %v2680_v2, 2 }
 0xcae   : > { %v2682_v11 = vadd.f32 %v2681_v61, %v2680_v2 }
 0xcb0   : > { %v2683_v56 = vrot.slane %v2682_v11, 1 }
 0xcb2   : > { %v2684_v26 = vadd.f32 %v2683_v56, %v2682_v11 }
 0xcb4   : > { %3294 = vpush %v2684_v26 }
 0xce5   : > { %s3295_s29 = spop %3294 }
 0xce6   : > { %v2686_v51 = vstv %s3295_s29 }
 0xce7   : > { %v2687_v44 = vmul.f32 0.00048828125, %v2686_v51 }
 0xce9   : > { %v2688_v25 = vadd.f32 1e-05, %v2687_v44 }
 0xceb   : > { %3845 = vrsqrt.f32 %v2688_v25  ;;  %vm2695_vm15 = vweird.f32 %v2688_v25 }
 0xcf1   : > { %v3846_v1 = vpop.eup %3845 }
 0xcf2   : > { %v2690_v5 = vmul.f32 %v3846_v1, %v2688_v25  ;;  %vm2696_vm13 = vweird.f32 %v3846_v1 }
 0xcf3   : > { %vm2697_vm11 = vmor %vm2695_vm15, %vm2696_vm13 }
 0xcf4   : > { %v2691_v12 = vmul.f32 %v3846_v1, %v2690_v5 }
 0xcf6   : > { %v2692_v16 = vmul.f32 0.5, %v2691_v12 }
 0xcf8   : > { %v2693_v29 = vsub.f32 1.5, %v2692_v16 }
 0xcfa   : > { %v2694_v62 = vmul.f32 %v3846_v1, %v2693_v29 }
 0xcfc   : > { %v2698_v10 = vsel %vm2697_vm11, %v3846_v1, %v2694_v62 }
 0xcfd   : > { %v2699_v15 = vmul.f32 %v2698_v10, %v2665_v36  ;;  %v2700_v52 = vmul.f32 %v2698_v10, %v2666_v54  ;;  %v2701_v42 = vmul.f32 %v2698_v10, %v2667_v18 }
 0xcff   : > { %v2708_v0 = vmul.f32 %v2706_v40, %v2699_v15  ;;  %v2709_v21 = vmul.f32 %v2706_v40, %v2700_v52  ;;  %v2710_v55 = vmul.f32 %v2706_v40, %v2701_v42 }
 0xd01   : > { %v2717_v27 = vadd.f32 %v2715_v47, %v2708_v0  ;;  %v2718_v57 = vadd.f32 %v2715_v47, %v2709_v21  ;;  %v2719_v7 = vadd.f32 %v2715_v47, %v2710_v55 }
 0xd03   : > { %v5294_v31 = vmul.f32 %v2717_v27, %v4271_v58  ;;  %v5297_v30 = vmul.f32 %v2718_v57, %v4273_v59  ;;  %v5300_v43 = vmul.f32 %v2719_v7, %v4269_v48 }
 0xd05   : > { %v5303_v19 = vmul.f32 0.70710677, %v5294_v31  ;;  %v5306_v33 = vmul.f32 0.70710677, %v5297_v30  ;;  %v5309_v14 = vmul.f32 0.70710677, %v5300_v43 }
 0xd07   : > { %v2735_v4 = vand.u32 2147483647, %v5303_v19  ;;  %v2736_v49 = vand.u32 2147483647, %v5306_v33  ;;  %v5314_v35 = vand.u32 2147483647, %v5309_v14 }
 0xd09   : > { %v2738_v32 = vmul.f32 0.3275911, %v2735_v4  ;;  %v2739_v23 = vmul.f32 0.3275911, %v2736_v49  ;;  %v2740_v24 = vmul.f32 0.3275911, %v5314_v35 }
 0xd0a   : > { %v2816_v9 = vsub.f32 0.0, %v2735_v4  ;;  %v2817_v5 = vsub.f32 0.0, %v2736_v49  ;;  %v2818_v55 = vsub.f32 0.0, %v5314_v35 }
 0xd0b   : > { %v2741_v53 = vadd.f32 1.0, %v2738_v32  ;;  %v2742_v34 = vadd.f32 1.0, %v2739_v23  ;;  %v2743_v37 = vadd.f32 1.0, %v2740_v24 }
 0xd0c   : > { %v2819_v15 = vmul.f32 %v2816_v9, %v2735_v4  ;;  %v2820_v42 = vmul.f32 %v2817_v5, %v2736_v49 }
 0xd0d   : > { %3847 = vrcp.f32 %v2741_v53  ;;  %v2768_v36 = vand.u32 2147483647, %v2742_v34  ;;  %v2770_v18 = vand.u32 2147483648, %v2742_v34  ;;  %v2755_v3 = vand.u32 2147483648, %v2741_v53 }
 0xd0e   : > { %3849 = vrcp.f32 %v2742_v34  ;;  %v2753_v6 = vand.u32 2147483647, %v2741_v53  ;;  %vm2764_vm3 = vweird.f32 %v2742_v34  ;;  %vm2749_vm5 = vweird.f32 %v2741_v53 }
 0xd0f   : > { %3851 = vrcp.f32 %v2743_v37  ;;  %vm5317_vm7 = vcmp.eq.f32.partialorder %v2768_v36, 8.507059e+37  ;;  %v2771_v63 = vor.u32 1.1754944e-38, %v2770_v18  ;;  %v2756_v2 = vor.u32 1.1754944e-38, %v2755_v3 }
 0xd10   : > { %vm2754_vm10 = vcmp.eq.f32.partialorder %v2753_v6, 8.507059e+37  ;;  %v2783_v56 = vand.u32 2147483647, %v2743_v37  ;;  %v2785_v26 = vand.u32 2147483648, %v2743_v37  ;;  %vm2779_vm13 = vweird.f32 %v2743_v37 }
 0xd11   : > { %v2822_v32 = vmul.f32 1.442695, %v2819_v15  ;;  %v2824_v24 = vmul.f32 1.442695, %v2820_v42 }
 0xd12   : > { %v2786_v62 = vor.u32 1.1754944e-38, %v2785_v26  ;;  %vm2784_vm11 = vcmp.eq.f32.partialorder %v2783_v56, 8.507059e+37 }
 0xd13   : > { %v3848_v45 = vpop.eup %3847  ;;  %3853 = vpow2.f32 %v2822_v32 }
 0xd14   : > { %v3850_v28 = vpop.eup %3849  ;;  %v2745_v60 = vmul.f32 %v3848_v45, %v2741_v53  ;;  %vm2750_vm14 = vweird.f32 %v3848_v45  ;;  %3855 = vpow2.f32 %v2824_v24 }
 0xd15   : > { %v2760_v20 = vmul.f32 %v3850_v28, %v2742_v34  ;;  %v3852_v22 = vpop.eup %3851  ;;  %vm2765_vm6 = vweird.f32 %v3850_v28  ;;  %vm2751_vm8 = vmor %vm2749_vm5, %vm2750_vm14  ;;  %v2821_v34 = vmul.f32 %v2818_v55, %v5314_v35  ;;  %vm2729_vm14 = vcmp.ge.f32.partialorder %v5303_v19, 0.0 }
 0xd16   : > { %v2746_v8 = vsub.f32 1.0, %v2745_v60  ;;  %v2775_v41 = vmul.f32 %v3852_v22, %v2743_v37  ;;  %vm2766_vm9 = vmor %vm2764_vm3, %vm2765_vm6  ;;  %vm2780_vm12 = vweird.f32 %v3852_v22  ;;  %vm2730_vm6 = vcmp.ge.f32.partialorder %v5306_v33, 0.0 }
 0xd17   : > { %v2761_v54 = vsub.f32 1.0, %v2760_v20  ;;  %vm2781_vm15 = vmor %vm2779_vm13, %vm2780_vm12  ;;  %v2826_v20 = vmul.f32 1.442695, %v2821_v34  ;;  %vm2731_vm3 = vcmp.ge.f32.partialorder %v5309_v14, 0.0  ;;  %v2723_v19 = vmul.f32 0.5, %v5294_v31 }
 0xd18   : > { %v2747_v17 = vmul.f32 %v3848_v45, %v2746_v8  ;;  %v2776_v61 = vsub.f32 1.0, %v2775_v41  ;;  %v2734_v5 = vsel %vm2731_vm3, 1.0, %v3886_v13  ;;  %vm5613_vm5 = vcmask 400384  }
 0xd19   : > { %v2762_v39 = vmul.f32 %v3850_v28, %v2761_v54  ;;  %3857 = vpow2.f32 %v2826_v20  ;;  %vm3037_vm12 = vcmask 1043456   ;;  %vm5620_vm13 = vcmask 646144  }
 0xd1a   : > { %v2748_v38 = vadd.f32 %v3848_v45, %v2747_v17  ;;  %v2777_v25 = vmul.f32 %v3852_v22, %v2776_v61  ;;  %v3854_v17 = vpop.eup %3853 }
 0xd1b   : > { %v2763_v50 = vadd.f32 %v3850_v28, %v2762_v39  ;;  %v3856_v35 = vpop.eup %3855 }
 0xd1c   : > { %v2752_v11 = vsel %vm2751_vm8, %v3848_v45, %v2748_v38  ;;  %v2778_v16 = vadd.f32 %v3852_v22, %v2777_v25  ;;  %vm5614_vm8 = vmmov %vm5613_vm5 }
 0xd1d   : > { %v2767_v51 = vsel %vm2766_vm9, %v3850_v28, %v2763_v50  ;;  %v2757_v44 = vsel %vm2754_vm10, %v2756_v2, %v2752_v11  ;;  %v2733_v11 = vsel %vm2730_vm6, 1.0, %v3886_v13  ;;  %vm5617_vm9 = vcmask 1031168   ;;  %vm5624_vm6 = vmmov %vm5620_vm13 }
 0xd1e   : > { %v2772_v1 = vsel %vm5317_vm7, %v2771_v63, %v2767_v51  ;;  %v2789_v12 = vmul.f32 1.0614054, %v2757_v44  ;;  %v2782_v52 = vsel %vm2781_vm15, %v3852_v22, %v2778_v16  ;;  %v2732_v63 = vsel %vm2729_vm14, 1.0, %v3886_v13  ;;  %vm5623_vm14 = vmmov %vm5620_vm13 }
 0xd1f   : > { %v2790_v40 = vmul.f32 1.0614054, %v2772_v1  ;;  %v2787_v21 = vsel %vm2784_vm11, %v2786_v62, %v2782_v52  ;;  %v3858_v61 = vpop.eup %3857  ;;  %v2725_v16 = vmul.f32 0.5, %v5300_v43  ;;  %vm5619_vm10 = vcmask 1039360   ;;  %vm5625_vm3 = vmmov %vm5624_vm6 }
 0xd20   : > { %v2792_v29 = vadd.f32 -1.4531521, %v2789_v12  ;;  %v2791_v27 = vmul.f32 1.0614054, %v2787_v21  ;;  %vm5622_vm11 = vmmov %vm5619_vm10 }
 0xd21   : > { %v2793_v10 = vadd.f32 -1.4531521, %v2790_v40  ;;  %v2724_v40 = vmul.f32 0.5, %v5297_v30 }
 0xd22   : > { %v2795_v0 = vmul.f32 %v2792_v29, %v2757_v44  ;;  %v2794_v23 = vadd.f32 -1.4531521, %v2791_v27 }
 0xd23   : > { %v2796_v47 = vmul.f32 %v2793_v10, %v2772_v1 }
 0xd24   : > { %v2798_v57 = vadd.f32 1.4214138, %v2795_v0  ;;  %v2797_v45 = vmul.f32 %v2794_v23, %v2787_v21 }
 0xd25   : > { %v2799_v7 = vadd.f32 1.4214138, %v2796_v47 }
 0xd26   : > { %v2801_v53 = vmul.f32 %v2798_v57, %v2757_v44  ;;  %v2800_v49 = vadd.f32 1.4214138, %v2797_v45 }
 0xd27   : > { %v2802_v37 = vmul.f32 %v2799_v7, %v2772_v1 }
 0xd28   : > { %v2804_v4 = vadd.f32 -0.28449672, %v2801_v53  ;;  %v2803_v36 = vmul.f32 %v2800_v49, %v2787_v21 }
 0xd29   : > { %v2805_v28 = vadd.f32 -0.28449672, %v2802_v37 }
 0xd2a   : > { %v2807_v60 = vmul.f32 %v2804_v4, %v2757_v44  ;;  %v2806_v3 = vadd.f32 -0.28449672, %v2803_v36 }
 0xd2b   : > { %v2808_v8 = vmul.f32 %v2805_v28, %v2772_v1 }
 0xd2c   : > { %v2810_v54 = vadd.f32 0.2548296, %v2807_v60  ;;  %v2809_v39 = vmul.f32 %v2806_v3, %v2787_v21 }
 0xd2d   : > { %v2811_v18 = vadd.f32 0.2548296, %v2808_v8 }
 0xd2e   : > { %v2813_v22 = vmul.f32 %v2810_v54, %v2757_v44  ;;  %v2812_v46 = vadd.f32 0.2548296, %v2809_v39 }
 0xd2f   : > { %v2814_v6 = vmul.f32 %v2811_v18, %v2772_v1 }
 0xd30   : > { %v2828_v9 = vmul.f32 %v3854_v17, %v2813_v22  ;;  %v2815_v2 = vmul.f32 %v2812_v46, %v2787_v21 }
 0xd31   : > { %v2829_v41 = vmul.f32 %v3856_v35, %v2814_v6 }
 0xd32   : > { %v2831_v38 = vsub.f32 1.0, %v2828_v9  ;;  %v2830_v51 = vmul.f32 %v3858_v61, %v2815_v2 }
 0xd33   : > { %v2832_v50 = vsub.f32 1.0, %v2829_v41 }
 0xd34   : > { %v2834_v56 = vmul.f32 %v2831_v38, %v2732_v63  ;;  %v2833_v25 = vsub.f32 1.0, %v2830_v51 }
 0xd35   : > { %v2835_v26 = vmul.f32 %v2832_v50, %v2733_v11 }
 0xd36   : > { %v2837_v44 = vadd.f32 1.0, %v2834_v56  ;;  %v2836_v12 = vmul.f32 %v2833_v25, %v2734_v5 }
 0xd37   : > { %v2838_v33 = vadd.f32 1.0, %v2835_v26 }
 0xd38   : > { %v2840_v1 = vmul.f32 %v2837_v44, %v2723_v19  ;;  %v2839_v29 = vadd.f32 1.0, %v2836_v12 }
 0xd39   : > { %v2841_v14 = vmul.f32 %v2838_v33, %v2724_v40 }
 0xd3a   : > { %2939 = vrot.lane.b32.xlu2 %v2840_v1, %s5499_s21  ;;  %2843 = vrot.lane.b32.xlu0 %v2840_v1, %s5560_s23  ;;  %v2842_v62 = vmul.f32 %v2839_v29, %v2725_v16 }
 0xd3c   : > { %v3742_v10 = vpack.i.bf16 %v2842_v62, %v2841_v14 }
 0xd42   : > { %2917 = vrot.lane.b32.xlu2 %v2840_v1, %s5561_s25  ;;  %3743 = vrot.lane.b32.xlu0 %v3742_v10, %s5563_s16 }
 0xd4a   : > { %2895 = vrot.lane.b32.xlu2 %v2840_v1, %s5563_s16 }
 0xd94   : > { %v2940_v32 = vpop.permute.xlu2 %2939 }
 0xd95   : > { %v2963_v34 = vpack.c.bf16 %v2940_v32, %v2940_v32 }
 0xd9c   : > { %v2918_v49 = vpop.permute.xlu2 %2917 }
 0xda4   : > { %v2896_v9 = vpop.permute.xlu2 %2895 }
 0xdac   : > { %v2844_v13 = vpop.permute.xlu0 %2843 }
 0xdad   : > { %v5340_v31 = vsel %vm520_vm0, %v2844_v13, %v2842_v62 }
 0xdae   : > { %v3757_v30 = vpack.i.bf16 %v5340_v31, %v2841_v14 }
 0xdb0   : > { %3758 = vrot.lane.b32.xlu1 %v3757_v30, %s5561_s25  ;;  %3748 = vrot.lane.b32.xlu0 %v3757_v30, %s5560_s23  ;;  %s3246_s25 = sshll.u32 %s5636_s19, 3 }
 0xdb4   : > { %v3744_v43 = vpop.permute.xlu0 %3743 }
 0xdb5   : > { %v3746_v3 = vunpack.i.h.bf16 %v3744_v43  ;;  %v3745_v22 = vunpack.i.l.bf16 %v3744_v43 }
 0xdb7   : > { %v2902_v41 = vsel %vm5613_vm5, %v3745_v22, %v3746_v3  ;;  %v2901_v19 = vsel %vm5614_vm8, %v2896_v9, %v3745_v22 }
 0xdb8   : > { %2928 = vrot.lane.b32.xlu0 %v2840_v1, %s5564_s20 }
 0xdc0   : > { %2906 = vrot.lane.b32.xlu0 %v2840_v1, %s5562_s26 }
 0xdc8   : > { %3753 = vrot.lane.b32.xlu0 %v3757_v30, %s5499_s21 }
 0xdd0   : > { %3763 = vrot.lane.b32.xlu0 %v3757_v30, %s5564_s20  ;;  %s506_s20 = scalar_lea.vmem %s5463_s14, %s3246_s25 }
 0xdd8   : > { %3768 = vrot.lane.b32.xlu0 %v3757_v30, %s5562_s26 }
 0xe22   : > { %v3749_v15 = vpop.permute.xlu0 %3748  ;;  %v3759_v37 = vpop.permute.xlu1 %3758 }
 0xe23   : > { %v3751_v52 = vunpack.i.h.bf16 %v3749_v15  ;;  %v3750_v42 = vunpack.i.l.bf16 %v3749_v15  ;;  %v3760_v4 = vunpack.i.l.bf16 %v3759_v37  ;;  %v3761_v61 = vunpack.i.h.bf16 %v3759_v37 }
 0xe25   : > { %v5351_v0 = vsel %vm520_vm0, %v3751_v52, %v3750_v42  ;;  %v5354_v21 = vsel %vm520_vm0, %v3750_v42, %v2844_v13  ;;  %vm5611_vm0 = vcmask 244736   ;;  %v2923_v20 = vsel %vm686_vm2, %v2918_v49, %v3760_v4 }
 0xe26   : > { %v3777_v55 = vpack.i.bf16 %v3751_v52, %v5351_v0  ;;  %2868 = vrot.lane.b32.xlu2 %v5354_v21, %s5501_s30  ;;  %v3772_v47 = vpack.i.bf16 %v5354_v21, %v5340_v31  ;;  %v3782_v57 = vpack.i.bf16 %v5340_v31, %v5351_v0  ;;  %vm5612_vm7 = vmmov %vm5611_vm0  ;;  %v2924_v56 = vsel %vm686_vm2, %v3760_v4, %v3761_v61 }
 0xe28   : > { %3778 = vrot.lane.b32.xlu1 %v3777_v55, %s5500_s22  ;;  %3773 = vrot.lane.b32.xlu0 %v3772_v47, %s5500_s22  ;;  %s511_s22 = scalar_lea.vmem %s5464_s15, %s3283_s27 }
 0xe2a   : > { %v2929_v27 = vpop.permute.xlu0 %2928 }
 0xe2b   : > { %v2960_v36 = vpack.c.bf16 %v2929_v27, %v2918_v49 }
 0xe2e   : > { %2857 = vrot.lane.b32.xlu2 %v5354_v21, %s5503_s28 }
 0xe30   : > { %3783 = vrot.lane.b32.xlu1 %v3782_v57, %s5501_s30 }
 0xe32   : > { %v2907_v7 = vpop.permute.xlu0 %2906 }
 0xe33   : > { %v2957_v38 = vpack.c.bf16 %v2907_v7, %v2896_v9 }
 0xe38   : > { %3788 = vrot.lane.b32.xlu1 %v3782_v57, %s5503_s28 }
 0xe3a   : > { %v3754_v23 = vpop.permute.xlu0 %3753 }
 0xe3b   : > { %v3755_v24 = vunpack.i.l.bf16 %v3754_v23  ;;  %v3756_v18 = vunpack.i.h.bf16 %v3754_v23 }
 0xe3d   : > { %v2945_v53 = vsel %vm5611_vm0, %v2940_v32, %v3755_v24  ;;  %v2946_v6 = vsel %vm5612_vm7, %v3755_v24, %v3756_v18  ;;  %vm5626_vm0 = vmmov %vm5625_vm3 }
 0xe3e   : > { %v2964_v45 = vpack.c.bf16 %v2945_v53, %v2945_v53  ;;  %v2965_v50 = vpack.c.bf16 %v2946_v6, %v2946_v6  ;;  %vm5627_vm7 = vmmov %vm5626_vm0 }
 0xe3f   : > { %vm5628_vm5 = vmmov %vm5626_vm0 }
 0xe40   : > { %3005 = vrot.lane.b32.xlu1 %v2963_v34, %s5502_s17  ;;  %3007 = vrot.lane.b32.xlu2 %v2964_v45, %s5502_s17  ;;  %vm5629_vm8 = vmmov %vm5626_vm0 }
 0xe42   : > { %v3764_v28 = vpop.permute.xlu0 %3763 }
 0xe43   : > { %v3765_v60 = vunpack.i.l.bf16 %v3764_v28  ;;  %v3766_v2 = vunpack.i.h.bf16 %v3764_v28 }
 0xe45   : > { %v2934_v8 = vsel %vm709_vm1, %v2929_v27, %v3765_v60  ;;  %v2935_v11 = vsel %vm709_vm1, %v3765_v60, %v3766_v2  ;;  %vm5615_vm1 = vcmask 900096   ;;  %v2950_v2 = vld [vmem:[%s5460_s11] sm:$0xf] }
 0xe46   : > { %v2961_v54 = vpack.c.bf16 %v2934_v8, %v2923_v20  ;;  %v2962_v26 = vpack.c.bf16 %v2935_v11, %v2924_v56  ;;  %vm5616_vm2 = vmmov %vm5615_vm1 }
 0xe47   : > { %vm5621_vm15 = vmmov %vm5615_vm1 }
 0xe48   : > { %3001 = vrot.lane.b32.xlu0 %v2961_v54, %s5502_s17  ;;  %2999 = vrot.lane.b32.xlu2 %v2960_v36, %s5502_s17 }
 0xe4a   : > { %v3769_v17 = vpop.permute.xlu0 %3768 }
 0xe4b   : > { %v3771_v39 = vunpack.i.h.bf16 %v3769_v17  ;;  %v3770_v35 = vunpack.i.l.bf16 %v3769_v17 }
 0xe4d   : > { %v2913_v46 = vsel %vm663_vm4, %v3770_v35, %v3771_v39  ;;  %v2912_v51 = vsel %vm663_vm4, %v2907_v7, %v3770_v35  ;;  %vm5618_vm4 = vmmov %vm5617_vm9 }
 0xe4e   : > { %v2959_v63 = vpack.c.bf16 %v2913_v46, %v2902_v41  ;;  %v2958_v44 = vpack.c.bf16 %v2912_v51, %v2901_v19 }
 0xe50   : > { %3009 = vrot.lane.b32.xlu0 %v2965_v50, %s5502_s17  ;;  %2993 = vrot.lane.b32.xlu2 %v2957_v38, %s5502_s17 }
 0xe51   : > { %2997 = vrot.lane.b32.xlu1 %v2959_v63, %s5502_s17 }
 0xe58   : > { %3003 = vrot.lane.b32.xlu0 %v2962_v26, %s5502_s17 }
 0xe60   : > { %2995 = vrot.lane.b32.xlu0 %v2958_v44, %s5502_s17 }
 0xe80   : > { %v2869_v33 = vpop.permute.xlu2 %2868 }
 0xe88   : > { %v2858_v52 = vpop.permute.xlu2 %2857 }
 0xe9a   : > { %v3779_v25 = vpop.permute.xlu1 %3778  ;;  %v3774_v1 = vpop.permute.xlu0 %3773 }
 0xe9b   : > { %v3780_v5 = vunpack.i.l.bf16 %v3779_v25  ;;  %v3776_v12 = vunpack.i.h.bf16 %v3774_v1  ;;  %v3775_v40 = vunpack.i.l.bf16 %v3774_v1  ;;  %v3781_v7 = vunpack.i.h.bf16 %v3779_v25  ;;  %v3008_v32 = vpop.permute.xlu2 %3007 }
 0xe9d   : > { %v2887_v62 = vsel %vm5615_vm1, %v3776_v12, %v3780_v5  ;;  %v2886_v10 = vsel %vm5616_vm2, %v3775_v40, %v3776_v12  ;;  %v2888_v53 = vsel %vm5621_vm15, %v3780_v5, %v3781_v7  ;;  %vm5630_vm1 = vmmov %vm5626_vm0  ;;  %vm3033_vm2 = vcmask 588800  }
 0xea2   : > { %v3784_v16 = vpop.permute.xlu1 %3783 }
 0xea3   : > { %v3786_v29 = vunpack.i.h.bf16 %v3784_v16  ;;  %v3785_v14 = vunpack.i.l.bf16 %v3784_v16 }
 0xea5   : > { %v2872_v13 = vsel %vm5617_vm9, %v3786_v29, %v2869_v33  ;;  %v2873_v30 = vsel %vm5618_vm4, %v2869_v33, %v3785_v14  ;;  %v2956_v37 = vpack.c.bf16 %v2888_v53, %v3785_v14  ;;  %vm5631_vm9 = vmmov %vm5626_vm0  ;;  %vm5632_vm4 = vcmask 556032  }
 0xea6   : > { %v2954_v43 = vpack.c.bf16 %v2886_v10, %v2872_v13  ;;  %v2955_v15 = vpack.c.bf16 %v2887_v62, %v2873_v30 }
 0xea8   : > { %2987 = vrot.lane.b32.xlu2 %v2954_v43, %s5502_s17  ;;  %2989 = vrot.lane.b32.xlu0 %v2955_v15, %s5502_s17  ;;  %v3140_v15 = vld [vmem:[%s5461_s12] sm:$0xff] }
 0xeaa   : > { %v3789_v42 = vpop.permute.xlu1 %3788 }
 0xeab   : > { %v3790_v55 = vunpack.i.l.bf16 %v3789_v42  ;;  %v3791_v45 = vunpack.i.h.bf16 %v3789_v42  ;;  %v3161_v42 = vld [vmem:[%s506_s20] sm:$0xff] }
 0xead   : > { %v2862_v47 = vsel %vm5619_vm10, %v2858_v52, %v3790_v55  ;;  %v2953_v27 = vpack.c.bf16 %v3790_v55, %v5351_v0  ;;  %v3000_v0 = vpop.permute.xlu2 %2999  ;;  %vm5633_vm10 = vmmov %vm5632_vm4 }
 0xeae   : > { %v2952_v57 = vpack.c.bf16 %v2862_v47, %v5354_v21  ;;  %v2861_v21 = vsel %vm5622_vm11, %v3791_v45, %v2858_v52  ;;  %v3149_v52 = vld [vmem:[%s5462_s13] sm:$0xff]  ;;  %vm5634_vm11 = vmmov %vm5632_vm4 }
 0xeaf   : > { %2985 = vrot.lane.b32.xlu1 %v2953_v27, %s5502_s17  ;;  %v2951_v49 = vpack.c.bf16 %v2861_v21, %v5340_v31 }
 0xeb0   : > { %2983 = vrot.lane.b32.xlu2 %v2952_v57, %s5502_s17 }
 0xeb2   : > { %v3006_v23 = vpop.permute.xlu1 %3005 }
 0xeb3   : > { %v3019_v24 = vsel %vm5620_vm13, %v3006_v23, %v3008_v32 }
 0xeb4   : > { %v3039_v34 = vsel %vm3037_vm12, %v3019_v24, 0 }
 0xeb5   : > { %3050 = vmatpush.bf16.msra.mxu0 %v3039_v34  ;;  %v2994_v22 = vpop.permute.xlu2 %2993 }
 0xeb7   : > { %2991 = vrot.lane.b32.xlu1 %v2956_v37, %s5502_s17 }
 0xeb8   : > { %3143 = vperm.xlu2 %3792, %v3140_v15  }
 0xeba   : > { %v3002_v4 = vpop.permute.xlu0 %3001 }
 0xebb   : > { %v3017_v28 = vsel %vm5623_vm14, %v3000_v0, %v3002_v4 }
 0xebc   : > { %3051 = vmatpush.bf16.msra.mxu0 %v3017_v28 }
 0xebf   : > { %2981 = vrot.lane.b32.xlu1 %v2951_v49, %s5502_s17 }
 0xec0   : > { %3152 = vperm.xlu2 %3792, %v3149_v52  }
 0xec2   : > { %v3010_v60 = vpop.permute.xlu0 %3009 }
 0xec3   : > { %v3020_v20 = vsel %vm5624_vm6, %v3008_v32, %v3010_v60  ;;  %v3045_v8 = vsel %vm3037_vm12, %v3010_v60, 0  ;;  %v2998_v3 = vpop.permute.xlu1 %2997 }
 0xec4   : > { %v3042_v36 = vsel %vm3037_vm12, %v3020_v20, 0  ;;  %3076 = vmatpush.bf16.msrb.mxu3 %v3045_v8 }
 0xec5   : > { %3063 = vmatpush.bf16.msra.mxu1 %v3042_v36 }
 0xec8   : > { %3164 = vperm.xlu2 %3792, %v3161_v42  }
 0xeca   : > { %v3004_v54 = vpop.permute.xlu0 %3003 }
 0xecb   : > { %3077 = vmatpush.bf16.msrb.mxu3 %v3004_v54  ;;  %v3018_v18 = vsel %vm5625_vm3, %v3002_v4, %v3004_v54 }
 0xecc   : > { %3064 = vmatpush.bf16.msra.mxu1 %v3018_v18 }
 0xecf   : > { %3078 = vmatpush.bf16.msrb.mxu3 %v2998_v3 }
 0xed2   : > { %v2996_v31 = vpop.permute.xlu0 %2995 }
 0xed3   : > { %v3015_v17 = vsel %vm5626_vm0, %v2994_v22, %v2996_v31  ;;  %v3016_v6 = vsel %vm5627_vm7, %v2996_v31, %v2998_v3 }
 0xed4   : > { %3052 = vmatpush.bf16.msra.mxu0 %v3015_v17  ;;  %3065 = vmatpush.bf16.msra.mxu1 %v3016_v6 }
 0xf02   : > { %v2988_v39 = vpop.permute.xlu2 %2987 }
 0xf0a   : > { %v2984_v50 = vpop.permute.xlu2 %2983 }
 0xf12   : > { %v3144_v22 = vpop.permute.xlu2 %3143 }
 0xf1a   : > { %v2990_v35 = vpop.permute.xlu0 %2989 }
 0xf1b   : > { %v3013_v9 = vsel %vm5628_vm5, %v2988_v39, %v2990_v35 }
 0xf1c   : > { %3053 = vmatpush.bf16.msra.mxu0 %v3013_v9 }
 0xf21   : > { %v2986_v41 = vpop.permute.xlu1 %2985 }
 0xf22   : > { %v3012_v63 = vsel %vm5630_vm1, %v2984_v50, %v2986_v41 }
 0xf29   : > { %v2992_v46 = vpop.permute.xlu1 %2991 }
 0xf2a   : > { %3079 = vmatpush.bf16.msrb.mxu3 %v2992_v46  ;;  %v3014_v38 = vsel %vm5629_vm8, %v2990_v35, %v2992_v46 }
 0xf2b   : > { %3066 = vmatpush.bf16.msra.mxu1 %v3014_v38 }
 0xf2e   : > { %3080 = vmatpush.bf16.msrb.mxu3 %v2986_v41  ;;  %v3153_v41 = vpop.permute.xlu2 %3152 }
 0xf2f   : > { %3067 = vmatpush.bf16.msra.mxu1 %v3012_v63 }
 0xf31   : > { %3275 = vmatmul.msk.bf16.vlgmr.msrb.gmra.mxu3 %vm3033_vm2, %v2950_v2  ;;  %v2982_v61 = vpop.permute.xlu1 %2981 }
 0xf32   : > { %3274 = vmatmul.msk.bf16.vlgmr.msra.gmra.mxu1 %vm3033_vm2, %v2950_v2  ;;  %v3011_v11 = vsel %vm5631_vm9, %v2982_v61, %v2984_v50 }
 0xf33   : > { %3054 = vmatpush.bf16.msra.mxu0 %v3011_v11 }
 0xf36   : > { %3273 = vmatmul.msk.bf16.vlgmr.msra.gmra.mxu0 %vm3033_vm2, %v2950_v2 }
 0xfaf   : > { %v3069_v56 = vpop.f32.mrf.mxu1 }
 0xfb0   : > { %v3087_v26 = vmul.f32 %v3069_v56, %v4273_v59 }
 0xfb3   : > { %v3056_v51 = vpop.f32.mrf.mxu0 }
 0xfb4   : > { %v3086_v19 = vmul.f32 %v3056_v51, %v4271_v58  ;;  %v3082_v44 = vpop.f32.mrf.mxu3 }
 0xfb5   : > { %v3088_v25 = vmul.f32 %v3082_v44, %v4269_v48 }
 0xfb6   : > { %v3089_v33 = vadd.f32 %v3087_v26, %v3086_v19 }
 0xfb7   : > { %v3090_v1 = vsel %vm5632_vm4, %v3088_v25, 0.0  ;;  %v3071_v5 = vpop.f32.mrf.mxu1 }
 0xfb8   : > { %v3091_v12 = vadd.f32 %v3090_v1, %v3089_v33  ;;  %v3165_v33 = vpop.permute.xlu2 %3164 }
 0xfba   : > { %3092 = vadd.xlane.f32.xlu0 %v3091_v12 }
 0xfbb   : > { %v3058_v40 = vpop.f32.mrf.mxu0 }
 0xfbc   : > { %v3084_v16 = vpop.f32.mrf.mxu3 }
0x102d   : > { %v3093_v29 = vpop.xlane.xlu0 %3092 }
0x102e   : > { %v3094_v14 = vrot.slane %v3093_v29, 4 }
0x1030   : > { %v3095_v62 = vadd.f32 %v3094_v14, %v3093_v29 }
0x1032   : > { %v3096_v10 = vrot.slane %v3095_v62, 2 }
0x1034   : > { %v3097_v13 = vadd.f32 %v3096_v10, %v3095_v62 }
0x1036   : > { %v3098_v30 = vrot.slane %v3097_v13, 1 }
0x1038   : > { %v3099_v43 = vadd.f32 %v3098_v30, %v3097_v13 }
0x103a   : > { %3296 = vpush %v3099_v43 }
0x106b   : > { %s3297_s0 = spop %3296 }
0x106c   : > { %v3101_v55 = vstv %s3297_s0 }
0x106d   : > { %v3102_v47 = vmul.f32 0.00048828125, %v3101_v55 }
0x106f   : > { %v3103_v27 = vsub.f32 %v3086_v19, %v3102_v47  ;;  %v3104_v57 = vsub.f32 %v3087_v26, %v3102_v47  ;;  %v3105_v7 = vsub.f32 %v3088_v25, %v3102_v47 }
0x1071   : > { %v3106_v32 = vmul.f32 %v3103_v27, %v3103_v27  ;;  %v3107_v23 = vmul.f32 %v3104_v57, %v3104_v57  ;;  %v3108_v24 = vmul.f32 %v3105_v7, %v3105_v7 }
0x1073   : > { %v3109_v53 = vmul.f32 %v3106_v32, %v4271_v58  ;;  %v3110_v34 = vmul.f32 %v3107_v23, %v4273_v59  ;;  %v3111_v37 = vmul.f32 %v3108_v24, %v4269_v48 }
0x1075   : > { %v3112_v45 = vadd.f32 %v3110_v34, %v3109_v53  ;;  %v3113_v0 = vsel %vm5633_vm10, %v3111_v37, 0.0 }
0x1077   : > { %v3114_v21 = vadd.f32 %v3113_v0, %v3112_v45 }
0x1079   : > { %3115 = vadd.xlane.f32.xlu1 %v3114_v21 }
0x10ec   : > { %v3116_v4 = vpop.xlane.xlu1 %3115 }
0x10ed   : > { %v3117_v28 = vrot.slane %v3116_v4, 4 }
0x10ef   : > { %v3118_v49 = vadd.f32 %v3117_v28, %v3116_v4 }
0x10f1   : > { %v3119_v60 = vrot.slane %v3118_v49, 2 }
0x10f3   : > { %v3120_v20 = vadd.f32 %v3119_v60, %v3118_v49 }
0x10f5   : > { %v3121_v8 = vrot.slane %v3120_v20, 1 }
0x10f7   : > { %v3122_v36 = vadd.f32 %v3121_v8, %v3120_v20 }
0x10f9   : > { %3298 = vpush %v3122_v36 }
0x112a   : > { %s3299_s24 = spop %3298 }
0x112b   : > { %v3124_v54 = vstv %s3299_s24 }
0x112c   : > { %v3125_v18 = vmul.f32 0.00048828125, %v3124_v54 }
0x112e   : > { %v3126_v3 = vadd.f32 1e-05, %v3125_v18 }
0x1130   : > { %3859 = vrsqrt.f32 %v3126_v3  ;;  %vm3133_vm13 = vweird.f32 %v3126_v3 }
0x1136   : > { %v3860_v31 = vpop.eup %3859 }
0x1137   : > { %v3128_v17 = vmul.f32 %v3860_v31, %v3126_v3  ;;  %vm3134_vm12 = vweird.f32 %v3860_v31 }
0x1138   : > { %vm3135_vm15 = vmor %vm3133_vm13, %vm3134_vm12 }
0x1139   : > { %v3129_v6 = vmul.f32 %v3860_v31, %v3128_v17 }
0x113b   : > { %v3130_v39 = vmul.f32 0.5, %v3129_v6 }
0x113d   : > { %v3131_v35 = vsub.f32 1.5, %v3130_v39 }
0x113f   : > { %v3132_v9 = vmul.f32 %v3860_v31, %v3131_v35 }
0x1141   : > { %v3136_v46 = vsel %vm3135_vm15, %v3860_v31, %v3132_v9 }
0x1142   : > { %v3137_v38 = vmul.f32 %v3136_v46, %v3103_v27  ;;  %v3138_v50 = vmul.f32 %v3136_v46, %v3104_v57  ;;  %v3139_v63 = vmul.f32 %v3136_v46, %v3105_v7 }
0x1144   : > { %v3146_v2 = vmul.f32 %v3144_v22, %v3137_v38  ;;  %v3147_v61 = vmul.f32 %v3144_v22, %v3138_v50  ;;  %v3148_v11 = vmul.f32 %v3144_v22, %v3139_v63 }
0x1146   : > { %v3155_v56 = vadd.f32 %v3153_v41, %v3146_v2  ;;  %v3156_v26 = vadd.f32 %v3153_v41, %v3147_v61  ;;  %v3157_v51 = vadd.f32 %v3153_v41, %v3148_v11 }
0x1148   : > { %v3158_v19 = vmul.f32 %v3155_v56, %v4271_v58  ;;  %v3159_v44 = vmul.f32 %v3156_v26, %v4273_v59  ;;  %v3160_v25 = vmul.f32 %v3157_v51, %v4269_v48 }
0x114a   : > { %v3167_v1 = vadd.f32 %v3165_v33, %v3158_v19  ;;  %v3168_v5 = vadd.f32 %v3165_v33, %v3159_v44  ;;  %v3169_v12 = vadd.f32 %v3165_v33, %v3160_v25 }
0x114c   : > { %3170 = vst [vmem:[%s511_s22] sm:$0xff] %v3167_v1 }
0x114d   : > { %3171 = vst [vmem:[%s511_s22 + $0x8] sm:$0xff] %v3168_v5 }
0x114e   : > { %3172 = vst.msk [vmem:[%s511_s22 + $0x10] sm:$0xff] %vm5634_vm11, %v3169_v12 }
0x114f PF: > { %s25_s18 = sadd.s32 1, %s3873_s18  }
0x1150   : > { %p22_p4 = scmp.ge.s32.totalorder %s25_s18, 4  }
0x1152   :  { %24 = sbr.rel (!%p22_p4) target bundleno = 2 (0x2), region = 113 }

</bundles_post_ra>
